<compile_context>
chip_gen: v7x
topology: tpu7x:2x2x1
jax: 0.10.0
libtpu: 0.0.40
codegen_flags: <defaults>
</compile_context>

<pallas_src>
import numpy as np
import jax
import jax.numpy as jnp
from jax.experimental import pallas as pl
from jax.experimental.pallas import tpu as pltpu


def _round_up(x, m):
    return ((x + m - 1) // m) * m


# ---------------------------------------------------------------------------
# Kernel 1: batch-tiled Caser feature extractor (horizontal + vertical convs,
# ReLU, and the reference's reshape+max_pool1d pooling).
# ---------------------------------------------------------------------------
def _make_feature_kernel(filter_sizes, L, W, F, TB, H):
    n_conv = len(filter_sizes)

    def kernel(*refs):
        x_ref = refs[0]                                   # (L, TB, W)
        xcol_refs = refs[1:1 + n_conv]                    # (Lp_j, TB, fs_j*W)
        k_refs = refs[1 + n_conv:1 + 2 * n_conv]          # (fs_j*W, 2F)
        b_refs = refs[1 + 2 * n_conv:1 + 3 * n_conv]      # (1, F)
        wv_ref = refs[1 + 3 * n_conv]                     # (L, 1, W)
        bv_ref = refs[2 + 3 * n_conv]                     # (1, 1)
        hraw_ref = refs[3 + 3 * n_conv]                   # (TB, 2*F*n_conv)
        vfeat_ref = refs[4 + 3 * n_conv]                  # (TB, H)

        # ---- vertical Conv2d(1, 1, (L, 1)):  v[b, w] = relu(bv + sum_l x*wv)
        v = jnp.zeros((TB, W), jnp.float32)
        for l in range(L):                                # static unroll (L = 20)
            v = v + x_ref[l] * wv_ref[l]                  # (TB, W) * (1, W)
        v = jnp.maximum(v + bv_ref[...], 0.0)
        vfeat_ref[...] = v[:, :H]                         # drop the rate column

        # helpers shared by all horizontal conv banks
        lane = jax.lax.broadcasted_iota(jnp.int32, (TB, 2 * F), 1)
        is_w0 = lane < F                                  # lanes [0,F): conv width-pos 0
        neg_inf = jnp.full((TB, 2 * F), -jnp.inf, jnp.float32)

        # ---- horizontal Conv2d(1, F, (fs, H)) banks + faithful pooling -----
        # h_i = xcol[i] @ K2 gives lanes [0,F) = conv(..., w=0), [F,2F) = w=1.
        # The reference does relu -> view(B,F,Lp,2)->(2B,F,Lp) -> max over Lp,
        # which (per flat-index analysis) equals, per filter f:
        #   row 2b  : max over {h0[l], l < ceil(Lp/2)} U {h1[l], l < floor(Lp/2)}
        #   row 2b+1: max over the complements.
        # relu / bias are monotonic, so they are applied after the running max.
        for j, fs in enumerate(filter_sizes):
            Lp = L - fs + 1
            c0 = (Lp + 1) // 2
            c1 = Lp // 2
            k2 = k_refs[j][...]                            # (fs*W, 2F)
            p_first = neg_inf
            p_second = neg_inf
            for i in range(Lp):                            # static unroll
                h_i = jnp.dot(xcol_refs[j][i], k2,
                              preferred_element_type=jnp.float32)   # (TB, 2F)
                in0 = i < c0
                in1 = i < c1
                if in0 and in1:
                    p_first = jnp.maximum(p_first, h_i)
                elif (not in0) and (not in1):
                    p_second = jnp.maximum(p_second, h_i)
                else:   # c1 <= i < c0 (only when Lp is odd)
                    p_first = jnp.where(is_w0, jnp.maximum(p_first, h_i), p_first)
                    p_second = jnp.where(is_w0, p_second,
                                         jnp.maximum(p_second, h_i))
            bias = b_refs[j][...]                          # (1, F)
            m0 = jnp.maximum(jnp.maximum(p_first[:, :F], p_first[:, F:]) + bias, 0.0)
            m1 = jnp.maximum(jnp.maximum(p_second[:, :F], p_second[:, F:]) + bias, 0.0)
            col = j * 2 * F
            hraw_ref[:, col:col + F] = m0                  # "even row" pooled feats
            hraw_ref[:, col + F:col + 2 * F] = m1          # "odd row"  pooled feats

    return kernel


# ---------------------------------------------------------------------------
# Kernel 2: lane-dense tiled final projection  (2B, D) @ (D, Npad) + bias
# ---------------------------------------------------------------------------
def _proj_kernel(a_ref, w_ref, b_ref, o_ref):
    o_ref[...] = jnp.dot(a_ref[...], w_ref[...],
                         preferred_element_type=jnp.float32) + b_ref[...]


# ---------------------------------------------------------------------------
# Forward wrapper
# ---------------------------------------------------------------------------
def caser_ctr_forward(params, states, state_rate, len_states, *,
                      num_filters, filter_sizes, batch_tile=128):
    item_emb = params["item_emb"]                  # (item_num+1, H)
    H = item_emb.shape[1]
    W = H + 1
    B, L = states.shape
    F = num_filters
    n_conv = len(filter_sizes)
    Ftot = F * n_conv
    wfc = params["wfc"]                            # (Ftot + H, item_num)
    item_num = wfc.shape[1]

    # ------------- glue: embedding lookup, rate concat, length mask ---------
    x = jnp.take(item_emb, states, axis=0)                        # (B, L, H)
    rate = state_rate.reshape(-1, L, 1).astype(jnp.float32)       # reference: view(-1, 20, 1)
    x = jnp.concatenate([x, rate], axis=2)                        # (B, L, W)
    mask = (jnp.arange(L)[None, :] < len_states[:, None]).astype(jnp.float32)
    x = x * mask[:, :, None]

    # ------------- batch tiling / padding ------------------------------------
    TB = min(batch_tile, _round_up(B, 8))
    Bp = _round_up(B, TB)
    if Bp != B:
        x = jnp.pad(x, ((0, Bp - B), (0, 0), (0, 0)))

    x_lbw = jnp.transpose(x, (1, 0, 2))                           # (L, Bp, W)
    xcols = []
    for fs in filter_sizes:                                       # im2col per filter size
        Lp = L - fs + 1
        xc = jnp.concatenate([x[:, d:d + Lp, :] for d in range(fs)], axis=2)
        xcols.append(jnp.transpose(xc, (1, 0, 2)))                # (Lp, Bp, fs*W)

    # ------------- conv weight prep (torch layouts -> matmul layouts) -------
    k2s, biases = [], []
    for j, fs in enumerate(filter_sizes):
        wgt = params["hconv_w"][j]                                # (F, 1, fs, H)
        kt = jnp.transpose(wgt[:, 0], (1, 2, 0)).astype(jnp.float32)  # (fs, H, F)
        zrow = jnp.zeros((fs, 1, F), jnp.float32)
        k0 = jnp.concatenate([kt, zrow], axis=1)                  # width position 0
        k1 = jnp.concatenate([zrow, kt], axis=1)                  # width position 1
        k2s.append(jnp.concatenate([k0, k1], axis=2).reshape(fs * W, 2 * F))
        biases.append(params["hconv_b"][j].reshape(1, F).astype(jnp.float32))
    wv = jnp.broadcast_to(params["vconv_w"].reshape(L, 1, 1), (L, 1, W)).astype(jnp.float32)
    bv = params["vconv_b"].reshape(1, 1).astype(jnp.float32)

    # ------------- Pallas feature kernel -------------------------------------
    in_specs = [pl.BlockSpec((L, TB, W), lambda i: (0, i, 0))]
    for fs in filter_sizes:
        Lp = L - fs + 1
        in_specs.append(pl.BlockSpec((Lp, TB, fs * W), lambda i: (0, i, 0)))
    for fs in filter_sizes:
        in_specs.append(pl.BlockSpec((fs * W, 2 * F), lambda i: (0, 0)))
    for _ in filter_sizes:
        in_specs.append(pl.BlockSpec((1, F), lambda i: (0, 0)))
    in_specs.append(pl.BlockSpec((L, 1, W), lambda i: (0, 0, 0)))
    in_specs.append(pl.BlockSpec((1, 1), lambda i: (0, 0)))

    kernel = _make_feature_kernel(tuple(filter_sizes), L, W, F, TB, H)
    hraw, vfeat = pl.pallas_call(
        kernel,
        grid=(Bp // TB,),
        in_specs=in_specs,
        out_specs=(pl.BlockSpec((TB, 2 * Ftot), lambda i: (i, 0)),
                   pl.BlockSpec((TB, H), lambda i: (i, 0))),
        out_shape=(jax.ShapeDtypeStruct((Bp, 2 * Ftot), jnp.float32),
                   jax.ShapeDtypeStruct((Bp, H), jnp.float32)),
        compiler_params=pltpu.CompilerParams(dimension_semantics=("parallel",)),
    )(x_lbw, *xcols, *k2s, *biases, wv, bv)

    hraw = hraw[:B]
    vfeat = vfeat[:B]

    # ------------- glue: reproduce the reference's feature ordering ---------
    # h_pool_flat[2b+s, j*F+g] = hraw[b, j*2F + p*F + f]  with t=s*F+g, f=t//2, p=t%2
    perms = []
    for s in range(2):
        ps = []
        for c in range(Ftot):
            j, g = divmod(c, F)
            t = s * F + g
            f, p = t // 2, t % 2
            ps.append(j * 2 * F + p * F + f)
        perms.append(jnp.asarray(ps, dtype=jnp.int32))
    h_rows = [hraw[:, perms[0]], hraw[:, perms[1]]]               # (B, Ftot) each
    h_pool_flat = jnp.stack(h_rows, axis=1).reshape(2 * B, Ftot)  # (2B, Ftot)
    v_flat = jnp.concatenate([vfeat, vfeat], axis=0)              # (2B, H)
    feats = jnp.concatenate([h_pool_flat, v_flat], axis=1)        # (2B, Ftot+H)
    # nn.Dropout is identity at inference.

    # ------------- Pallas projection kernel (lane-dense, N padded to 128) ---
    Dfin = Ftot + H
    M = 2 * B
    tm = min(256, _round_up(M, 8))
    Mp = _round_up(M, tm)
    tn = 128
    Np = _round_up(item_num, tn)
    feats_p = jnp.pad(feats, ((0, Mp - M), (0, 0)))
    wfc_p = jnp.pad(wfc.astype(jnp.float32), ((0, 0), (0, Np - item_num)))
    bfc_p = jnp.pad(params["bfc"].reshape(1, item_num).astype(jnp.float32),
                    ((0, 0), (0, Np - item_num)))

    logits = pl.pallas_call(
        _proj_kernel,
        grid=(Mp // tm, Np // tn),
        in_specs=[pl.BlockSpec((tm, Dfin), lambda i, j: (i, 0)),
                  pl.BlockSpec((Dfin, tn), lambda i, j: (0, j)),
                  pl.BlockSpec((1, tn), lambda i, j: (0, j))],
        out_specs=pl.BlockSpec((tm, tn), lambda i, j: (i, j)),
        out_shape=jax.ShapeDtypeStruct((Mp, Np), jnp.float32),
        compiler_params=pltpu.CompilerParams(
            dimension_semantics=("parallel", "parallel")),
    )(feats_p, wfc_p, bfc_p)

    return logits[:M, :item_num]


# ---------------------------------------------------------------------------
# Parameter init (shapes/semantics of the PyTorch module; exact init dists
# are irrelevant for the forward-pass check).
# ---------------------------------------------------------------------------
def init_params(key, hidden_size, item_num, state_size, num_filters, filter_sizes):
    keys = jax.random.split(key, 4 + 2 * len(filter_sizes))
    H = hidden_size
    final_dim = H + num_filters * len(filter_sizes)
    lim = 1.0 / np.sqrt(final_dim)
    params = {
        "item_emb": 0.01 * jax.random.normal(keys[0], (item_num + 1, H), jnp.float32),
        "hconv_w": [],
        "hconv_b": [],
        "vconv_w": jax.random.normal(keys[1], (1, 1, state_size, 1), jnp.float32)
                   * np.sqrt(2.0 / (state_size + 1.0)),
        "vconv_b": jnp.full((1,), 0.1, jnp.float32),
        "wfc": jax.random.uniform(keys[2], (final_dim, item_num), jnp.float32, -lim, lim),
        "bfc": jax.random.uniform(keys[3], (item_num,), jnp.float32, -lim, lim),
    }
    for j, fs in enumerate(filter_sizes):
        fan_in = fs * H
        fan_out = num_filters * fs * H
        std = np.sqrt(2.0 / (fan_in + fan_out))
        params["hconv_w"].append(
            std * jax.random.normal(keys[4 + 2 * j], (num_filters, 1, fs, H), jnp.float32))
        params["hconv_b"].append(jnp.full((num_filters,), 0.1, jnp.float32))
    return params


# ---------------------------------------------------------------------------
# Literal numpy transcription of the PyTorch forward (for self-checking).
# ---------------------------------------------------------------------------
def _reference_numpy(params, states, state_rate, len_states,
                     filter_sizes, num_filters, hidden_size):
    emb = np.asarray(params["item_emb"])
    x = emb[np.asarray(states)]                                    # (B, L, H)
    rate = np.asarray(state_rate, np.float32).reshape(-1, 20, 1)
    x = np.concatenate([x, rate], axis=2)                          # (B, L, W)
    B, L, W = x.shape
    lens = np.asarray(len_states)
    mask = (np.arange(L)[None, :] < lens[:, None]).astype(np.float32)[:, :, None]
    x = x * mask
    pooled = []
    for j, fs in enumerate(filter_sizes):
        wgt = np.asarray(params["hconv_w"][j])                     # (F, 1, fs, H)
        b = np.asarray(params["hconv_b"][j])
        Lp = L - fs + 1
        h = np.zeros((B, num_filters, Lp, 2), np.float32)
        for i in range(Lp):
            for w0 in range(2):
                window = x[:, i:i + fs, w0:w0 + hidden_size]       # (B, fs, H)
                h[:, :, i, w0] = np.einsum("bdh,fdh->bf", window, wgt[:, 0]) + b[None, :]
        h = np.maximum(h, 0.0)
        hr = h.reshape(2 * B, num_filters, Lp)                     # == .view(-1, F, Lp)
        pooled.append(hr.max(axis=-1))                             # == max_pool1d
    h_pool_flat = np.concatenate(pooled, axis=1)                   # (2B, Ftot)
    wv = np.asarray(params["vconv_w"]).reshape(-1)
    bv = float(np.asarray(params["vconv_b"]).reshape(()))
    v = np.maximum(np.einsum("blw,l->bw", x, wv) + bv, 0.0)        # (B, W)
    v_flat = np.concatenate([v, v], axis=0)[:, :hidden_size]       # (2B, H)
    out = np.concatenate([h_pool_flat, v_flat], axis=1)
    wfc = np.asarray(params["wfc"])
    bfc = np.asarray(params["bfc"]).reshape(-1)
    return out @ wfc + bfc[None, :]


if __name__ == "__main__":
    hidden_size = 32
    item_num = 64
    state_size = 20           # forward hard-codes state_rate.view(-1, 20, 1)
    num_filters = 16
    filter_sizes = [2, 3, 4]
    batch = 2

    root = jax.random.PRNGKey(0)
    kp, ks, kr = jax.random.split(root, 3)
    params = init_params(kp, hidden_size, item_num, state_size, num_filters, filter_sizes)

    states = jax.random.randint(ks, (batch, state_size), 0, item_num + 1, dtype=jnp.int32)
    state_rate = jax.random.uniform(kr, (batch, state_size), jnp.float32, 0.0, 5.0)
    len_states = jnp.array([state_size, 7], dtype=jnp.int32)

    out = caser_ctr_forward(params, states, state_rate, len_states,
                            num_filters=num_filters, filter_sizes=filter_sizes)
    out = jax.block_until_ready(out)
    assert out.shape == (2 * batch, item_num)          # Caser CTR forward returns 2B rows
    assert bool(jnp.all(jnp.isfinite(out)))

    ref = _reference_numpy(params, states, state_rate, len_states,
                           filter_sizes, num_filters, hidden_size)
    err = float(np.max(np.abs(np.asarray(out) - ref)))
    scale = float(np.max(np.abs(ref))) + 1e-6
    assert err / scale < 5e-2, f"mismatch vs reference: rel err {err / scale:.3e}"
    print("KERNEL_OK")
</pallas_src>

<mosaic_0001>
module attributes {stable_mosaic.version = 11 : i64} {
  func.func @kernel(%arg0: i32, %arg1: memref<20x8x33xf32, #tpu.memory_space<vmem>>, %arg2: memref<19x8x66xf32, #tpu.memory_space<vmem>>, %arg3: memref<18x8x99xf32, #tpu.memory_space<vmem>>, %arg4: memref<17x8x132xf32, #tpu.memory_space<vmem>>, %arg5: memref<66x32xf32, #tpu.memory_space<vmem>>, %arg6: memref<99x32xf32, #tpu.memory_space<vmem>>, %arg7: memref<132x32xf32, #tpu.memory_space<vmem>>, %arg8: memref<1x16xf32, #tpu.memory_space<vmem>>, %arg9: memref<1x16xf32, #tpu.memory_space<vmem>>, %arg10: memref<1x16xf32, #tpu.memory_space<vmem>>, %arg11: memref<20x1x33xf32, #tpu.memory_space<vmem>>, %arg12: memref<1x1xf32, #tpu.memory_space<vmem>>, %arg13: memref<8x96xf32, #tpu.memory_space<vmem>>, %arg14: memref<8x32xf32, #tpu.memory_space<vmem>>) attributes {dimension_semantics = [#tpu.dimension_semantics<parallel>], iteration_bounds = array<i64: 1>, scalar_prefetch = 0 : i64, scratch_operands = 0 : i64, tpu.core_type = #tpu.core_type<tc>, window_params = [{transform_indices = @transform_0, window_bounds = array<i64: 20, 8, 33>}, {transform_indices = @transform_1, window_bounds = array<i64: 19, 8, 66>}, {transform_indices = @transform_2, window_bounds = array<i64: 18, 8, 99>}, {transform_indices = @transform_3, window_bounds = array<i64: 17, 8, 132>}, {pipeline_mode = #tpu.pipeline_mode<synchronous>, transform_indices = @transform_4, window_bounds = array<i64: 66, 32>}, {pipeline_mode = #tpu.pipeline_mode<synchronous>, transform_indices = @transform_5, window_bounds = array<i64: 99, 32>}, {pipeline_mode = #tpu.pipeline_mode<synchronous>, transform_indices = @transform_6, window_bounds = array<i64: 132, 32>}, {pipeline_mode = #tpu.pipeline_mode<synchronous>, transform_indices = @transform_7, window_bounds = array<i64: 1, 16>}, {pipeline_mode = #tpu.pipeline_mode<synchronous>, transform_indices = @transform_8, window_bounds = array<i64: 1, 16>}, {pipeline_mode = #tpu.pipeline_mode<synchronous>, transform_indices = @transform_9, window_bounds = array<i64: 1, 16>}, {pipeline_mode = #tpu.pipeline_mode<synchronous>, transform_indices = @transform_10, window_bounds = array<i64: 20, 1, 33>}, {pipeline_mode = #tpu.pipeline_mode<synchronous>, transform_indices = @transform_11, window_bounds = array<i64: 1, 1>}, {transform_indices = @transform_12, window_bounds = array<i64: 8, 96>}, {transform_indices = @transform_13, window_bounds = array<i64: 8, 32>}]} {
    %cst = arith.constant 0.000000e+00 : f32
    %0 = vector.broadcast %cst : f32 to vector<8x33xf32>
    %c0 = arith.constant 0 : index
    %c0_0 = arith.constant 0 : index
    %c0_1 = arith.constant 0 : index
    %1 = vector.load %arg1[%c0, %c0_0, %c0_1] : memref<20x8x33xf32, #tpu.memory_space<vmem>>, vector<1x8x33xf32>
    %2 = vector.shape_cast %1 : vector<1x8x33xf32> to vector<8x33xf32>
    %c0_2 = arith.constant 0 : index
    %c0_3 = arith.constant 0 : index
    %c0_4 = arith.constant 0 : index
    %3 = vector.load %arg11[%c0_2, %c0_3, %c0_4] : memref<20x1x33xf32, #tpu.memory_space<vmem>>, vector<1x1x33xf32>
    %4 = vector.shape_cast %3 : vector<1x1x33xf32> to vector<1x33xf32>
    %5 = vector.broadcast %4 : vector<1x33xf32> to vector<8x33xf32>
    %6 = arith.mulf %2, %5 : vector<8x33xf32>
    %7 = arith.addf %0, %6 : vector<8x33xf32>
    %c1 = arith.constant 1 : index
    %c0_5 = arith.constant 0 : index
    %c0_6 = arith.constant 0 : index
    %8 = vector.load %arg1[%c1, %c0_5, %c0_6] : memref<20x8x33xf32, #tpu.memory_space<vmem>>, vector<1x8x33xf32>
    %9 = vector.shape_cast %8 : vector<1x8x33xf32> to vector<8x33xf32>
    %c1_7 = arith.constant 1 : index
    %c0_8 = arith.constant 0 : index
    %c0_9 = arith.constant 0 : index
    %10 = vector.load %arg11[%c1_7, %c0_8, %c0_9] : memref<20x1x33xf32, #tpu.memory_space<vmem>>, vector<1x1x33xf32>
    %11 = vector.shape_cast %10 : vector<1x1x33xf32> to vector<1x33xf32>
    %12 = vector.broadcast %11 : vector<1x33xf32> to vector<8x33xf32>
    %13 = arith.mulf %9, %12 : vector<8x33xf32>
    %14 = arith.addf %7, %13 : vector<8x33xf32>
    %c2 = arith.constant 2 : index
    %c0_10 = arith.constant 0 : index
    %c0_11 = arith.constant 0 : index
    %15 = vector.load %arg1[%c2, %c0_10, %c0_11] : memref<20x8x33xf32, #tpu.memory_space<vmem>>, vector<1x8x33xf32>
    %16 = vector.shape_cast %15 : vector<1x8x33xf32> to vector<8x33xf32>
    %c2_12 = arith.constant 2 : index
    %c0_13 = arith.constant 0 : index
    %c0_14 = arith.constant 0 : index
    %17 = vector.load %arg11[%c2_12, %c0_13, %c0_14] : memref<20x1x33xf32, #tpu.memory_space<vmem>>, vector<1x1x33xf32>
    %18 = vector.shape_cast %17 : vector<1x1x33xf32> to vector<1x33xf32>
    %19 = vector.broadcast %18 : vector<1x33xf32> to vector<8x33xf32>
    %20 = arith.mulf %16, %19 : vector<8x33xf32>
    %21 = arith.addf %14, %20 : vector<8x33xf32>
    %c3 = arith.constant 3 : index
    %c0_15 = arith.constant 0 : index
    %c0_16 = arith.constant 0 : index
    %22 = vector.load %arg1[%c3, %c0_15, %c0_16] : memref<20x8x33xf32, #tpu.memory_space<vmem>>, vector<1x8x33xf32>
    %23 = vector.shape_cast %22 : vector<1x8x33xf32> to vector<8x33xf32>
    %c3_17 = arith.constant 3 : index
    %c0_18 = arith.constant 0 : index
    %c0_19 = arith.constant 0 : index
    %24 = vector.load %arg11[%c3_17, %c0_18, %c0_19] : memref<20x1x33xf32, #tpu.memory_space<vmem>>, vector<1x1x33xf32>
    %25 = vector.shape_cast %24 : vector<1x1x33xf32> to vector<1x33xf32>
    %26 = vector.broadcast %25 : vector<1x33xf32> to vector<8x33xf32>
    %27 = arith.mulf %23, %26 : vector<8x33xf32>
    %28 = arith.addf %21, %27 : vector<8x33xf32>
    %c4 = arith.constant 4 : index
    %c0_20 = arith.constant 0 : index
    %c0_21 = arith.constant 0 : index
    %29 = vector.load %arg1[%c4, %c0_20, %c0_21] : memref<20x8x33xf32, #tpu.memory_space<vmem>>, vector<1x8x33xf32>
    %30 = vector.shape_cast %29 : vector<1x8x33xf32> to vector<8x33xf32>
    %c4_22 = arith.constant 4 : index
    %c0_23 = arith.constant 0 : index
    %c0_24 = arith.constant 0 : index
    %31 = vector.load %arg11[%c4_22, %c0_23, %c0_24] : memref<20x1x33xf32, #tpu.memory_space<vmem>>, vector<1x1x33xf32>
    %32 = vector.shape_cast %31 : vector<1x1x33xf32> to vector<1x33xf32>
    %33 = vector.broadcast %32 : vector<1x33xf32> to vector<8x33xf32>
    %34 = arith.mulf %30, %33 : vector<8x33xf32>
    %35 = arith.addf %28, %34 : vector<8x33xf32>
    %c5 = arith.constant 5 : index
    %c0_25 = arith.constant 0 : index
    %c0_26 = arith.constant 0 : index
    %36 = vector.load %arg1[%c5, %c0_25, %c0_26] : memref<20x8x33xf32, #tpu.memory_space<vmem>>, vector<1x8x33xf32>
    %37 = vector.shape_cast %36 : vector<1x8x33xf32> to vector<8x33xf32>
    %c5_27 = arith.constant 5 : index
    %c0_28 = arith.constant 0 : index
    %c0_29 = arith.constant 0 : index
    %38 = vector.load %arg11[%c5_27, %c0_28, %c0_29] : memref<20x1x33xf32, #tpu.memory_space<vmem>>, vector<1x1x33xf32>
    %39 = vector.shape_cast %38 : vector<1x1x33xf32> to vector<1x33xf32>
    %40 = vector.broadcast %39 : vector<1x33xf32> to vector<8x33xf32>
    %41 = arith.mulf %37, %40 : vector<8x33xf32>
    %42 = arith.addf %35, %41 : vector<8x33xf32>
    %c6 = arith.constant 6 : index
    %c0_30 = arith.constant 0 : index
    %c0_31 = arith.constant 0 : index
    %43 = vector.load %arg1[%c6, %c0_30, %c0_31] : memref<20x8x33xf32, #tpu.memory_space<vmem>>, vector<1x8x33xf32>
    %44 = vector.shape_cast %43 : vector<1x8x33xf32> to vector<8x33xf32>
    %c6_32 = arith.constant 6 : index
    %c0_33 = arith.constant 0 : index
    %c0_34 = arith.constant 0 : index
    %45 = vector.load %arg11[%c6_32, %c0_33, %c0_34] : memref<20x1x33xf32, #tpu.memory_space<vmem>>, vector<1x1x33xf32>
    %46 = vector.shape_cast %45 : vector<1x1x33xf32> to vector<1x33xf32>
    %47 = vector.broadcast %46 : vector<1x33xf32> to vector<8x33xf32>
    %48 = arith.mulf %44, %47 : vector<8x33xf32>
    %49 = arith.addf %42, %48 : vector<8x33xf32>
    %c7 = arith.constant 7 : index
    %c0_35 = arith.constant 0 : index
    %c0_36 = arith.constant 0 : index
    %50 = vector.load %arg1[%c7, %c0_35, %c0_36] : memref<20x8x33xf32, #tpu.memory_space<vmem>>, vector<1x8x33xf32>
    %51 = vector.shape_cast %50 : vector<1x8x33xf32> to vector<8x33xf32>
    %c7_37 = arith.constant 7 : index
    %c0_38 = arith.constant 0 : index
    %c0_39 = arith.constant 0 : index
    %52 = vector.load %arg11[%c7_37, %c0_38, %c0_39] : memref<20x1x33xf32, #tpu.memory_space<vmem>>, vector<1x1x33xf32>
    %53 = vector.shape_cast %52 : vector<1x1x33xf32> to vector<1x33xf32>
    %54 = vector.broadcast %53 : vector<1x33xf32> to vector<8x33xf32>
    %55 = arith.mulf %51, %54 : vector<8x33xf32>
    %56 = arith.addf %49, %55 : vector<8x33xf32>
    %c8 = arith.constant 8 : index
    %c0_40 = arith.constant 0 : index
    %c0_41 = arith.constant 0 : index
    %57 = vector.load %arg1[%c8, %c0_40, %c0_41] : memref<20x8x33xf32, #tpu.memory_space<vmem>>, vector<1x8x33xf32>
    %58 = vector.shape_cast %57 : vector<1x8x33xf32> to vector<8x33xf32>
    %c8_42 = arith.constant 8 : index
    %c0_43 = arith.constant 0 : index
    %c0_44 = arith.constant 0 : index
    %59 = vector.load %arg11[%c8_42, %c0_43, %c0_44] : memref<20x1x33xf32, #tpu.memory_space<vmem>>, vector<1x1x33xf32>
    %60 = vector.shape_cast %59 : vector<1x1x33xf32> to vector<1x33xf32>
    %61 = vector.broadcast %60 : vector<1x33xf32> to vector<8x33xf32>
    %62 = arith.mulf %58, %61 : vector<8x33xf32>
    %63 = arith.addf %56, %62 : vector<8x33xf32>
    %c9 = arith.constant 9 : index
    %c0_45 = arith.constant 0 : index
    %c0_46 = arith.constant 0 : index
    %64 = vector.load %arg1[%c9, %c0_45, %c0_46] : memref<20x8x33xf32, #tpu.memory_space<vmem>>, vector<1x8x33xf32>
    %65 = vector.shape_cast %64 : vector<1x8x33xf32> to vector<8x33xf32>
    %c9_47 = arith.constant 9 : index
    %c0_48 = arith.constant 0 : index
    %c0_49 = arith.constant 0 : index
    %66 = vector.load %arg11[%c9_47, %c0_48, %c0_49] : memref<20x1x33xf32, #tpu.memory_space<vmem>>, vector<1x1x33xf32>
    %67 = vector.shape_cast %66 : vector<1x1x33xf32> to vector<1x33xf32>
    %68 = vector.broadcast %67 : vector<1x33xf32> to vector<8x33xf32>
    %69 = arith.mulf %65, %68 : vector<8x33xf32>
    %70 = arith.addf %63, %69 : vector<8x33xf32>
    %c10 = arith.constant 10 : index
    %c0_50 = arith.constant 0 : index
    %c0_51 = arith.constant 0 : index
    %71 = vector.load %arg1[%c10, %c0_50, %c0_51] : memref<20x8x33xf32, #tpu.memory_space<vmem>>, vector<1x8x33xf32>
    %72 = vector.shape_cast %71 : vector<1x8x33xf32> to vector<8x33xf32>
    %c10_52 = arith.constant 10 : index
    %c0_53 = arith.constant 0 : index
    %c0_54 = arith.constant 0 : index
    %73 = vector.load %arg11[%c10_52, %c0_53, %c0_54] : memref<20x1x33xf32, #tpu.memory_space<vmem>>, vector<1x1x33xf32>
    %74 = vector.shape_cast %73 : vector<1x1x33xf32> to vector<1x33xf32>
    %75 = vector.broadcast %74 : vector<1x33xf32> to vector<8x33xf32>
    %76 = arith.mulf %72, %75 : vector<8x33xf32>
    %77 = arith.addf %70, %76 : vector<8x33xf32>
    %c11 = arith.constant 11 : index
    %c0_55 = arith.constant 0 : index
    %c0_56 = arith.constant 0 : index
    %78 = vector.load %arg1[%c11, %c0_55, %c0_56] : memref<20x8x33xf32, #tpu.memory_space<vmem>>, vector<1x8x33xf32>
    %79 = vector.shape_cast %78 : vector<1x8x33xf32> to vector<8x33xf32>
    %c11_57 = arith.constant 11 : index
    %c0_58 = arith.constant 0 : index
    %c0_59 = arith.constant 0 : index
    %80 = vector.load %arg11[%c11_57, %c0_58, %c0_59] : memref<20x1x33xf32, #tpu.memory_space<vmem>>, vector<1x1x33xf32>
    %81 = vector.shape_cast %80 : vector<1x1x33xf32> to vector<1x33xf32>
    %82 = vector.broadcast %81 : vector<1x33xf32> to vector<8x33xf32>
    %83 = arith.mulf %79, %82 : vector<8x33xf32>
    %84 = arith.addf %77, %83 : vector<8x33xf32>
    %c12 = arith.constant 12 : index
    %c0_60 = arith.constant 0 : index
    %c0_61 = arith.constant 0 : index
    %85 = vector.load %arg1[%c12, %c0_60, %c0_61] : memref<20x8x33xf32, #tpu.memory_space<vmem>>, vector<1x8x33xf32>
    %86 = vector.shape_cast %85 : vector<1x8x33xf32> to vector<8x33xf32>
    %c12_62 = arith.constant 12 : index
    %c0_63 = arith.constant 0 : index
    %c0_64 = arith.constant 0 : index
    %87 = vector.load %arg11[%c12_62, %c0_63, %c0_64] : memref<20x1x33xf32, #tpu.memory_space<vmem>>, vector<1x1x33xf32>
    %88 = vector.shape_cast %87 : vector<1x1x33xf32> to vector<1x33xf32>
    %89 = vector.broadcast %88 : vector<1x33xf32> to vector<8x33xf32>
    %90 = arith.mulf %86, %89 : vector<8x33xf32>
    %91 = arith.addf %84, %90 : vector<8x33xf32>
    %c13 = arith.constant 13 : index
    %c0_65 = arith.constant 0 : index
    %c0_66 = arith.constant 0 : index
    %92 = vector.load %arg1[%c13, %c0_65, %c0_66] : memref<20x8x33xf32, #tpu.memory_space<vmem>>, vector<1x8x33xf32>
    %93 = vector.shape_cast %92 : vector<1x8x33xf32> to vector<8x33xf32>
    %c13_67 = arith.constant 13 : index
    %c0_68 = arith.constant 0 : index
    %c0_69 = arith.constant 0 : index
    %94 = vector.load %arg11[%c13_67, %c0_68, %c0_69] : memref<20x1x33xf32, #tpu.memory_space<vmem>>, vector<1x1x33xf32>
    %95 = vector.shape_cast %94 : vector<1x1x33xf32> to vector<1x33xf32>
    %96 = vector.broadcast %95 : vector<1x33xf32> to vector<8x33xf32>
    %97 = arith.mulf %93, %96 : vector<8x33xf32>
    %98 = arith.addf %91, %97 : vector<8x33xf32>
    %c14 = arith.constant 14 : index
    %c0_70 = arith.constant 0 : index
    %c0_71 = arith.constant 0 : index
    %99 = vector.load %arg1[%c14, %c0_70, %c0_71] : memref<20x8x33xf32, #tpu.memory_space<vmem>>, vector<1x8x33xf32>
    %100 = vector.shape_cast %99 : vector<1x8x33xf32> to vector<8x33xf32>
    %c14_72 = arith.constant 14 : index
    %c0_73 = arith.constant 0 : index
    %c0_74 = arith.constant 0 : index
    %101 = vector.load %arg11[%c14_72, %c0_73, %c0_74] : memref<20x1x33xf32, #tpu.memory_space<vmem>>, vector<1x1x33xf32>
    %102 = vector.shape_cast %101 : vector<1x1x33xf32> to vector<1x33xf32>
    %103 = vector.broadcast %102 : vector<1x33xf32> to vector<8x33xf32>
    %104 = arith.mulf %100, %103 : vector<8x33xf32>
    %105 = arith.addf %98, %104 : vector<8x33xf32>
    %c15 = arith.constant 15 : index
    %c0_75 = arith.constant 0 : index
    %c0_76 = arith.constant 0 : index
    %106 = vector.load %arg1[%c15, %c0_75, %c0_76] : memref<20x8x33xf32, #tpu.memory_space<vmem>>, vector<1x8x33xf32>
    %107 = vector.shape_cast %106 : vector<1x8x33xf32> to vector<8x33xf32>
    %c15_77 = arith.constant 15 : index
    %c0_78 = arith.constant 0 : index
    %c0_79 = arith.constant 0 : index
    %108 = vector.load %arg11[%c15_77, %c0_78, %c0_79] : memref<20x1x33xf32, #tpu.memory_space<vmem>>, vector<1x1x33xf32>
    %109 = vector.shape_cast %108 : vector<1x1x33xf32> to vector<1x33xf32>
    %110 = vector.broadcast %109 : vector<1x33xf32> to vector<8x33xf32>
    %111 = arith.mulf %107, %110 : vector<8x33xf32>
    %112 = arith.addf %105, %111 : vector<8x33xf32>
    %c16 = arith.constant 16 : index
    %c0_80 = arith.constant 0 : index
    %c0_81 = arith.constant 0 : index
    %113 = vector.load %arg1[%c16, %c0_80, %c0_81] : memref<20x8x33xf32, #tpu.memory_space<vmem>>, vector<1x8x33xf32>
    %114 = vector.shape_cast %113 : vector<1x8x33xf32> to vector<8x33xf32>
    %c16_82 = arith.constant 16 : index
    %c0_83 = arith.constant 0 : index
    %c0_84 = arith.constant 0 : index
    %115 = vector.load %arg11[%c16_82, %c0_83, %c0_84] : memref<20x1x33xf32, #tpu.memory_space<vmem>>, vector<1x1x33xf32>
    %116 = vector.shape_cast %115 : vector<1x1x33xf32> to vector<1x33xf32>
    %117 = vector.broadcast %116 : vector<1x33xf32> to vector<8x33xf32>
    %118 = arith.mulf %114, %117 : vector<8x33xf32>
    %119 = arith.addf %112, %118 : vector<8x33xf32>
    %c17 = arith.constant 17 : index
    %c0_85 = arith.constant 0 : index
    %c0_86 = arith.constant 0 : index
    %120 = vector.load %arg1[%c17, %c0_85, %c0_86] : memref<20x8x33xf32, #tpu.memory_space<vmem>>, vector<1x8x33xf32>
    %121 = vector.shape_cast %120 : vector<1x8x33xf32> to vector<8x33xf32>
    %c17_87 = arith.constant 17 : index
    %c0_88 = arith.constant 0 : index
    %c0_89 = arith.constant 0 : index
    %122 = vector.load %arg11[%c17_87, %c0_88, %c0_89] : memref<20x1x33xf32, #tpu.memory_space<vmem>>, vector<1x1x33xf32>
    %123 = vector.shape_cast %122 : vector<1x1x33xf32> to vector<1x33xf32>
    %124 = vector.broadcast %123 : vector<1x33xf32> to vector<8x33xf32>
    %125 = arith.mulf %121, %124 : vector<8x33xf32>
    %126 = arith.addf %119, %125 : vector<8x33xf32>
    %c18 = arith.constant 18 : index
    %c0_90 = arith.constant 0 : index
    %c0_91 = arith.constant 0 : index
    %127 = vector.load %arg1[%c18, %c0_90, %c0_91] : memref<20x8x33xf32, #tpu.memory_space<vmem>>, vector<1x8x33xf32>
    %128 = vector.shape_cast %127 : vector<1x8x33xf32> to vector<8x33xf32>
    %c18_92 = arith.constant 18 : index
    %c0_93 = arith.constant 0 : index
    %c0_94 = arith.constant 0 : index
    %129 = vector.load %arg11[%c18_92, %c0_93, %c0_94] : memref<20x1x33xf32, #tpu.memory_space<vmem>>, vector<1x1x33xf32>
    %130 = vector.shape_cast %129 : vector<1x1x33xf32> to vector<1x33xf32>
    %131 = vector.broadcast %130 : vector<1x33xf32> to vector<8x33xf32>
    %132 = arith.mulf %128, %131 : vector<8x33xf32>
    %133 = arith.addf %126, %132 : vector<8x33xf32>
    %c19 = arith.constant 19 : index
    %c0_95 = arith.constant 0 : index
    %c0_96 = arith.constant 0 : index
    %134 = vector.load %arg1[%c19, %c0_95, %c0_96] : memref<20x8x33xf32, #tpu.memory_space<vmem>>, vector<1x8x33xf32>
    %135 = vector.shape_cast %134 : vector<1x8x33xf32> to vector<8x33xf32>
    %c19_97 = arith.constant 19 : index
    %c0_98 = arith.constant 0 : index
    %c0_99 = arith.constant 0 : index
    %136 = vector.load %arg11[%c19_97, %c0_98, %c0_99] : memref<20x1x33xf32, #tpu.memory_space<vmem>>, vector<1x1x33xf32>
    %137 = vector.shape_cast %136 : vector<1x1x33xf32> to vector<1x33xf32>
    %138 = vector.broadcast %137 : vector<1x33xf32> to vector<8x33xf32>
    %139 = arith.mulf %135, %138 : vector<8x33xf32>
    %140 = arith.addf %133, %139 : vector<8x33xf32>
    %c0_100 = arith.constant 0 : index
    %c0_101 = arith.constant 0 : index
    %141 = vector.load %arg12[%c0_100, %c0_101] : memref<1x1xf32, #tpu.memory_space<vmem>>, vector<1x1xf32>
    %142 = vector.broadcast %141 : vector<1x1xf32> to vector<8x33xf32>
    %143 = arith.addf %140, %142 : vector<8x33xf32>
    %cst_102 = arith.constant 0.000000e+00 : f32
    %144 = vector.broadcast %cst_102 : f32 to vector<8x33xf32>
    %145 = arith.maximumf %143, %144 : vector<8x33xf32>
    %146 = vector.extract_strided_slice %145 {offsets = [0, 0], sizes = [8, 32], strides = [1, 1]} : vector<8x33xf32> to vector<8x32xf32>
    %c0_103 = arith.constant 0 : index
    %c0_104 = arith.constant 0 : index
    %147 = vector.load %arg14[%c0_103, %c0_104] : memref<8x32xf32, #tpu.memory_space<vmem>>, vector<8x32xf32>
    tpu.vector_store %arg14[%c0_103, %c0_104], %146 {strides = array<i32>} : memref<8x32xf32, #tpu.memory_space<vmem>>, vector<8x32xf32>,
    %148 = tpu.iota {dimensions = array<i32: 1>} : vector<8x32xi32>
    %c16_i32 = arith.constant 16 : i32
    %149 = vector.broadcast %c16_i32 : i32 to vector<8x32xi32>
    %150 = arith.cmpi slt, %148, %149 : vector<8x32xi32>
    %cst_105 = arith.constant 0xFF800000 : f32
    %151 = vector.broadcast %cst_105 : f32 to vector<8x32xf32>
    %c0_106 = arith.constant 0 : index
    %c0_107 = arith.constant 0 : index
    %152 = vector.load %arg5[%c0_106, %c0_107] : memref<66x32xf32, #tpu.memory_space<vmem>>, vector<66x32xf32>
    %c0_108 = arith.constant 0 : index
    %c0_109 = arith.constant 0 : index
    %c0_110 = arith.constant 0 : index
    %153 = vector.load %arg2[%c0_108, %c0_109, %c0_110] : memref<19x8x66xf32, #tpu.memory_space<vmem>>, vector<1x8x66xf32>
    %154 = vector.shape_cast %153 : vector<1x8x66xf32> to vector<8x66xf32>
    %cst_111 = arith.constant dense<0.000000e+00> : vector<8x32xf32>
    %155 = tpu.matmul %154, %152, %cst_111 {dimension_numbers = #tpu.dot_dimension_numbers<[1], [0], [0], [1], [0, 0, 1, 1], [], []>} : vector<8x66xf32>, vector<66x32xf32>, vector<8x32xf32> -> vector<8x32xf32>
    %156 = arith.maximumf %151, %155 : vector<8x32xf32>
    %c1_112 = arith.constant 1 : index
    %c0_113 = arith.constant 0 : index
    %c0_114 = arith.constant 0 : index
    %157 = vector.load %arg2[%c1_112, %c0_113, %c0_114] : memref<19x8x66xf32, #tpu.memory_space<vmem>>, vector<1x8x66xf32>
    %158 = vector.shape_cast %157 : vector<1x8x66xf32> to vector<8x66xf32>
    %cst_115 = arith.constant dense<0.000000e+00> : vector<8x32xf32>
    %159 = tpu.matmul %158, %152, %cst_115 {dimension_numbers = #tpu.dot_dimension_numbers<[1], [0], [0], [1], [0, 0, 1, 1], [], []>} : vector<8x66xf32>, vector<66x32xf32>, vector<8x32xf32> -> vector<8x32xf32>
    %160 = arith.maximumf %156, %159 : vector<8x32xf32>
    %c2_116 = arith.constant 2 : index
    %c0_117 = arith.constant 0 : index
    %c0_118 = arith.constant 0 : index
    %161 = vector.load %arg2[%c2_116, %c0_117, %c0_118] : memref<19x8x66xf32, #tpu.memory_space<vmem>>, vector<1x8x66xf32>
    %162 = vector.shape_cast %161 : vector<1x8x66xf32> to vector<8x66xf32>
    %cst_119 = arith.constant dense<0.000000e+00> : vector<8x32xf32>
    %163 = tpu.matmul %162, %152, %cst_119 {dimension_numbers = #tpu.dot_dimension_numbers<[1], [0], [0], [1], [0, 0, 1, 1], [], []>} : vector<8x66xf32>, vector<66x32xf32>, vector<8x32xf32> -> vector<8x32xf32>
    %164 = arith.maximumf %160, %163 : vector<8x32xf32>
    %c3_120 = arith.constant 3 : index
    %c0_121 = arith.constant 0 : index
    %c0_122 = arith.constant 0 : index
    %165 = vector.load %arg2[%c3_120, %c0_121, %c0_122] : memref<19x8x66xf32, #tpu.memory_space<vmem>>, vector<1x8x66xf32>
    %166 = vector.shape_cast %165 : vector<1x8x66xf32> to vector<8x66xf32>
    %cst_123 = arith.constant dense<0.000000e+00> : vector<8x32xf32>
    %167 = tpu.matmul %166, %152, %cst_123 {dimension_numbers = #tpu.dot_dimension_numbers<[1], [0], [0], [1], [0, 0, 1, 1], [], []>} : vector<8x66xf32>, vector<66x32xf32>, vector<8x32xf32> -> vector<8x32xf32>
    %168 = arith.maximumf %164, %167 : vector<8x32xf32>
    %c4_124 = arith.constant 4 : index
    %c0_125 = arith.constant 0 : index
    %c0_126 = arith.constant 0 : index
    %169 = vector.load %arg2[%c4_124, %c0_125, %c0_126] : memref<19x8x66xf32, #tpu.memory_space<vmem>>, vector<1x8x66xf32>
    %170 = vector.shape_cast %169 : vector<1x8x66xf32> to vector<8x66xf32>
    %cst_127 = arith.constant dense<0.000000e+00> : vector<8x32xf32>
    %171 = tpu.matmul %170, %152, %cst_127 {dimension_numbers = #tpu.dot_dimension_numbers<[1], [0], [0], [1], [0, 0, 1, 1], [], []>} : vector<8x66xf32>, vector<66x32xf32>, vector<8x32xf32> -> vector<8x32xf32>
    %172 = arith.maximumf %168, %171 : vector<8x32xf32>
    %c5_128 = arith.constant 5 : index
    %c0_129 = arith.constant 0 : index
    %c0_130 = arith.constant 0 : index
    %173 = vector.load %arg2[%c5_128, %c0_129, %c0_130] : memref<19x8x66xf32, #tpu.memory_space<vmem>>, vector<1x8x66xf32>
    %174 = vector.shape_cast %173 : vector<1x8x66xf32> to vector<8x66xf32>
    %cst_131 = arith.constant dense<0.000000e+00> : vector<8x32xf32>
    %175 = tpu.matmul %174, %152, %cst_131 {dimension_numbers = #tpu.dot_dimension_numbers<[1], [0], [0], [1], [0, 0, 1, 1], [], []>} : vector<8x66xf32>, vector<66x32xf32>, vector<8x32xf32> -> vector<8x32xf32>
    %176 = arith.maximumf %172, %175 : vector<8x32xf32>
    %c6_132 = arith.constant 6 : index
    %c0_133 = arith.constant 0 : index
    %c0_134 = arith.constant 0 : index
    %177 = vector.load %arg2[%c6_132, %c0_133, %c0_134] : memref<19x8x66xf32, #tpu.memory_space<vmem>>, vector<1x8x66xf32>
    %178 = vector.shape_cast %177 : vector<1x8x66xf32> to vector<8x66xf32>
    %cst_135 = arith.constant dense<0.000000e+00> : vector<8x32xf32>
    %179 = tpu.matmul %178, %152, %cst_135 {dimension_numbers = #tpu.dot_dimension_numbers<[1], [0], [0], [1], [0, 0, 1, 1], [], []>} : vector<8x66xf32>, vector<66x32xf32>, vector<8x32xf32> -> vector<8x32xf32>
    %180 = arith.maximumf %176, %179 : vector<8x32xf32>
    %c7_136 = arith.constant 7 : index
    %c0_137 = arith.constant 0 : index
    %c0_138 = arith.constant 0 : index
    %181 = vector.load %arg2[%c7_136, %c0_137, %c0_138] : memref<19x8x66xf32, #tpu.memory_space<vmem>>, vector<1x8x66xf32>
    %182 = vector.shape_cast %181 : vector<1x8x66xf32> to vector<8x66xf32>
    %cst_139 = arith.constant dense<0.000000e+00> : vector<8x32xf32>
    %183 = tpu.matmul %182, %152, %cst_139 {dimension_numbers = #tpu.dot_dimension_numbers<[1], [0], [0], [1], [0, 0, 1, 1], [], []>} : vector<8x66xf32>, vector<66x32xf32>, vector<8x32xf32> -> vector<8x32xf32>
    %184 = arith.maximumf %180, %183 : vector<8x32xf32>
    %c8_140 = arith.constant 8 : index
    %c0_141 = arith.constant 0 : index
    %c0_142 = arith.constant 0 : index
    %185 = vector.load %arg2[%c8_140, %c0_141, %c0_142] : memref<19x8x66xf32, #tpu.memory_space<vmem>>, vector<1x8x66xf32>
    %186 = vector.shape_cast %185 : vector<1x8x66xf32> to vector<8x66xf32>
    %cst_143 = arith.constant dense<0.000000e+00> : vector<8x32xf32>
    %187 = tpu.matmul %186, %152, %cst_143 {dimension_numbers = #tpu.dot_dimension_numbers<[1], [0], [0], [1], [0, 0, 1, 1], [], []>} : vector<8x66xf32>, vector<66x32xf32>, vector<8x32xf32> -> vector<8x32xf32>
    %188 = arith.maximumf %184, %187 : vector<8x32xf32>
    %c9_144 = arith.constant 9 : index
    %c0_145 = arith.constant 0 : index
    %c0_146 = arith.constant 0 : index
    %189 = vector.load %arg2[%c9_144, %c0_145, %c0_146] : memref<19x8x66xf32, #tpu.memory_space<vmem>>, vector<1x8x66xf32>
    %190 = vector.shape_cast %189 : vector<1x8x66xf32> to vector<8x66xf32>
    %cst_147 = arith.constant dense<0.000000e+00> : vector<8x32xf32>
    %191 = tpu.matmul %190, %152, %cst_147 {dimension_numbers = #tpu.dot_dimension_numbers<[1], [0], [0], [1], [0, 0, 1, 1], [], []>} : vector<8x66xf32>, vector<66x32xf32>, vector<8x32xf32> -> vector<8x32xf32>
    %192 = arith.maximumf %188, %191 : vector<8x32xf32>
    %193 = arith.select %150, %192, %188 : vector<8x32xi1>, vector<8x32xf32>
    %194 = arith.maximumf %151, %191 : vector<8x32xf32>
    %195 = arith.select %150, %151, %194 : vector<8x32xi1>, vector<8x32xf32>
    %c10_148 = arith.constant 10 : index
    %c0_149 = arith.constant 0 : index
    %c0_150 = arith.constant 0 : index
    %196 = vector.load %arg2[%c10_148, %c0_149, %c0_150] : memref<19x8x66xf32, #tpu.memory_space<vmem>>, vector<1x8x66xf32>
    %197 = vector.shape_cast %196 : vector<1x8x66xf32> to vector<8x66xf32>
    %cst_151 = arith.constant dense<0.000000e+00> : vector<8x32xf32>
    %198 = tpu.matmul %197, %152, %cst_151 {dimension_numbers = #tpu.dot_dimension_numbers<[1], [0], [0], [1], [0, 0, 1, 1], [], []>} : vector<8x66xf32>, vector<66x32xf32>, vector<8x32xf32> -> vector<8x32xf32>
    %199 = arith.maximumf %195, %198 : vector<8x32xf32>
    %c11_152 = arith.constant 11 : index
    %c0_153 = arith.constant 0 : index
    %c0_154 = arith.constant 0 : index
    %200 = vector.load %arg2[%c11_152, %c0_153, %c0_154] : memref<19x8x66xf32, #tpu.memory_space<vmem>>, vector<1x8x66xf32>
    %201 = vector.shape_cast %200 : vector<1x8x66xf32> to vector<8x66xf32>
    %cst_155 = arith.constant dense<0.000000e+00> : vector<8x32xf32>
    %202 = tpu.matmul %201, %152, %cst_155 {dimension_numbers = #tpu.dot_dimension_numbers<[1], [0], [0], [1], [0, 0, 1, 1], [], []>} : vector<8x66xf32>, vector<66x32xf32>, vector<8x32xf32> -> vector<8x32xf32>
    %203 = arith.maximumf %199, %202 : vector<8x32xf32>
    %c12_156 = arith.constant 12 : index
    %c0_157 = arith.constant 0 : index
    %c0_158 = arith.constant 0 : index
    %204 = vector.load %arg2[%c12_156, %c0_157, %c0_158] : memref<19x8x66xf32, #tpu.memory_space<vmem>>, vector<1x8x66xf32>
    %205 = vector.shape_cast %204 : vector<1x8x66xf32> to vector<8x66xf32>
    %cst_159 = arith.constant dense<0.000000e+00> : vector<8x32xf32>
    %206 = tpu.matmul %205, %152, %cst_159 {dimension_numbers = #tpu.dot_dimension_numbers<[1], [0], [0], [1], [0, 0, 1, 1], [], []>} : vector<8x66xf32>, vector<66x32xf32>, vector<8x32xf32> -> vector<8x32xf32>
    %207 = arith.maximumf %203, %206 : vector<8x32xf32>
    %c13_160 = arith.constant 13 : index
    %c0_161 = arith.constant 0 : index
    %c0_162 = arith.constant 0 : index
    %208 = vector.load %arg2[%c13_160, %c0_161, %c0_162] : memref<19x8x66xf32, #tpu.memory_space<vmem>>, vector<1x8x66xf32>
    %209 = vector.shape_cast %208 : vector<1x8x66xf32> to vector<8x66xf32>
    %cst_163 = arith.constant dense<0.000000e+00> : vector<8x32xf32>
    %210 = tpu.matmul %209, %152, %cst_163 {dimension_numbers = #tpu.dot_dimension_numbers<[1], [0], [0], [1], [0, 0, 1, 1], [], []>} : vector<8x66xf32>, vector<66x32xf32>, vector<8x32xf32> -> vector<8x32xf32>
    %211 = arith.maximumf %207, %210 : vector<8x32xf32>
    %c14_164 = arith.constant 14 : index
    %c0_165 = arith.constant 0 : index
    %c0_166 = arith.constant 0 : index
    %212 = vector.load %arg2[%c14_164, %c0_165, %c0_166] : memref<19x8x66xf32, #tpu.memory_space<vmem>>, vector<1x8x66xf32>
    %213 = vector.shape_cast %212 : vector<1x8x66xf32> to vector<8x66xf32>
    %cst_167 = arith.constant dense<0.000000e+00> : vector<8x32xf32>
    %214 = tpu.matmul %213, %152, %cst_167 {dimension_numbers = #tpu.dot_dimension_numbers<[1], [0], [0], [1], [0, 0, 1, 1], [], []>} : vector<8x66xf32>, vector<66x32xf32>, vector<8x32xf32> -> vector<8x32xf32>
    %215 = arith.maximumf %211, %214 : vector<8x32xf32>
    %c15_168 = arith.constant 15 : index
    %c0_169 = arith.constant 0 : index
    %c0_170 = arith.constant 0 : index
    %216 = vector.load %arg2[%c15_168, %c0_169, %c0_170] : memref<19x8x66xf32, #tpu.memory_space<vmem>>, vector<1x8x66xf32>
    %217 = vector.shape_cast %216 : vector<1x8x66xf32> to vector<8x66xf32>
    %cst_171 = arith.constant dense<0.000000e+00> : vector<8x32xf32>
    %218 = tpu.matmul %217, %152, %cst_171 {dimension_numbers = #tpu.dot_dimension_numbers<[1], [0], [0], [1], [0, 0, 1, 1], [], []>} : vector<8x66xf32>, vector<66x32xf32>, vector<8x32xf32> -> vector<8x32xf32>
    %219 = arith.maximumf %215, %218 : vector<8x32xf32>
    %c16_172 = arith.constant 16 : index
    %c0_173 = arith.constant 0 : index
    %c0_174 = arith.constant 0 : index
    %220 = vector.load %arg2[%c16_172, %c0_173, %c0_174] : memref<19x8x66xf32, #tpu.memory_space<vmem>>, vector<1x8x66xf32>
    %221 = vector.shape_cast %220 : vector<1x8x66xf32> to vector<8x66xf32>
    %cst_175 = arith.constant dense<0.000000e+00> : vector<8x32xf32>
    %222 = tpu.matmul %221, %152, %cst_175 {dimension_numbers = #tpu.dot_dimension_numbers<[1], [0], [0], [1], [0, 0, 1, 1], [], []>} : vector<8x66xf32>, vector<66x32xf32>, vector<8x32xf32> -> vector<8x32xf32>
    %223 = arith.maximumf %219, %222 : vector<8x32xf32>
    %c17_176 = arith.constant 17 : index
    %c0_177 = arith.constant 0 : index
    %c0_178 = arith.constant 0 : index
    %224 = vector.load %arg2[%c17_176, %c0_177, %c0_178] : memref<19x8x66xf32, #tpu.memory_space<vmem>>, vector<1x8x66xf32>
    %225 = vector.shape_cast %224 : vector<1x8x66xf32> to vector<8x66xf32>
    %cst_179 = arith.constant dense<0.000000e+00> : vector<8x32xf32>
    %226 = tpu.matmul %225, %152, %cst_179 {dimension_numbers = #tpu.dot_dimension_numbers<[1], [0], [0], [1], [0, 0, 1, 1], [], []>} : vector<8x66xf32>, vector<66x32xf32>, vector<8x32xf32> -> vector<8x32xf32>
    %227 = arith.maximumf %223, %226 : vector<8x32xf32>
    %c18_180 = arith.constant 18 : index
    %c0_181 = arith.constant 0 : index
    %c0_182 = arith.constant 0 : index
    %228 = vector.load %arg2[%c18_180, %c0_181, %c0_182] : memref<19x8x66xf32, #tpu.memory_space<vmem>>, vector<1x8x66xf32>
    %229 = vector.shape_cast %228 : vector<1x8x66xf32> to vector<8x66xf32>
    %cst_183 = arith.constant dense<0.000000e+00> : vector<8x32xf32>
    %230 = tpu.matmul %229, %152, %cst_183 {dimension_numbers = #tpu.dot_dimension_numbers<[1], [0], [0], [1], [0, 0, 1, 1], [], []>} : vector<8x66xf32>, vector<66x32xf32>, vector<8x32xf32> -> vector<8x32xf32>
    %231 = arith.maximumf %227, %230 : vector<8x32xf32>
    %c0_184 = arith.constant 0 : index
    %c0_185 = arith.constant 0 : index
    %232 = vector.load %arg8[%c0_184, %c0_185] : memref<1x16xf32, #tpu.memory_space<vmem>>, vector<1x16xf32>
    %233 = vector.extract_strided_slice %193 {offsets = [0, 0], sizes = [8, 16], strides = [1, 1]} : vector<8x32xf32> to vector<8x16xf32>
    %234 = vector.extract_strided_slice %193 {offsets = [0, 16], sizes = [8, 16], strides = [1, 1]} : vector<8x32xf32> to vector<8x16xf32>
    %235 = arith.maximumf %233, %234 : vector<8x16xf32>
    %236 = vector.broadcast %232 : vector<1x16xf32> to vector<8x16xf32>
    %237 = arith.addf %235, %236 : vector<8x16xf32>
    %cst_186 = arith.constant 0.000000e+00 : f32
    %238 = vector.broadcast %cst_186 : f32 to vector<8x16xf32>
    %239 = arith.maximumf %237, %238 : vector<8x16xf32>
    %240 = vector.extract_strided_slice %231 {offsets = [0, 0], sizes = [8, 16], strides = [1, 1]} : vector<8x32xf32> to vector<8x16xf32>
    %241 = vector.extract_strided_slice %231 {offsets = [0, 16], sizes = [8, 16], strides = [1, 1]} : vector<8x32xf32> to vector<8x16xf32>
    %242 = arith.maximumf %240, %241 : vector<8x16xf32>
    %243 = vector.broadcast %232 : vector<1x16xf32> to vector<8x16xf32>
    %244 = arith.addf %242, %243 : vector<8x16xf32>
    %cst_187 = arith.constant 0.000000e+00 : f32
    %245 = vector.broadcast %cst_187 : f32 to vector<8x16xf32>
    %246 = arith.maximumf %244, %245 : vector<8x16xf32>
    %c0_188 = arith.constant 0 : index
    %c0_189 = arith.constant 0 : index
    %247 = vector.load %arg13[%c0_188, %c0_189] : memref<8x96xf32, #tpu.memory_space<vmem>>, vector<8x16xf32>
    tpu.vector_store %arg13[%c0_188, %c0_189], %239 {strides = array<i32>} : memref<8x96xf32, #tpu.memory_space<vmem>>, vector<8x16xf32>,
    %c0_190 = arith.constant 0 : index
    %c16_191 = arith.constant 16 : index
    %248 = vector.load %arg13[%c0_190, %c16_191] : memref<8x96xf32, #tpu.memory_space<vmem>>, vector<8x16xf32>
    tpu.vector_store %arg13[%c0_190, %c16_191], %246 {strides = array<i32>} : memref<8x96xf32, #tpu.memory_space<vmem>>, vector<8x16xf32>,
    %c0_192 = arith.constant 0 : index
    %c0_193 = arith.constant 0 : index
    %249 = vector.load %arg6[%c0_192, %c0_193] : memref<99x32xf32, #tpu.memory_space<vmem>>, vector<99x32xf32>
    %c0_194 = arith.constant 0 : index
    %c0_195 = arith.constant 0 : index
    %c0_196 = arith.constant 0 : index
    %250 = vector.load %arg3[%c0_194, %c0_195, %c0_196] : memref<18x8x99xf32, #tpu.memory_space<vmem>>, vector<1x8x99xf32>
    %251 = vector.shape_cast %250 : vector<1x8x99xf32> to vector<8x99xf32>
    %cst_197 = arith.constant dense<0.000000e+00> : vector<8x32xf32>
    %252 = tpu.matmul %251, %249, %cst_197 {dimension_numbers = #tpu.dot_dimension_numbers<[1], [0], [0], [1], [0, 0, 1, 1], [], []>} : vector<8x99xf32>, vector<99x32xf32>, vector<8x32xf32> -> vector<8x32xf32>
    %253 = arith.maximumf %151, %252 : vector<8x32xf32>
    %c1_198 = arith.constant 1 : index
    %c0_199 = arith.constant 0 : index
    %c0_200 = arith.constant 0 : index
    %254 = vector.load %arg3[%c1_198, %c0_199, %c0_200] : memref<18x8x99xf32, #tpu.memory_space<vmem>>, vector<1x8x99xf32>
    %255 = vector.shape_cast %254 : vector<1x8x99xf32> to vector<8x99xf32>
    %cst_201 = arith.constant dense<0.000000e+00> : vector<8x32xf32>
    %256 = tpu.matmul %255, %249, %cst_201 {dimension_numbers = #tpu.dot_dimension_numbers<[1], [0], [0], [1], [0, 0, 1, 1], [], []>} : vector<8x99xf32>, vector<99x32xf32>, vector<8x32xf32> -> vector<8x32xf32>
    %257 = arith.maximumf %253, %256 : vector<8x32xf32>
    %c2_202 = arith.constant 2 : index
    %c0_203 = arith.constant 0 : index
    %c0_204 = arith.constant 0 : index
    %258 = vector.load %arg3[%c2_202, %c0_203, %c0_204] : memref<18x8x99xf32, #tpu.memory_space<vmem>>, vector<1x8x99xf32>
    %259 = vector.shape_cast %258 : vector<1x8x99xf32> to vector<8x99xf32>
    %cst_205 = arith.constant dense<0.000000e+00> : vector<8x32xf32>
    %260 = tpu.matmul %259, %249, %cst_205 {dimension_numbers = #tpu.dot_dimension_numbers<[1], [0], [0], [1], [0, 0, 1, 1], [], []>} : vector<8x99xf32>, vector<99x32xf32>, vector<8x32xf32> -> vector<8x32xf32>
    %261 = arith.maximumf %257, %260 : vector<8x32xf32>
    %c3_206 = arith.constant 3 : index
    %c0_207 = arith.constant 0 : index
    %c0_208 = arith.constant 0 : index
    %262 = vector.load %arg3[%c3_206, %c0_207, %c0_208] : memref<18x8x99xf32, #tpu.memory_space<vmem>>, vector<1x8x99xf32>
    %263 = vector.shape_cast %262 : vector<1x8x99xf32> to vector<8x99xf32>
    %cst_209 = arith.constant dense<0.000000e+00> : vector<8x32xf32>
    %264 = tpu.matmul %263, %249, %cst_209 {dimension_numbers = #tpu.dot_dimension_numbers<[1], [0], [0], [1], [0, 0, 1, 1], [], []>} : vector<8x99xf32>, vector<99x32xf32>, vector<8x32xf32> -> vector<8x32xf32>
    %265 = arith.maximumf %261, %264 : vector<8x32xf32>
    %c4_210 = arith.constant 4 : index
    %c0_211 = arith.constant 0 : index
    %c0_212 = arith.constant 0 : index
    %266 = vector.load %arg3[%c4_210, %c0_211, %c0_212] : memref<18x8x99xf32, #tpu.memory_space<vmem>>, vector<1x8x99xf32>
    %267 = vector.shape_cast %266 : vector<1x8x99xf32> to vector<8x99xf32>
    %cst_213 = arith.constant dense<0.000000e+00> : vector<8x32xf32>
    %268 = tpu.matmul %267, %249, %cst_213 {dimension_numbers = #tpu.dot_dimension_numbers<[1], [0], [0], [1], [0, 0, 1, 1], [], []>} : vector<8x99xf32>, vector<99x32xf32>, vector<8x32xf32> -> vector<8x32xf32>
    %269 = arith.maximumf %265, %268 : vector<8x32xf32>
    %c5_214 = arith.constant 5 : index
    %c0_215 = arith.constant 0 : index
    %c0_216 = arith.constant 0 : index
    %270 = vector.load %arg3[%c5_214, %c0_215, %c0_216] : memref<18x8x99xf32, #tpu.memory_space<vmem>>, vector<1x8x99xf32>
    %271 = vector.shape_cast %270 : vector<1x8x99xf32> to vector<8x99xf32>
    %cst_217 = arith.constant dense<0.000000e+00> : vector<8x32xf32>
    %272 = tpu.matmul %271, %249, %cst_217 {dimension_numbers = #tpu.dot_dimension_numbers<[1], [0], [0], [1], [0, 0, 1, 1], [], []>} : vector<8x99xf32>, vector<99x32xf32>, vector<8x32xf32> -> vector<8x32xf32>
    %273 = arith.maximumf %269, %272 : vector<8x32xf32>
    %c6_218 = arith.constant 6 : index
    %c0_219 = arith.constant 0 : index
    %c0_220 = arith.constant 0 : index
    %274 = vector.load %arg3[%c6_218, %c0_219, %c0_220] : memref<18x8x99xf32, #tpu.memory_space<vmem>>, vector<1x8x99xf32>
    %275 = vector.shape_cast %274 : vector<1x8x99xf32> to vector<8x99xf32>
    %cst_221 = arith.constant dense<0.000000e+00> : vector<8x32xf32>
    %276 = tpu.matmul %275, %249, %cst_221 {dimension_numbers = #tpu.dot_dimension_numbers<[1], [0], [0], [1], [0, 0, 1, 1], [], []>} : vector<8x99xf32>, vector<99x32xf32>, vector<8x32xf32> -> vector<8x32xf32>
    %277 = arith.maximumf %273, %276 : vector<8x32xf32>
    %c7_222 = arith.constant 7 : index
    %c0_223 = arith.constant 0 : index
    %c0_224 = arith.constant 0 : index
    %278 = vector.load %arg3[%c7_222, %c0_223, %c0_224] : memref<18x8x99xf32, #tpu.memory_space<vmem>>, vector<1x8x99xf32>
    %279 = vector.shape_cast %278 : vector<1x8x99xf32> to vector<8x99xf32>
    %cst_225 = arith.constant dense<0.000000e+00> : vector<8x32xf32>
    %280 = tpu.matmul %279, %249, %cst_225 {dimension_numbers = #tpu.dot_dimension_numbers<[1], [0], [0], [1], [0, 0, 1, 1], [], []>} : vector<8x99xf32>, vector<99x32xf32>, vector<8x32xf32> -> vector<8x32xf32>
    %281 = arith.maximumf %277, %280 : vector<8x32xf32>
    %c8_226 = arith.constant 8 : index
    %c0_227 = arith.constant 0 : index
    %c0_228 = arith.constant 0 : index
    %282 = vector.load %arg3[%c8_226, %c0_227, %c0_228] : memref<18x8x99xf32, #tpu.memory_space<vmem>>, vector<1x8x99xf32>
    %283 = vector.shape_cast %282 : vector<1x8x99xf32> to vector<8x99xf32>
    %cst_229 = arith.constant dense<0.000000e+00> : vector<8x32xf32>
    %284 = tpu.matmul %283, %249, %cst_229 {dimension_numbers = #tpu.dot_dimension_numbers<[1], [0], [0], [1], [0, 0, 1, 1], [], []>} : vector<8x99xf32>, vector<99x32xf32>, vector<8x32xf32> -> vector<8x32xf32>
    %285 = arith.maximumf %281, %284 : vector<8x32xf32>
    %c9_230 = arith.constant 9 : index
    %c0_231 = arith.constant 0 : index
    %c0_232 = arith.constant 0 : index
    %286 = vector.load %arg3[%c9_230, %c0_231, %c0_232] : memref<18x8x99xf32, #tpu.memory_space<vmem>>, vector<1x8x99xf32>
    %287 = vector.shape_cast %286 : vector<1x8x99xf32> to vector<8x99xf32>
    %cst_233 = arith.constant dense<0.000000e+00> : vector<8x32xf32>
    %288 = tpu.matmul %287, %249, %cst_233 {dimension_numbers = #tpu.dot_dimension_numbers<[1], [0], [0], [1], [0, 0, 1, 1], [], []>} : vector<8x99xf32>, vector<99x32xf32>, vector<8x32xf32> -> vector<8x32xf32>
    %289 = arith.maximumf %151, %288 : vector<8x32xf32>
    %c10_234 = arith.constant 10 : index
    %c0_235 = arith.constant 0 : index
    %c0_236 = arith.constant 0 : index
    %290 = vector.load %arg3[%c10_234, %c0_235, %c0_236] : memref<18x8x99xf32, #tpu.memory_space<vmem>>, vector<1x8x99xf32>
    %291 = vector.shape_cast %290 : vector<1x8x99xf32> to vector<8x99xf32>
    %cst_237 = arith.constant dense<0.000000e+00> : vector<8x32xf32>
    %292 = tpu.matmul %291, %249, %cst_237 {dimension_numbers = #tpu.dot_dimension_numbers<[1], [0], [0], [1], [0, 0, 1, 1], [], []>} : vector<8x99xf32>, vector<99x32xf32>, vector<8x32xf32> -> vector<8x32xf32>
    %293 = arith.maximumf %289, %292 : vector<8x32xf32>
    %c11_238 = arith.constant 11 : index
    %c0_239 = arith.constant 0 : index
    %c0_240 = arith.constant 0 : index
    %294 = vector.load %arg3[%c11_238, %c0_239, %c0_240] : memref<18x8x99xf32, #tpu.memory_space<vmem>>, vector<1x8x99xf32>
    %295 = vector.shape_cast %294 : vector<1x8x99xf32> to vector<8x99xf32>
    %cst_241 = arith.constant dense<0.000000e+00> : vector<8x32xf32>
    %296 = tpu.matmul %295, %249, %cst_241 {dimension_numbers = #tpu.dot_dimension_numbers<[1], [0], [0], [1], [0, 0, 1, 1], [], []>} : vector<8x99xf32>, vector<99x32xf32>, vector<8x32xf32> -> vector<8x32xf32>
    %297 = arith.maximumf %293, %296 : vector<8x32xf32>
    %c12_242 = arith.constant 12 : index
    %c0_243 = arith.constant 0 : index
    %c0_244 = arith.constant 0 : index
    %298 = vector.load %arg3[%c12_242, %c0_243, %c0_244] : memref<18x8x99xf32, #tpu.memory_space<vmem>>, vector<1x8x99xf32>
    %299 = vector.shape_cast %298 : vector<1x8x99xf32> to vector<8x99xf32>
    %cst_245 = arith.constant dense<0.000000e+00> : vector<8x32xf32>
    %300 = tpu.matmul %299, %249, %cst_245 {dimension_numbers = #tpu.dot_dimension_numbers<[1], [0], [0], [1], [0, 0, 1, 1], [], []>} : vector<8x99xf32>, vector<99x32xf32>, vector<8x32xf32> -> vector<8x32xf32>
    %301 = arith.maximumf %297, %300 : vector<8x32xf32>
    %c13_246 = arith.constant 13 : index
    %c0_247 = arith.constant 0 : index
    %c0_248 = arith.constant 0 : index
    %302 = vector.load %arg3[%c13_246, %c0_247, %c0_248] : memref<18x8x99xf32, #tpu.memory_space<vmem>>, vector<1x8x99xf32>
    %303 = vector.shape_cast %302 : vector<1x8x99xf32> to vector<8x99xf32>
    %cst_249 = arith.constant dense<0.000000e+00> : vector<8x32xf32>
    %304 = tpu.matmul %303, %249, %cst_249 {dimension_numbers = #tpu.dot_dimension_numbers<[1], [0], [0], [1], [0, 0, 1, 1], [], []>} : vector<8x99xf32>, vector<99x32xf32>, vector<8x32xf32> -> vector<8x32xf32>
    %305 = arith.maximumf %301, %304 : vector<8x32xf32>
    %c14_250 = arith.constant 14 : index
    %c0_251 = arith.constant 0 : index
    %c0_252 = arith.constant 0 : index
    %306 = vector.load %arg3[%c14_250, %c0_251, %c0_252] : memref<18x8x99xf32, #tpu.memory_space<vmem>>, vector<1x8x99xf32>
    %307 = vector.shape_cast %306 : vector<1x8x99xf32> to vector<8x99xf32>
    %cst_253 = arith.constant dense<0.000000e+00> : vector<8x32xf32>
    %308 = tpu.matmul %307, %249, %cst_253 {dimension_numbers = #tpu.dot_dimension_numbers<[1], [0], [0], [1], [0, 0, 1, 1], [], []>} : vector<8x99xf32>, vector<99x32xf32>, vector<8x32xf32> -> vector<8x32xf32>
    %309 = arith.maximumf %305, %308 : vector<8x32xf32>
    %c15_254 = arith.constant 15 : index
    %c0_255 = arith.constant 0 : index
    %c0_256 = arith.constant 0 : index
    %310 = vector.load %arg3[%c15_254, %c0_255, %c0_256] : memref<18x8x99xf32, #tpu.memory_space<vmem>>, vector<1x8x99xf32>
    %311 = vector.shape_cast %310 : vector<1x8x99xf32> to vector<8x99xf32>
    %cst_257 = arith.constant dense<0.000000e+00> : vector<8x32xf32>
    %312 = tpu.matmul %311, %249, %cst_257 {dimension_numbers = #tpu.dot_dimension_numbers<[1], [0], [0], [1], [0, 0, 1, 1], [], []>} : vector<8x99xf32>, vector<99x32xf32>, vector<8x32xf32> -> vector<8x32xf32>
    %313 = arith.maximumf %309, %312 : vector<8x32xf32>
    %c16_258 = arith.constant 16 : index
    %c0_259 = arith.constant 0 : index
    %c0_260 = arith.constant 0 : index
    %314 = vector.load %arg3[%c16_258, %c0_259, %c0_260] : memref<18x8x99xf32, #tpu.memory_space<vmem>>, vector<1x8x99xf32>
    %315 = vector.shape_cast %314 : vector<1x8x99xf32> to vector<8x99xf32>
    %cst_261 = arith.constant dense<0.000000e+00> : vector<8x32xf32>
    %316 = tpu.matmul %315, %249, %cst_261 {dimension_numbers = #tpu.dot_dimension_numbers<[1], [0], [0], [1], [0, 0, 1, 1], [], []>} : vector<8x99xf32>, vector<99x32xf32>, vector<8x32xf32> -> vector<8x32xf32>
    %317 = arith.maximumf %313, %316 : vector<8x32xf32>
    %c17_262 = arith.constant 17 : index
    %c0_263 = arith.constant 0 : index
    %c0_264 = arith.constant 0 : index
    %318 = vector.load %arg3[%c17_262, %c0_263, %c0_264] : memref<18x8x99xf32, #tpu.memory_space<vmem>>, vector<1x8x99xf32>
    %319 = vector.shape_cast %318 : vector<1x8x99xf32> to vector<8x99xf32>
    %cst_265 = arith.constant dense<0.000000e+00> : vector<8x32xf32>
    %320 = tpu.matmul %319, %249, %cst_265 {dimension_numbers = #tpu.dot_dimension_numbers<[1], [0], [0], [1], [0, 0, 1, 1], [], []>} : vector<8x99xf32>, vector<99x32xf32>, vector<8x32xf32> -> vector<8x32xf32>
    %321 = arith.maximumf %317, %320 : vector<8x32xf32>
    %c0_266 = arith.constant 0 : index
    %c0_267 = arith.constant 0 : index
    %322 = vector.load %arg9[%c0_266, %c0_267] : memref<1x16xf32, #tpu.memory_space<vmem>>, vector<1x16xf32>
    %323 = vector.extract_strided_slice %285 {offsets = [0, 0], sizes = [8, 16], strides = [1, 1]} : vector<8x32xf32> to vector<8x16xf32>
    %324 = vector.extract_strided_slice %285 {offsets = [0, 16], sizes = [8, 16], strides = [1, 1]} : vector<8x32xf32> to vector<8x16xf32>
    %325 = arith.maximumf %323, %324 : vector<8x16xf32>
    %326 = vector.broadcast %322 : vector<1x16xf32> to vector<8x16xf32>
    %327 = arith.addf %325, %326 : vector<8x16xf32>
    %cst_268 = arith.constant 0.000000e+00 : f32
    %328 = vector.broadcast %cst_268 : f32 to vector<8x16xf32>
    %329 = arith.maximumf %327, %328 : vector<8x16xf32>
    %330 = vector.extract_strided_slice %321 {offsets = [0, 0], sizes = [8, 16], strides = [1, 1]} : vector<8x32xf32> to vector<8x16xf32>
    %331 = vector.extract_strided_slice %321 {offsets = [0, 16], sizes = [8, 16], strides = [1, 1]} : vector<8x32xf32> to vector<8x16xf32>
    %332 = arith.maximumf %330, %331 : vector<8x16xf32>
    %333 = vector.broadcast %322 : vector<1x16xf32> to vector<8x16xf32>
    %334 = arith.addf %332, %333 : vector<8x16xf32>
    %cst_269 = arith.constant 0.000000e+00 : f32
    %335 = vector.broadcast %cst_269 : f32 to vector<8x16xf32>
    %336 = arith.maximumf %334, %335 : vector<8x16xf32>
    %c0_270 = arith.constant 0 : index
    %c32 = arith.constant 32 : index
    %337 = vector.load %arg13[%c0_270, %c32] : memref<8x96xf32, #tpu.memory_space<vmem>>, vector<8x16xf32>
    tpu.vector_store %arg13[%c0_270, %c32], %329 {strides = array<i32>} : memref<8x96xf32, #tpu.memory_space<vmem>>, vector<8x16xf32>,
    %c0_271 = arith.constant 0 : index
    %c48 = arith.constant 48 : index
    %338 = vector.load %arg13[%c0_271, %c48] : memref<8x96xf32, #tpu.memory_space<vmem>>, vector<8x16xf32>
    tpu.vector_store %arg13[%c0_271, %c48], %336 {strides = array<i32>} : memref<8x96xf32, #tpu.memory_space<vmem>>, vector<8x16xf32>,
    %c0_272 = arith.constant 0 : index
    %c0_273 = arith.constant 0 : index
    %339 = vector.load %arg7[%c0_272, %c0_273] : memref<132x32xf32, #tpu.memory_space<vmem>>, vector<132x32xf32>
    %c0_274 = arith.constant 0 : index
    %c0_275 = arith.constant 0 : index
    %c0_276 = arith.constant 0 : index
    %340 = vector.load %arg4[%c0_274, %c0_275, %c0_276] : memref<17x8x132xf32, #tpu.memory_space<vmem>>, vector<1x8x132xf32>
    %341 = vector.shape_cast %340 : vector<1x8x132xf32> to vector<8x132xf32>
    %cst_277 = arith.constant dense<0.000000e+00> : vector<8x32xf32>
    %342 = tpu.matmul %341, %339, %cst_277 {dimension_numbers = #tpu.dot_dimension_numbers<[1], [0], [0], [1], [0, 0, 1, 1], [], []>} : vector<8x132xf32>, vector<132x32xf32>, vector<8x32xf32> -> vector<8x32xf32>
    %343 = arith.maximumf %151, %342 : vector<8x32xf32>
    %c1_278 = arith.constant 1 : index
    %c0_279 = arith.constant 0 : index
    %c0_280 = arith.constant 0 : index
    %344 = vector.load %arg4[%c1_278, %c0_279, %c0_280] : memref<17x8x132xf32, #tpu.memory_space<vmem>>, vector<1x8x132xf32>
    %345 = vector.shape_cast %344 : vector<1x8x132xf32> to vector<8x132xf32>
    %cst_281 = arith.constant dense<0.000000e+00> : vector<8x32xf32>
    %346 = tpu.matmul %345, %339, %cst_281 {dimension_numbers = #tpu.dot_dimension_numbers<[1], [0], [0], [1], [0, 0, 1, 1], [], []>} : vector<8x132xf32>, vector<132x32xf32>, vector<8x32xf32> -> vector<8x32xf32>
    %347 = arith.maximumf %343, %346 : vector<8x32xf32>
    %c2_282 = arith.constant 2 : index
    %c0_283 = arith.constant 0 : index
    %c0_284 = arith.constant 0 : index
    %348 = vector.load %arg4[%c2_282, %c0_283, %c0_284] : memref<17x8x132xf32, #tpu.memory_space<vmem>>, vector<1x8x132xf32>
    %349 = vector.shape_cast %348 : vector<1x8x132xf32> to vector<8x132xf32>
    %cst_285 = arith.constant dense<0.000000e+00> : vector<8x32xf32>
    %350 = tpu.matmul %349, %339, %cst_285 {dimension_numbers = #tpu.dot_dimension_numbers<[1], [0], [0], [1], [0, 0, 1, 1], [], []>} : vector<8x132xf32>, vector<132x32xf32>, vector<8x32xf32> -> vector<8x32xf32>
    %351 = arith.maximumf %347, %350 : vector<8x32xf32>
    %c3_286 = arith.constant 3 : index
    %c0_287 = arith.constant 0 : index
    %c0_288 = arith.constant 0 : index
    %352 = vector.load %arg4[%c3_286, %c0_287, %c0_288] : memref<17x8x132xf32, #tpu.memory_space<vmem>>, vector<1x8x132xf32>
    %353 = vector.shape_cast %352 : vector<1x8x132xf32> to vector<8x132xf32>
    %cst_289 = arith.constant dense<0.000000e+00> : vector<8x32xf32>
    %354 = tpu.matmul %353, %339, %cst_289 {dimension_numbers = #tpu.dot_dimension_numbers<[1], [0], [0], [1], [0, 0, 1, 1], [], []>} : vector<8x132xf32>, vector<132x32xf32>, vector<8x32xf32> -> vector<8x32xf32>
    %355 = arith.maximumf %351, %354 : vector<8x32xf32>
    %c4_290 = arith.constant 4 : index
    %c0_291 = arith.constant 0 : index
    %c0_292 = arith.constant 0 : index
    %356 = vector.load %arg4[%c4_290, %c0_291, %c0_292] : memref<17x8x132xf32, #tpu.memory_space<vmem>>, vector<1x8x132xf32>
    %357 = vector.shape_cast %356 : vector<1x8x132xf32> to vector<8x132xf32>
    %cst_293 = arith.constant dense<0.000000e+00> : vector<8x32xf32>
    %358 = tpu.matmul %357, %339, %cst_293 {dimension_numbers = #tpu.dot_dimension_numbers<[1], [0], [0], [1], [0, 0, 1, 1], [], []>} : vector<8x132xf32>, vector<132x32xf32>, vector<8x32xf32> -> vector<8x32xf32>
    %359 = arith.maximumf %355, %358 : vector<8x32xf32>
    %c5_294 = arith.constant 5 : index
    %c0_295 = arith.constant 0 : index
    %c0_296 = arith.constant 0 : index
    %360 = vector.load %arg4[%c5_294, %c0_295, %c0_296] : memref<17x8x132xf32, #tpu.memory_space<vmem>>, vector<1x8x132xf32>
    %361 = vector.shape_cast %360 : vector<1x8x132xf32> to vector<8x132xf32>
    %cst_297 = arith.constant dense<0.000000e+00> : vector<8x32xf32>
    %362 = tpu.matmul %361, %339, %cst_297 {dimension_numbers = #tpu.dot_dimension_numbers<[1], [0], [0], [1], [0, 0, 1, 1], [], []>} : vector<8x132xf32>, vector<132x32xf32>, vector<8x32xf32> -> vector<8x32xf32>
    %363 = arith.maximumf %359, %362 : vector<8x32xf32>
    %c6_298 = arith.constant 6 : index
    %c0_299 = arith.constant 0 : index
    %c0_300 = arith.constant 0 : index
    %364 = vector.load %arg4[%c6_298, %c0_299, %c0_300] : memref<17x8x132xf32, #tpu.memory_space<vmem>>, vector<1x8x132xf32>
    %365 = vector.shape_cast %364 : vector<1x8x132xf32> to vector<8x132xf32>
    %cst_301 = arith.constant dense<0.000000e+00> : vector<8x32xf32>
    %366 = tpu.matmul %365, %339, %cst_301 {dimension_numbers = #tpu.dot_dimension_numbers<[1], [0], [0], [1], [0, 0, 1, 1], [], []>} : vector<8x132xf32>, vector<132x32xf32>, vector<8x32xf32> -> vector<8x32xf32>
    %367 = arith.maximumf %363, %366 : vector<8x32xf32>
    %c7_302 = arith.constant 7 : index
    %c0_303 = arith.constant 0 : index
    %c0_304 = arith.constant 0 : index
    %368 = vector.load %arg4[%c7_302, %c0_303, %c0_304] : memref<17x8x132xf32, #tpu.memory_space<vmem>>, vector<1x8x132xf32>
    %369 = vector.shape_cast %368 : vector<1x8x132xf32> to vector<8x132xf32>
    %cst_305 = arith.constant dense<0.000000e+00> : vector<8x32xf32>
    %370 = tpu.matmul %369, %339, %cst_305 {dimension_numbers = #tpu.dot_dimension_numbers<[1], [0], [0], [1], [0, 0, 1, 1], [], []>} : vector<8x132xf32>, vector<132x32xf32>, vector<8x32xf32> -> vector<8x32xf32>
    %371 = arith.maximumf %367, %370 : vector<8x32xf32>
    %c8_306 = arith.constant 8 : index
    %c0_307 = arith.constant 0 : index
    %c0_308 = arith.constant 0 : index
    %372 = vector.load %arg4[%c8_306, %c0_307, %c0_308] : memref<17x8x132xf32, #tpu.memory_space<vmem>>, vector<1x8x132xf32>
    %373 = vector.shape_cast %372 : vector<1x8x132xf32> to vector<8x132xf32>
    %cst_309 = arith.constant dense<0.000000e+00> : vector<8x32xf32>
    %374 = tpu.matmul %373, %339, %cst_309 {dimension_numbers = #tpu.dot_dimension_numbers<[1], [0], [0], [1], [0, 0, 1, 1], [], []>} : vector<8x132xf32>, vector<132x32xf32>, vector<8x32xf32> -> vector<8x32xf32>
    %375 = arith.maximumf %371, %374 : vector<8x32xf32>
    %376 = arith.select %150, %375, %371 : vector<8x32xi1>, vector<8x32xf32>
    %377 = arith.maximumf %151, %374 : vector<8x32xf32>
    %378 = arith.select %150, %151, %377 : vector<8x32xi1>, vector<8x32xf32>
    %c9_310 = arith.constant 9 : index
    %c0_311 = arith.constant 0 : index
    %c0_312 = arith.constant 0 : index
    %379 = vector.load %arg4[%c9_310, %c0_311, %c0_312] : memref<17x8x132xf32, #tpu.memory_space<vmem>>, vector<1x8x132xf32>
    %380 = vector.shape_cast %379 : vector<1x8x132xf32> to vector<8x132xf32>
    %cst_313 = arith.constant dense<0.000000e+00> : vector<8x32xf32>
    %381 = tpu.matmul %380, %339, %cst_313 {dimension_numbers = #tpu.dot_dimension_numbers<[1], [0], [0], [1], [0, 0, 1, 1], [], []>} : vector<8x132xf32>, vector<132x32xf32>, vector<8x32xf32> -> vector<8x32xf32>
    %382 = arith.maximumf %378, %381 : vector<8x32xf32>
    %c10_314 = arith.constant 10 : index
    %c0_315 = arith.constant 0 : index
    %c0_316 = arith.constant 0 : index
    %383 = vector.load %arg4[%c10_314, %c0_315, %c0_316] : memref<17x8x132xf32, #tpu.memory_space<vmem>>, vector<1x8x132xf32>
    %384 = vector.shape_cast %383 : vector<1x8x132xf32> to vector<8x132xf32>
    %cst_317 = arith.constant dense<0.000000e+00> : vector<8x32xf32>
    %385 = tpu.matmul %384, %339, %cst_317 {dimension_numbers = #tpu.dot_dimension_numbers<[1], [0], [0], [1], [0, 0, 1, 1], [], []>} : vector<8x132xf32>, vector<132x32xf32>, vector<8x32xf32> -> vector<8x32xf32>
    %386 = arith.maximumf %382, %385 : vector<8x32xf32>
    %c11_318 = arith.constant 11 : index
    %c0_319 = arith.constant 0 : index
    %c0_320 = arith.constant 0 : index
    %387 = vector.load %arg4[%c11_318, %c0_319, %c0_320] : memref<17x8x132xf32, #tpu.memory_space<vmem>>, vector<1x8x132xf32>
    %388 = vector.shape_cast %387 : vector<1x8x132xf32> to vector<8x132xf32>
    %cst_321 = arith.constant dense<0.000000e+00> : vector<8x32xf32>
    %389 = tpu.matmul %388, %339, %cst_321 {dimension_numbers = #tpu.dot_dimension_numbers<[1], [0], [0], [1], [0, 0, 1, 1], [], []>} : vector<8x132xf32>, vector<132x32xf32>, vector<8x32xf32> -> vector<8x32xf32>
    %390 = arith.maximumf %386, %389 : vector<8x32xf32>
    %c12_322 = arith.constant 12 : index
    %c0_323 = arith.constant 0 : index
    %c0_324 = arith.constant 0 : index
    %391 = vector.load %arg4[%c12_322, %c0_323, %c0_324] : memref<17x8x132xf32, #tpu.memory_space<vmem>>, vector<1x8x132xf32>
    %392 = vector.shape_cast %391 : vector<1x8x132xf32> to vector<8x132xf32>
    %cst_325 = arith.constant dense<0.000000e+00> : vector<8x32xf32>
    %393 = tpu.matmul %392, %339, %cst_325 {dimension_numbers = #tpu.dot_dimension_numbers<[1], [0], [0], [1], [0, 0, 1, 1], [], []>} : vector<8x132xf32>, vector<132x32xf32>, vector<8x32xf32> -> vector<8x32xf32>
    %394 = arith.maximumf %390, %393 : vector<8x32xf32>
    %c13_326 = arith.constant 13 : index
    %c0_327 = arith.constant 0 : index
    %c0_328 = arith.constant 0 : index
    %395 = vector.load %arg4[%c13_326, %c0_327, %c0_328] : memref<17x8x132xf32, #tpu.memory_space<vmem>>, vector<1x8x132xf32>
    %396 = vector.shape_cast %395 : vector<1x8x132xf32> to vector<8x132xf32>
    %cst_329 = arith.constant dense<0.000000e+00> : vector<8x32xf32>
    %397 = tpu.matmul %396, %339, %cst_329 {dimension_numbers = #tpu.dot_dimension_numbers<[1], [0], [0], [1], [0, 0, 1, 1], [], []>} : vector<8x132xf32>, vector<132x32xf32>, vector<8x32xf32> -> vector<8x32xf32>
    %398 = arith.maximumf %394, %397 : vector<8x32xf32>
    %c14_330 = arith.constant 14 : index
    %c0_331 = arith.constant 0 : index
    %c0_332 = arith.constant 0 : index
    %399 = vector.load %arg4[%c14_330, %c0_331, %c0_332] : memref<17x8x132xf32, #tpu.memory_space<vmem>>, vector<1x8x132xf32>
    %400 = vector.shape_cast %399 : vector<1x8x132xf32> to vector<8x132xf32>
    %cst_333 = arith.constant dense<0.000000e+00> : vector<8x32xf32>
    %401 = tpu.matmul %400, %339, %cst_333 {dimension_numbers = #tpu.dot_dimension_numbers<[1], [0], [0], [1], [0, 0, 1, 1], [], []>} : vector<8x132xf32>, vector<132x32xf32>, vector<8x32xf32> -> vector<8x32xf32>
    %402 = arith.maximumf %398, %401 : vector<8x32xf32>
    %c15_334 = arith.constant 15 : index
    %c0_335 = arith.constant 0 : index
    %c0_336 = arith.constant 0 : index
    %403 = vector.load %arg4[%c15_334, %c0_335, %c0_336] : memref<17x8x132xf32, #tpu.memory_space<vmem>>, vector<1x8x132xf32>
    %404 = vector.shape_cast %403 : vector<1x8x132xf32> to vector<8x132xf32>
    %cst_337 = arith.constant dense<0.000000e+00> : vector<8x32xf32>
    %405 = tpu.matmul %404, %339, %cst_337 {dimension_numbers = #tpu.dot_dimension_numbers<[1], [0], [0], [1], [0, 0, 1, 1], [], []>} : vector<8x132xf32>, vector<132x32xf32>, vector<8x32xf32> -> vector<8x32xf32>
    %406 = arith.maximumf %402, %405 : vector<8x32xf32>
    %c16_338 = arith.constant 16 : index
    %c0_339 = arith.constant 0 : index
    %c0_340 = arith.constant 0 : index
    %407 = vector.load %arg4[%c16_338, %c0_339, %c0_340] : memref<17x8x132xf32, #tpu.memory_space<vmem>>, vector<1x8x132xf32>
    %408 = vector.shape_cast %407 : vector<1x8x132xf32> to vector<8x132xf32>
    %cst_341 = arith.constant dense<0.000000e+00> : vector<8x32xf32>
    %409 = tpu.matmul %408, %339, %cst_341 {dimension_numbers = #tpu.dot_dimension_numbers<[1], [0], [0], [1], [0, 0, 1, 1], [], []>} : vector<8x132xf32>, vector<132x32xf32>, vector<8x32xf32> -> vector<8x32xf32>
    %410 = arith.maximumf %406, %409 : vector<8x32xf32>
    %c0_342 = arith.constant 0 : index
    %c0_343 = arith.constant 0 : index
    %411 = vector.load %arg10[%c0_342, %c0_343] : memref<1x16xf32, #tpu.memory_space<vmem>>, vector<1x16xf32>
    %412 = vector.extract_strided_slice %376 {offsets = [0, 0], sizes = [8, 16], strides = [1, 1]} : vector<8x32xf32> to vector<8x16xf32>
    %413 = vector.extract_strided_slice %376 {offsets = [0, 16], sizes = [8, 16], strides = [1, 1]} : vector<8x32xf32> to vector<8x16xf32>
    %414 = arith.maximumf %412, %413 : vector<8x16xf32>
    %415 = vector.broadcast %411 : vector<1x16xf32> to vector<8x16xf32>
    %416 = arith.addf %414, %415 : vector<8x16xf32>
    %cst_344 = arith.constant 0.000000e+00 : f32
    %417 = vector.broadcast %cst_344 : f32 to vector<8x16xf32>
    %418 = arith.maximumf %416, %417 : vector<8x16xf32>
    %419 = vector.extract_strided_slice %410 {offsets = [0, 0], sizes = [8, 16], strides = [1, 1]} : vector<8x32xf32> to vector<8x16xf32>
    %420 = vector.extract_strided_slice %410 {offsets = [0, 16], sizes = [8, 16], strides = [1, 1]} : vector<8x32xf32> to vector<8x16xf32>
    %421 = arith.maximumf %419, %420 : vector<8x16xf32>
    %422 = vector.broadcast %411 : vector<1x16xf32> to vector<8x16xf32>
    %423 = arith.addf %421, %422 : vector<8x16xf32>
    %cst_345 = arith.constant 0.000000e+00 : f32
    %424 = vector.broadcast %cst_345 : f32 to vector<8x16xf32>
    %425 = arith.maximumf %423, %424 : vector<8x16xf32>
    %c0_346 = arith.constant 0 : index
    %c64 = arith.constant 64 : index
    %426 = vector.load %arg13[%c0_346, %c64] : memref<8x96xf32, #tpu.memory_space<vmem>>, vector<8x16xf32>
    tpu.vector_store %arg13[%c0_346, %c64], %418 {strides = array<i32>} : memref<8x96xf32, #tpu.memory_space<vmem>>, vector<8x16xf32>,
    %c0_347 = arith.constant 0 : index
    %c80 = arith.constant 80 : index
    %427 = vector.load %arg13[%c0_347, %c80] : memref<8x96xf32, #tpu.memory_space<vmem>>, vector<8x16xf32>
    tpu.vector_store %arg13[%c0_347, %c80], %425 {strides = array<i32>} : memref<8x96xf32, #tpu.memory_space<vmem>>, vector<8x16xf32>,
    return
  }
  func.func @transform_0(%arg0: i32) -> (i32, i32, i32) {
    %c0_i32 = arith.constant 0 : i32
    %c0_i32_0 = arith.constant 0 : i32
    %c0_i32_1 = arith.constant 0 : i32
    return %c0_i32, %arg0, %c0_i32_0 : i32, i32, i32
  }
  func.func @transform_1(%arg0: i32) -> (i32, i32, i32) {
    %c0_i32 = arith.constant 0 : i32
    %c0_i32_0 = arith.constant 0 : i32
    %c0_i32_1 = arith.constant 0 : i32
    return %c0_i32, %arg0, %c0_i32_0 : i32, i32, i32
  }
  func.func @transform_2(%arg0: i32) -> (i32, i32, i32) {
    %c0_i32 = arith.constant 0 : i32
    %c0_i32_0 = arith.constant 0 : i32
    %c0_i32_1 = arith.constant 0 : i32
    return %c0_i32, %arg0, %c0_i32_0 : i32, i32, i32
  }
  func.func @transform_3(%arg0: i32) -> (i32, i32, i32) {
    %c0_i32 = arith.constant 0 : i32
    %c0_i32_0 = arith.constant 0 : i32
    %c0_i32_1 = arith.constant 0 : i32
    return %c0_i32, %arg0, %c0_i32_0 : i32, i32, i32
  }
  func.func @transform_4(%arg0: i32) -> (i32, i32) {
    %c0_i32 = arith.constant 0 : i32
    %c0_i32_0 = arith.constant 0 : i32
    %c0_i32_1 = arith.constant 0 : i32
    return %c0_i32, %c0_i32_0 : i32, i32
  }
  func.func @transform_5(%arg0: i32) -> (i32, i32) {
    %c0_i32 = arith.constant 0 : i32
    %c0_i32_0 = arith.constant 0 : i32
    %c0_i32_1 = arith.constant 0 : i32
    return %c0_i32, %c0_i32_0 : i32, i32
  }
  func.func @transform_6(%arg0: i32) -> (i32, i32) {
    %c0_i32 = arith.constant 0 : i32
    %c0_i32_0 = arith.constant 0 : i32
    %c0_i32_1 = arith.constant 0 : i32
    return %c0_i32, %c0_i32_0 : i32, i32
  }
  func.func @transform_7(%arg0: i32) -> (i32, i32) {
    %c0_i32 = arith.constant 0 : i32
    %c0_i32_0 = arith.constant 0 : i32
    %c0_i32_1 = arith.constant 0 : i32
    return %c0_i32, %c0_i32_0 : i32, i32
  }
  func.func @transform_8(%arg0: i32) -> (i32, i32) {
    %c0_i32 = arith.constant 0 : i32
    %c0_i32_0 = arith.constant 0 : i32
    %c0_i32_1 = arith.constant 0 : i32
    return %c0_i32, %c0_i32_0 : i32, i32
  }
  func.func @transform_9(%arg0: i32) -> (i32, i32) {
    %c0_i32 = arith.constant 0 : i32
    %c0_i32_0 = arith.constant 0 : i32
    %c0_i32_1 = arith.constant 0 : i32
    return %c0_i32, %c0_i32_0 : i32, i32
  }
  func.func @transform_10(%arg0: i32) -> (i32, i32, i32) {
    %c0_i32 = arith.constant 0 : i32
    %c0_i32_0 = arith.constant 0 : i32
    %c0_i32_1 = arith.constant 0 : i32
    %c0_i32_2 = arith.constant 0 : i32
    return %c0_i32, %c0_i32_0, %c0_i32_1 : i32, i32, i32
  }
  func.func @transform_11(%arg0: i32) -> (i32, i32) {
    %c0_i32 = arith.constant 0 : i32
    %c0_i32_0 = arith.constant 0 : i32
    %c0_i32_1 = arith.constant 0 : i32
    return %c0_i32, %c0_i32_0 : i32, i32
  }
  func.func @transform_12(%arg0: i32) -> (i32, i32) {
    %c0_i32 = arith.constant 0 : i32
    %c0_i32_0 = arith.constant 0 : i32
    return %arg0, %c0_i32 : i32, i32
  }
  func.func @transform_13(%arg0: i32) -> (i32, i32) {
    %c0_i32 = arith.constant 0 : i32
    %c0_i32_0 = arith.constant 0 : i32
    return %arg0, %c0_i32 : i32, i32
  }
}

</mosaic_0001>

<bundles_post_ra>
// kernel: tpu_custom_call.1
= control target key start
LH: loop header
LB: loop body
LE: loop exit
PB: predicated region body
PF: predicated region fallthrough
CT: control target
= control target key end

     0   :  { %s8768_s0 = inlined_call_operand.vmem [shape: f32[20,8,33], index: 0, kind: input, shape index: {}]   ;;  %s8769_s1 = inlined_call_operand.hbm [shape: f32[19,8,66], index: 1, kind: input, shape index: {}]   ;;  %s8770_s2 = inlined_call_operand.hbm [shape: f32[18,8,99], index: 2, kind: input, shape index: {}]   ;;  %s8771_s3 = inlined_call_operand.vmem [shape: f32[17,8,132], index: 3, kind: input, shape index: {}]   ;;  %s8772_s4 = inlined_call_operand.vmem [shape: f32[66,32], index: 4, kind: input, shape index: {}]   ;;  %s8773_s5 = inlined_call_operand.vmem [shape: f32[99,32], index: 5, kind: input, shape index: {}]   ;;  %s8774_s6 = inlined_call_operand.vmem [shape: f32[132,32], index: 6, kind: input, shape index: {}]   ;;  %s8775_s7 = inlined_call_operand.vmem [shape: f32[1,16], index: 7, kind: input, shape index: {}]   ;;  %s8776_s8 = inlined_call_operand.vmem [shape: f32[1,16], index: 8, kind: input, shape index: {}]   ;;  %s8777_s9 = inlined_call_operand.vmem [shape: f32[1,16], index: 9, kind: input, shape index: {}]   ;;  %s8778_s10 = inlined_call_operand.vmem [shape: f32[20,1,33], index: 10, kind: input, shape index: {}]   ;;  %s8779_s11 = inlined_call_operand.<no memory space> [shape: f32[1,1], index: 11, kind: input, shape index: {}]   ;;  %s8780_s12 = inlined_call_operand.hbm [shape: f32[8,96], index: 12, kind: output, shape index: {0}]   ;;  %s8781_s13 = inlined_call_operand.hbm [shape: f32[8,32], index: 13, kind: output, shape index: {1}]  }
   0x1   :  { %v19_v0 = vstv %s8779_s11 }
   0x2   :  { %20 = vst [vmem:[#allocation2] sm:$0x1] %v19_v0 }
   0x3   :  { %21 = vsyncpa [#allocation4], 0 }
   0x4   :  { %22 = vsyncpa [#allocation7], 0 }
   0x5   :  { %23 = vsyncpa [#allocation5], 0 }
   0x6   :  { %24 = vsyncpa [#allocation10], 0  ;;  %s7266_s27 = smov [#allocation3]   ;;  %s7170_s14 = scalar_lea.hbm %s8769_s1, 2432 }
   0x7   :  { %s32_s28 = sshll.u32 %s7266_s27, 4  ;;  %p7171_p0 = scmp.ne.s32.totalorder %s8769_s1, %s7170_s14  ;;  %s33_s28 = int_to_ptr.vmem [resolvable:$true] %s32_s28 }
   0x8   :  { %p7174_p1 = scmp.lt.u32.totalorder %s7170_s14, %s8769_s1 }
   0xa   :  { %p7176_p2 = pnand %p7174_p1, %p7171_p0 }
   0xc   :  { %7179 = shalt.err (!%p7176_p2)
}
   0xd   :  { %s7180_s11 = scalar_lea.vmem %s33_s28, 2432  ;;  %p7185_p4 = scmp.lt.s32.totalorder %s33_s28, %s33_s28 }
   0xe   :  { %p7181_p3 = scmp.ne.s32.totalorder %s33_s28, %s7180_s11  ;;  %p7186_p5 = scmp.lt.s32.totalorder %s7180_s11, %s7180_s11 }
  0x10   :  { %p7187_p6 = por %p7186_p5, %p7185_p4 }
  0x12   :  { %p7188_p7 = pnand %p7187_p6, %p7181_p3 }
  0x14   :  { %7191 = shalt.err (!%p7188_p7)
}
  0x15   :  { %s7267_s19 = smov 128   ;;  %s7268_s20 = smov 8  }
  0x16   :  { %38 = dma.hbm_to_vmem [thread:$0]  %s8769_s1, 2432, %s33_s28, [#allocation4], %s7267_s19, %s7267_s19, %s7268_s20  }
  0x17   :  { %s7269_s23 = smov [#allocation6]   ;;  %s7192_s27 = scalar_lea.hbm %s8770_s2, 2304 }
  0x18   :  { %s44_s24 = sshll.u32 %s7269_s23, 4  ;;  %p7193_p8 = scmp.ne.s32.totalorder %s8770_s2, %s7192_s27  ;;  %s45_s24 = int_to_ptr.vmem [resolvable:$true] %s44_s24 }
  0x19   :  { %p7196_p9 = scmp.lt.u32.totalorder %s7192_s27, %s8770_s2 }
  0x1b   :  { %p7198_p10 = pnand %p7196_p9, %p7193_p8 }
  0x1d   :  { %7201 = shalt.err (!%p7198_p10)
}
  0x1e   :  { %s7202_s16 = scalar_lea.vmem %s45_s24, 2304  ;;  %p7207_p12 = scmp.lt.s32.totalorder %s45_s24, %s45_s24 }
  0x1f   :  { %p7203_p11 = scmp.ne.s32.totalorder %s45_s24, %s7202_s16  ;;  %p7208_p13 = scmp.lt.s32.totalorder %s7202_s16, %s7202_s16 }
  0x21   :  { %p7209_p0 = por %p7208_p13, %p7207_p12 }
  0x23   :  { %p7210_p1 = pnand %p7209_p0, %p7203_p11 }
  0x25   :  { %7213 = shalt.err (!%p7210_p1)
}
  0x26   :  { %50 = dma.hbm_to_vmem [thread:$0]  %s8770_s2, 2304, %s45_s24, [#allocation7], %s7267_s19, %s7267_s19, %s7268_s20  }
  0x27   :  { %7258 = dma.done.wait [#allocation4], 2432  }
  0x28   :  { %7259 = vsyncadd [#allocation4], 4294964864 }
  0x29   :  { %7260 = dma.done.wait [#allocation7], 2304  }
  0x2a   :  { %7261 = vsyncadd [#allocation7], 4294964992  ;;  %v7270_v1 = vmov 0.0|0.0   ;;  %vm7271_vm0 = vmmov 0   ;;  %v7272_v2 = vmov 0.0   ;;  %v330_v3 = vld [vmem:[%s8772_s4] sm:$0xff] }
  0x2b   :  { %6192 = vmatprep.subr.bf16.mxu0 %v7270_v1  ;;  %6204 = vmatprep.subr.bf16.mxu1 %v7270_v1  ;;  %v331_v4 = vld [vmem:[%s8772_s4 + $0x8] sm:$0xff]  ;;  %v332_v5 = vld [vmem:[%s8772_s4 + $0x10] sm:$0xff]  ;;  %v333_v7 = vld [vmem:[%s8772_s4 + $0x18] sm:$0xff]  ;;  %vm344_vm1 = vcmask 1041408   ;;  %vm340_vm2 = vcmask 539648   ;;  %vm1835_vm3 = vcmask 1042432  }
  0x2c   :  { %5310 = vmatprep.mubr.msk.f32.mxu1 %vm7271_vm0, %v7272_v2  ;;  %5289 = vmatprep.mubr.msk.f32.mxu0 %vm7271_vm0, %v7272_v2  ;;  %v7394_v6 = vpack.c.bf16 %v331_v4, %v330_v3  ;;  %v7401_v8 = vpack.c.bf16 %v333_v7, %v332_v5  ;;  %v334_v9 = vld [vmem:[%s8772_s4 + $0x20] sm:$0xff]  ;;  %v335_v10 = vld [vmem:[%s8772_s4 + $0x28] sm:$0xff]  ;;  %v336_v12 = vld [vmem:[%s8772_s4 + $0x30] sm:$0xff]  ;;  %vm1831_vm4 = vcmask 809984   ;;  %s7273_s20 = smov 112   ;;  %vm3252_vm6 = vcmask 31744  }
  0x2d   :  { %v7413_v11 = vpack.c.bf16 %v335_v10, %v334_v9  ;;  %v337_v13 = vld [vmem:[%s8772_s4 + $0x38] sm:$0xff]  ;;  %v7436_v15 = vld [vmem:[%s8772_s4 + $0x40] sm:$0x3]  ;;  %v419_v16 = vld [vmem:[#allocation3 + $0x8] sm:$0xff]  ;;  %vm3256_vm7 = vcmask 1043456   ;;  %s7276_s28 = smov 48  }
  0x2e   :  { %6194 = vmatpush3.bf16.msra.mxu0 %v7394_v6  ;;  %6206 = vmatpush3.bf16.msra.mxu1 %v7394_v6  ;;  %v7425_v14 = vpack.c.bf16 %v337_v13, %v336_v12  ;;  %v339_v17 = vld [vmem:[#allocation3] sm:$0xff]  ;;  %v495_v18 = vld [vmem:[#allocation3 + $0x10] sm:$0xff]  ;;  %v571_v19 = vld [vmem:[#allocation3 + $0x18] sm:$0xff]  ;;  %vm325_vm8 = vcmask 261120  }
  0x2f   :  { %6195 = vmatprep.subr.bf16.mxu0 %v7270_v1  ;;  %6207 = vmatprep.subr.bf16.mxu1 %v7270_v1  ;;  %v647_v20 = vld [vmem:[#allocation3 + $0x20] sm:$0xff]  ;;  %v723_v21 = vld [vmem:[#allocation3 + $0x28] sm:$0xff]  ;;  %v799_v22 = vld [vmem:[#allocation3 + $0x30] sm:$0xff] }
  0x30   :  { %v875_v23 = vld [vmem:[#allocation3 + $0x38] sm:$0xff]  ;;  %v951_v24 = vld [vmem:[#allocation3 + $0x40] sm:$0xff]  ;;  %v1027_v25 = vld [vmem:[#allocation3 + $0x48] sm:$0xff] }
  0x31   :  { %v1105_v26 = vld [vmem:[#allocation3 + $0x50] sm:$0xff]  ;;  %v1181_v27 = vld [vmem:[#allocation3 + $0x58] sm:$0xff]  ;;  %v1257_v28 = vld [vmem:[#allocation3 + $0x60] sm:$0xff] }
  0x32   :  { %6197 = vmatpush3.bf16.msra.mxu0 %v7401_v8  ;;  %6209 = vmatpush3.bf16.msra.mxu1 %v7401_v8  ;;  %v1333_v29 = vld [vmem:[#allocation3 + $0x68] sm:$0xff]  ;;  %v1409_v30 = vld [vmem:[#allocation3 + $0x70] sm:$0xff]  ;;  %v1485_v31 = vld [vmem:[#allocation3 + $0x78] sm:$0xff] }
  0x33   :  { %6198 = vmatprep.subr.bf16.mxu0 %v7270_v1  ;;  %6210 = vmatprep.subr.bf16.mxu1 %v7270_v1  ;;  %v1817_v32 = vld [vmem:[%s8773_s5] sm:$0xff]  ;;  %v1818_v33 = vld [vmem:[%s8773_s5 + $0x8] sm:$0xff]  ;;  %v1819_v37 = vld [vmem:[%s8773_s5 + $0x10] sm:$0xff] }
  0x34   :  { %v1561_v34 = vld [vmem:[#allocation3 + $0x80] sm:$0xff]  ;;  %v1637_v35 = vld [vmem:[#allocation3 + $0x88] sm:$0xff]  ;;  %v7668_v36 = vpack.c.bf16 %v1818_v33, %v1817_v32  ;;  %v1820_v38 = vld [vmem:[%s8773_s5 + $0x18] sm:$0xff] }
  0x35   :  { %v7686_v39 = vpack.c.bf16 %v1820_v38, %v1819_v37  ;;  %v1821_v40 = vld [vmem:[%s8773_s5 + $0x20] sm:$0xff]  ;;  %v1822_v41 = vld [vmem:[%s8773_s5 + $0x28] sm:$0xff]  ;;  %v1823_v43 = vld [vmem:[%s8773_s5 + $0x30] sm:$0xff] }
  0x36   :  { %6200 = vmatpush3.bf16.msra.mxu0 %v7413_v11  ;;  %6212 = vmatpush3.bf16.msra.mxu1 %v7413_v11  ;;  %v7702_v42 = vpack.c.bf16 %v1822_v41, %v1821_v40  ;;  %v1824_v44 = vld [vmem:[%s8773_s5 + $0x38] sm:$0xff]  ;;  %v1825_v46 = vld [vmem:[%s8773_s5 + $0x40] sm:$0xff]  ;;  %v1826_v47 = vld [vmem:[%s8773_s5 + $0x48] sm:$0xff] }
  0x37   :  { %6201 = vmatprep.subr.bf16.mxu0 %v7270_v1  ;;  %6213 = vmatprep.subr.bf16.mxu1 %v7270_v1  ;;  %v7714_v45 = vpack.c.bf16 %v1824_v44, %v1823_v43  ;;  %v7726_v48 = vpack.c.bf16 %v1826_v47, %v1825_v46  ;;  %v1827_v49 = vld [vmem:[%s8773_s5 + $0x50] sm:$0xff]  ;;  %v1828_v50 = vld [vmem:[%s8773_s5 + $0x58] sm:$0xff]  ;;  %v7753_v53 = vld [vmem:[%s8773_s5 + $0x60] sm:$0x7]  ;;  %s7277_s5 = smov 32  }
  0x38   :  { %v1713_v51 = vld [vmem:[#allocation3 + $0x90] sm:$0xff]  ;;  %v7739_v52 = vpack.c.bf16 %v1828_v50, %v1827_v49  ;;  %v1830_v54 = vld [vmem:[#allocation6] sm:$0xff]  ;;  %v1910_v55 = vld [vmem:[#allocation6 + $0x8] sm:$0xff] }
  0x39   :  { %v1986_v56 = vld [vmem:[#allocation6 + $0x10] sm:$0xff]  ;;  %v2062_v62 = vld [vmem:[#allocation6 + $0x18] sm:$0xff]  ;;  %v2138_v63 = vld [vmem:[#allocation6 + $0x20] sm:$0xff] }
  0x3a   :  { %6203 = vmatpush3.bf16.msra.mxu0 %v7425_v14  ;;  %6215 = vmatpush3.bf16.msra.mxu1 %v7425_v14  ;;  %v2518_v33 = vld [vmem:[#allocation6 + $0x48] sm:$0xff]  ;;  %v2669_v46 = vld [vmem:[#allocation6 + $0x58] sm:$0xff] }
  0x3b   :  { %5287 = vmatprep.subr.mxu0 %v7272_v2  ;;  %5308 = vmatprep.subr.mxu1 %v7272_v2 }
  0x3e   :  { %5288 = vmatpush3.msk.msra.mxu0 %vm344_vm1, %v7436_v15  ;;  %5309 = vmatpush3.msk.msra.mxu1 %vm344_vm1, %v7436_v15 }
  0x3f   :  { %5311 = vmatmul.mubr.msk.f32.vlgmr.msra.gmra.mrb[0].mxu1 %vm340_vm2, %v419_v16  ;;  %6216 = vmatprep.subr.bf16.mxu0 %v7270_v1 }
  0x40   :  { %6228 = vmatprep.subr.bf16.mxu1 %v7270_v1  ;;  %5290 = vmatmul.mubr.msk.f32.vlgmr.msra.gmra.mrb[0].mxu0 %vm340_vm2, %v339_v17 }
  0x41   :  { %6218 = vmatpush3.bf16.msra.mxu0 %v7394_v6  ;;  %6230 = vmatpush3.bf16.msra.mxu1 %v7394_v6 }
  0x42   :  { %6219 = vmatprep.subr.bf16.mxu0 %v7270_v1  ;;  %6231 = vmatprep.subr.bf16.mxu1 %v7270_v1 }
  0x43   :  { %5331 = vmatprep.mubr.msk.f32.mxu0 %vm7271_vm0, %v7272_v2  ;;  %5352 = vmatprep.mubr.msk.f32.mxu1 %vm7271_vm0, %v7272_v2 }
  0x45   :  { %6221 = vmatpush3.bf16.msra.mxu0 %v7401_v8  ;;  %6233 = vmatpush3.bf16.msra.mxu1 %v7401_v8 }
  0x46   :  { %6222 = vmatprep.subr.bf16.mxu0 %v7270_v1  ;;  %6234 = vmatprep.subr.bf16.mxu1 %v7270_v1 }
  0x49   :  { %6224 = vmatpush3.bf16.msra.mxu0 %v7413_v11  ;;  %6236 = vmatpush3.bf16.msra.mxu1 %v7413_v11 }
  0x4a   :  { %6225 = vmatprep.subr.bf16.mxu0 %v7270_v1  ;;  %6237 = vmatprep.subr.bf16.mxu1 %v7270_v1 }
  0x4d   :  { %6227 = vmatpush3.bf16.msra.mxu0 %v7425_v14  ;;  %6239 = vmatpush3.bf16.msra.mxu1 %v7425_v14 }
  0x4e   :  { %5329 = vmatprep.subr.mxu0 %v7272_v2  ;;  %5350 = vmatprep.subr.mxu1 %v7272_v2 }
  0x51   :  { %5330 = vmatpush3.msk.msra.mxu0 %vm344_vm1, %v7436_v15  ;;  %5351 = vmatpush3.msk.msra.mxu1 %vm344_vm1, %v7436_v15 }
  0x52   :  { %5332 = vmatmul.mubr.msk.f32.vlgmr.msra.gmra.mrb[2].mxu0 %vm340_vm2, %v495_v18  ;;  %5353 = vmatmul.mubr.msk.f32.vlgmr.msra.gmra.mrb[2].mxu1 %vm340_vm2, %v571_v19 }
  0x53   :  { %6240 = vmatprep.subr.bf16.mxu0 %v7270_v1  ;;  %6252 = vmatprep.subr.bf16.mxu1 %v7270_v1 }
  0x54   :  { %6242 = vmatpush3.bf16.msra.mxu0 %v7394_v6  ;;  %6254 = vmatpush3.bf16.msra.mxu1 %v7394_v6 }
  0x55   :  { %6243 = vmatprep.subr.bf16.mxu0 %v7270_v1  ;;  %6255 = vmatprep.subr.bf16.mxu1 %v7270_v1 }
  0x56   :  { %5373 = vmatprep.mubr.msk.f32.mxu0 %vm7271_vm0, %v7272_v2  ;;  %5394 = vmatprep.mubr.msk.f32.mxu1 %vm7271_vm0, %v7272_v2 }
  0x58   :  { %6245 = vmatpush3.bf16.msra.mxu0 %v7401_v8  ;;  %6257 = vmatpush3.bf16.msra.mxu1 %v7401_v8 }
  0x59   :  { %6246 = vmatprep.subr.bf16.mxu0 %v7270_v1  ;;  %6258 = vmatprep.subr.bf16.mxu1 %v7270_v1 }
  0x5c   :  { %6248 = vmatpush3.bf16.msra.mxu0 %v7413_v11  ;;  %6260 = vmatpush3.bf16.msra.mxu1 %v7413_v11 }
  0x5d   :  { %6249 = vmatprep.subr.bf16.mxu0 %v7270_v1  ;;  %6261 = vmatprep.subr.bf16.mxu1 %v7270_v1 }
  0x60   :  { %6251 = vmatpush3.bf16.msra.mxu0 %v7425_v14  ;;  %6263 = vmatpush3.bf16.msra.mxu1 %v7425_v14 }
  0x61   :  { %5371 = vmatprep.subr.mxu0 %v7272_v2  ;;  %5392 = vmatprep.subr.mxu1 %v7272_v2 }
  0x64   :  { %5372 = vmatpush3.msk.msra.mxu0 %vm344_vm1, %v7436_v15  ;;  %5393 = vmatpush3.msk.msra.mxu1 %vm344_vm1, %v7436_v15 }
  0x65   :  { %5374 = vmatmul.mubr.msk.f32.vlgmr.msra.gmra.mrb[4].mxu0 %vm340_vm2, %v647_v20  ;;  %5395 = vmatmul.mubr.msk.f32.vlgmr.msra.gmra.mrb[4].mxu1 %vm340_vm2, %v723_v21 }
  0x66   :  { %6264 = vmatprep.subr.bf16.mxu0 %v7270_v1  ;;  %6276 = vmatprep.subr.bf16.mxu1 %v7270_v1 }
  0x67   :  { %6266 = vmatpush3.bf16.msra.mxu0 %v7394_v6  ;;  %6278 = vmatpush3.bf16.msra.mxu1 %v7394_v6 }
  0x68   :  { %6267 = vmatprep.subr.bf16.mxu0 %v7270_v1  ;;  %6279 = vmatprep.subr.bf16.mxu1 %v7270_v1 }
  0x69   :  { %5415 = vmatprep.mubr.msk.f32.mxu0 %vm7271_vm0, %v7272_v2  ;;  %5436 = vmatprep.mubr.msk.f32.mxu1 %vm7271_vm0, %v7272_v2 }
  0x6b   :  { %6269 = vmatpush3.bf16.msra.mxu0 %v7401_v8  ;;  %6281 = vmatpush3.bf16.msra.mxu1 %v7401_v8 }
  0x6c   :  { %6270 = vmatprep.subr.bf16.mxu0 %v7270_v1  ;;  %6282 = vmatprep.subr.bf16.mxu1 %v7270_v1 }
  0x6f   :  { %6272 = vmatpush3.bf16.msra.mxu0 %v7413_v11  ;;  %6284 = vmatpush3.bf16.msra.mxu1 %v7413_v11 }
  0x70   :  { %6273 = vmatprep.subr.bf16.mxu0 %v7270_v1  ;;  %6285 = vmatprep.subr.bf16.mxu1 %v7270_v1 }
  0x73   :  { %6275 = vmatpush3.bf16.msra.mxu0 %v7425_v14  ;;  %6287 = vmatpush3.bf16.msra.mxu1 %v7425_v14 }
  0x74   :  { %5413 = vmatprep.subr.mxu0 %v7272_v2  ;;  %5434 = vmatprep.subr.mxu1 %v7272_v2 }
  0x77   :  { %5414 = vmatpush3.msk.msra.mxu0 %vm344_vm1, %v7436_v15  ;;  %5435 = vmatpush3.msk.msra.mxu1 %vm344_vm1, %v7436_v15 }
  0x78   :  { %5416 = vmatmul.mubr.msk.f32.vlgmr.msra.gmra.mrb[6].mxu0 %vm340_vm2, %v799_v22  ;;  %5437 = vmatmul.mubr.msk.f32.vlgmr.msra.gmra.mrb[6].mxu1 %vm340_vm2, %v875_v23  ;;  %v2366_v22 = vld [vmem:[#allocation6 + $0x38] sm:$0xff]  ;;  %v2442_v23 = vld [vmem:[#allocation6 + $0x40] sm:$0xff] }
  0x79   :  { %6288 = vmatprep.subr.bf16.mxu0 %v7270_v1  ;;  %6300 = vmatprep.subr.bf16.mxu1 %v7270_v1 }
  0x7a   :  { %6290 = vmatpush3.bf16.msra.mxu0 %v7394_v6  ;;  %6302 = vmatpush3.bf16.msra.mxu1 %v7394_v6 }
  0x7b   :  { %6291 = vmatprep.subr.bf16.mxu0 %v7270_v1  ;;  %6303 = vmatprep.subr.bf16.mxu1 %v7270_v1 }
  0x7c   :  { %5457 = vmatprep.mubr.msk.f32.mxu0 %vm7271_vm0, %v7272_v2  ;;  %5478 = vmatprep.mubr.msk.f32.mxu1 %vm7271_vm0, %v7272_v2 }
  0x7e   :  { %6293 = vmatpush3.bf16.msra.mxu0 %v7401_v8  ;;  %6305 = vmatpush3.bf16.msra.mxu1 %v7401_v8 }
  0x7f   :  { %6294 = vmatprep.subr.bf16.mxu0 %v7270_v1  ;;  %6306 = vmatprep.subr.bf16.mxu1 %v7270_v1 }
  0x82   :  { %6296 = vmatpush3.bf16.msra.mxu0 %v7413_v11  ;;  %6308 = vmatpush3.bf16.msra.mxu1 %v7413_v11 }
  0x83   :  { %6297 = vmatprep.subr.bf16.mxu0 %v7270_v1  ;;  %6309 = vmatprep.subr.bf16.mxu1 %v7270_v1 }
  0x86   :  { %6299 = vmatpush3.bf16.msra.mxu0 %v7425_v14  ;;  %6311 = vmatpush3.bf16.msra.mxu1 %v7425_v14 }
  0x87   :  { %5455 = vmatprep.subr.mxu0 %v7272_v2  ;;  %5476 = vmatprep.subr.mxu1 %v7272_v2 }
  0x8a   :  { %5456 = vmatpush3.msk.msra.mxu0 %vm344_vm1, %v7436_v15  ;;  %5477 = vmatpush3.msk.msra.mxu1 %vm344_vm1, %v7436_v15 }
  0x8b   :  { %5458 = vmatmul.mubr.msk.f32.vlgmr.msra.gmra.mrb[8].mxu0 %vm340_vm2, %v951_v24  ;;  %5479 = vmatmul.mubr.msk.f32.vlgmr.msra.gmra.mrb[8].mxu1 %vm340_vm2, %v1027_v25  ;;  %v327_v24 = vlaneseq }
  0x8c   :  { %6312 = vmatprep.subr.bf16.mxu0 %v7270_v1  ;;  %6324 = vmatprep.subr.bf16.mxu1 %v7270_v1 }
  0x8d   :  { %6314 = vmatpush3.bf16.msra.mxu0 %v7394_v6  ;;  %6326 = vmatpush3.bf16.msra.mxu1 %v7394_v6 }
  0x8e   :  { %6315 = vmatprep.subr.bf16.mxu0 %v7270_v1  ;;  %6327 = vmatprep.subr.bf16.mxu1 %v7270_v1 }
  0x8f   :  { %5499 = vmatprep.mubr.msk.f32.mxu0 %vm7271_vm0, %v7272_v2  ;;  %5520 = vmatprep.mubr.msk.f32.mxu1 %vm7271_vm0, %v7272_v2 }
  0x91   :  { %6317 = vmatpush3.bf16.msra.mxu0 %v7401_v8  ;;  %6329 = vmatpush3.bf16.msra.mxu1 %v7401_v8 }
  0x92   :  { %6318 = vmatprep.subr.bf16.mxu0 %v7270_v1  ;;  %6330 = vmatprep.subr.bf16.mxu1 %v7270_v1 }
  0x95   :  { %6320 = vmatpush3.bf16.msra.mxu0 %v7413_v11  ;;  %6332 = vmatpush3.bf16.msra.mxu1 %v7413_v11 }
  0x96   :  { %6321 = vmatprep.subr.bf16.mxu0 %v7270_v1  ;;  %6333 = vmatprep.subr.bf16.mxu1 %v7270_v1 }
  0x99   :  { %6323 = vmatpush3.bf16.msra.mxu0 %v7425_v14  ;;  %6335 = vmatpush3.bf16.msra.mxu1 %v7425_v14 }
  0x9a   :  { %5497 = vmatprep.subr.mxu0 %v7272_v2  ;;  %5518 = vmatprep.subr.mxu1 %v7272_v2 }
  0x9d   :  { %5498 = vmatpush3.msk.msra.mxu0 %vm344_vm1, %v7436_v15  ;;  %5519 = vmatpush3.msk.msra.mxu1 %vm344_vm1, %v7436_v15 }
  0x9e   :  { %5500 = vmatmul.mubr.msk.f32.vlgmr.msra.gmra.mrb[10].mxu0 %vm340_vm2, %v1105_v26  ;;  %5521 = vmatmul.mubr.msk.f32.vlgmr.msra.gmra.mrb[10].mxu1 %vm340_vm2, %v1181_v27  ;;  %v7911_v27 = vand.u32 127, %v327_v24  ;;  %v3240_v24 = vld [vmem:[%s8774_s6 + $0x38] sm:$0xff] }
  0x9f   :  { %6336 = vmatprep.subr.bf16.mxu0 %v7270_v1  ;;  %6348 = vmatprep.subr.bf16.mxu1 %v7270_v1 }
  0xa0   :  { %6338 = vmatpush3.bf16.msra.mxu0 %v7394_v6  ;;  %6350 = vmatpush3.bf16.msra.mxu1 %v7394_v6  ;;  %vm329_vm5 = vcmp.lt.s32.totalorder %v7911_v27, 16 }
  0xa1   :  { %6339 = vmatprep.subr.bf16.mxu0 %v7270_v1  ;;  %6351 = vmatprep.subr.bf16.mxu1 %v7270_v1 }
  0xa2   :  { %5541 = vmatprep.mubr.msk.f32.mxu0 %vm7271_vm0, %v7272_v2  ;;  %5562 = vmatprep.mubr.msk.f32.mxu1 %vm7271_vm0, %v7272_v2 }
  0xa4   :  { %6341 = vmatpush3.bf16.msra.mxu0 %v7401_v8  ;;  %6353 = vmatpush3.bf16.msra.mxu1 %v7401_v8 }
  0xa5   :  { %6342 = vmatprep.subr.bf16.mxu0 %v7270_v1  ;;  %6354 = vmatprep.subr.bf16.mxu1 %v7270_v1 }
  0xa8   :  { %6344 = vmatpush3.bf16.msra.mxu0 %v7413_v11  ;;  %6356 = vmatpush3.bf16.msra.mxu1 %v7413_v11 }
  0xa9   :  { %6345 = vmatprep.subr.bf16.mxu0 %v7270_v1  ;;  %6357 = vmatprep.subr.bf16.mxu1 %v7270_v1 }
  0xac   :  { %6347 = vmatpush3.bf16.msra.mxu0 %v7425_v14  ;;  %6359 = vmatpush3.bf16.msra.mxu1 %v7425_v14 }
  0xad   :  { %5539 = vmatprep.subr.mxu0 %v7272_v2  ;;  %5560 = vmatprep.subr.mxu1 %v7272_v2 }
  0xb0   :  { %5540 = vmatpush3.msk.msra.mxu0 %vm344_vm1, %v7436_v15  ;;  %5561 = vmatpush3.msk.msra.mxu1 %vm344_vm1, %v7436_v15 }
  0xb1   :  { %5542 = vmatmul.mubr.msk.f32.vlgmr.msra.gmra.mrb[12].mxu0 %vm340_vm2, %v1257_v28  ;;  %5563 = vmatmul.mubr.msk.f32.vlgmr.msra.gmra.mrb[12].mxu1 %vm340_vm2, %v1333_v29 }
  0xb2   :  { %6360 = vmatprep.subr.bf16.mxu0 %v7270_v1  ;;  %6372 = vmatprep.subr.bf16.mxu1 %v7270_v1 }
  0xb3   :  { %6362 = vmatpush3.bf16.msra.mxu0 %v7394_v6  ;;  %6374 = vmatpush3.bf16.msra.mxu1 %v7394_v6 }
  0xb4   :  { %6363 = vmatprep.subr.bf16.mxu0 %v7270_v1  ;;  %6375 = vmatprep.subr.bf16.mxu1 %v7270_v1 }
  0xb5   :  { %5583 = vmatprep.mubr.msk.f32.mxu0 %vm7271_vm0, %v7272_v2  ;;  %5604 = vmatprep.mubr.msk.f32.mxu1 %vm7271_vm0, %v7272_v2 }
  0xb7   :  { %6365 = vmatpush3.bf16.msra.mxu0 %v7401_v8  ;;  %6377 = vmatpush3.bf16.msra.mxu1 %v7401_v8 }
  0xb8   :  { %6366 = vmatprep.subr.bf16.mxu0 %v7270_v1  ;;  %6378 = vmatprep.subr.bf16.mxu1 %v7270_v1 }
  0xbb   :  { %6368 = vmatpush3.bf16.msra.mxu0 %v7413_v11  ;;  %6380 = vmatpush3.bf16.msra.mxu1 %v7413_v11 }
  0xbc   :  { %6369 = vmatprep.subr.bf16.mxu0 %v7270_v1  ;;  %6381 = vmatprep.subr.bf16.mxu1 %v7270_v1 }
  0xbf   :  { %6371 = vmatpush3.bf16.msra.mxu0 %v7425_v14  ;;  %6383 = vmatpush3.bf16.msra.mxu1 %v7425_v14 }
  0xc0   :  { %5581 = vmatprep.subr.mxu0 %v7272_v2  ;;  %5602 = vmatprep.subr.mxu1 %v7272_v2 }
  0xc3   :  { %5582 = vmatpush3.msk.msra.mxu0 %vm344_vm1, %v7436_v15  ;;  %5603 = vmatpush3.msk.msra.mxu1 %vm344_vm1, %v7436_v15 }
  0xc4   :  { %5584 = vmatmul.mubr.msk.f32.vlgmr.msra.gmra.mrb[14].mxu0 %vm340_vm2, %v1409_v30  ;;  %5605 = vmatmul.mubr.msk.f32.vlgmr.msra.gmra.mrb[14].mxu1 %vm340_vm2, %v1485_v31 }
  0xc5   :  { %6384 = vmatprep.subr.bf16.mxu0 %v7270_v1  ;;  %6396 = vmatprep.subr.bf16.mxu1 %v7270_v1 }
  0xc6   :  { %6386 = vmatpush3.bf16.msra.mxu0 %v7394_v6  ;;  %6398 = vmatpush3.bf16.msra.mxu1 %v7394_v6 }
  0xc7   :  { %6387 = vmatprep.subr.bf16.mxu0 %v7270_v1  ;;  %6399 = vmatprep.subr.bf16.mxu1 %v7270_v1 }
  0xc8   :  { %5625 = vmatprep.mubr.msk.f32.mxu0 %vm7271_vm0, %v7272_v2  ;;  %5646 = vmatprep.mubr.msk.f32.mxu1 %vm7271_vm0, %v7272_v2 }
  0xca   :  { %6389 = vmatpush3.bf16.msra.mxu0 %v7401_v8  ;;  %6401 = vmatpush3.bf16.msra.mxu1 %v7401_v8 }
  0xcb   :  { %6390 = vmatprep.subr.bf16.mxu0 %v7270_v1  ;;  %6402 = vmatprep.subr.bf16.mxu1 %v7270_v1 }
  0xce   :  { %6392 = vmatpush3.bf16.msra.mxu0 %v7413_v11  ;;  %6404 = vmatpush3.bf16.msra.mxu1 %v7413_v11 }
  0xcf   :  { %6393 = vmatprep.subr.bf16.mxu0 %v7270_v1  ;;  %6405 = vmatprep.subr.bf16.mxu1 %v7270_v1 }
  0xd2   :  { %6395 = vmatpush3.bf16.msra.mxu0 %v7425_v14  ;;  %6407 = vmatpush3.bf16.msra.mxu1 %v7425_v14 }
  0xd3   :  { %5623 = vmatprep.subr.mxu0 %v7272_v2  ;;  %5644 = vmatprep.subr.mxu1 %v7272_v2 }
  0xd6   :  { %5624 = vmatpush3.msk.msra.mxu0 %vm344_vm1, %v7436_v15  ;;  %5645 = vmatpush3.msk.msra.mxu1 %vm344_vm1, %v7436_v15 }
  0xd7   :  { %5626 = vmatmul.mubr.msk.f32.vlgmr.msra.gmra.mrb[16].mxu0 %vm340_vm2, %v1561_v34  ;;  %5647 = vmatmul.mubr.msk.f32.vlgmr.msra.gmra.mrb[16].mxu1 %vm340_vm2, %v1637_v35  ;;  %v2593_v34 = vld [vmem:[#allocation6 + $0x50] sm:$0xff] }
  0xd8   :  { %6408 = vmatprep.subr.bf16.mxu0 %v7270_v1  ;;  %6420 = vmatprep.subr.bf16.mxu1 %v7270_v1 }
  0xd9   :  { %6410 = vmatpush3.bf16.msra.mxu0 %v7394_v6  ;;  %6422 = vmatpush3.bf16.msra.mxu1 %v7668_v36 }
  0xda   :  { %6411 = vmatprep.subr.bf16.mxu0 %v7270_v1  ;;  %6423 = vmatprep.subr.bf16.mxu1 %v7270_v1 }
  0xdb   :  { %5667 = vmatprep.mubr.msk.f32.mxu0 %vm7271_vm0, %v7272_v2  ;;  %5696 = vmatprep.mubr.msk.f32.mxu1 %vm7271_vm0, %v7272_v2 }
  0xdd   :  { %6413 = vmatpush3.bf16.msra.mxu0 %v7401_v8  ;;  %6425 = vmatpush3.bf16.msra.mxu1 %v7686_v39  ;;  %v2214_v8 = vld [vmem:[#allocation6 + $0x28] sm:$0xff] }
  0xde   :  { %6414 = vmatprep.subr.bf16.mxu0 %v7270_v1  ;;  %6426 = vmatprep.subr.bf16.mxu1 %v7270_v1 }
  0xe1   :  { %6416 = vmatpush3.bf16.msra.mxu0 %v7413_v11  ;;  %6428 = vmatpush3.bf16.msra.mxu1 %v7702_v42 }
  0xe2   :  { %6417 = vmatprep.subr.bf16.mxu0 %v7270_v1  ;;  %6429 = vmatprep.subr.bf16.mxu1 %v7270_v1 }
  0xe5   :  { %6419 = vmatpush3.bf16.msra.mxu0 %v7425_v14  ;;  %6431 = vmatpush3.bf16.msra.mxu1 %v7714_v45 }
  0xe6   :  { %5665 = vmatprep.subr.mxu0 %v7272_v2  ;;  %6432 = vmatprep.subr.bf16.mxu1 %v7270_v1 }
  0xe9   :  { %5666 = vmatpush3.msk.msra.mxu0 %vm344_vm1, %v7436_v15  ;;  %6434 = vmatpush3.bf16.msra.mxu1 %v7726_v48  ;;  %v2290_v15 = vld [vmem:[#allocation6 + $0x30] sm:$0xff] }
  0xea   :  { %5668 = vmatmul.mubr.msk.f32.vlgmr.msra.gmra.mrb[18].mxu0 %vm340_vm2, %v1713_v51  ;;  %6438 = vmatprep.subr.bf16.mxu0 %v7270_v1 }
  0xeb   :  { %6440 = vmatpush3.bf16.msra.mxu0 %v7668_v36  ;;  %6435 = vmatprep.subr.bf16.mxu1 %v7270_v1 }
  0xec   :  { %6441 = vmatprep.subr.bf16.mxu0 %v7270_v1  ;;  %5725 = vmatprep.mubr.msk.f32.mxu0 %vm7271_vm0, %v7272_v2 }
  0xed   :  { %6437 = vmatpush3.bf16.msra.mxu1 %v7739_v52 }
  0xee   :  { %5694 = vmatprep.subr.mxu1 %v7272_v2 }
  0xef   :  { %6443 = vmatpush3.bf16.msra.mxu0 %v7686_v39 }
  0xf0   :  { %6444 = vmatprep.subr.bf16.mxu0 %v7270_v1 }
  0xf1   :  { %5695 = vmatpush3.msk.msra.mxu1 %vm1835_vm3, %v7753_v53 }
  0xf2   :  { %5697 = vmatmul.mubr.msk.f32.vlgmr.msra.gmra.mrb[18].mxu1 %vm1831_vm4, %v1830_v54  ;;  %6456 = vmatprep.subr.bf16.mxu1 %v7270_v1 }
  0xf3   :  { %6446 = vmatpush3.bf16.msra.mxu0 %v7702_v42  ;;  %6458 = vmatpush3.bf16.msra.mxu1 %v7668_v36 }
  0xf4   :  { %6447 = vmatprep.subr.bf16.mxu0 %v7270_v1  ;;  %6459 = vmatprep.subr.bf16.mxu1 %v7270_v1 }
  0xf5   :  { %5754 = vmatprep.mubr.msk.f32.mxu1 %vm7271_vm0, %v7272_v2 }
  0xf7   :  { %6449 = vmatpush3.bf16.msra.mxu0 %v7714_v45  ;;  %6461 = vmatpush3.bf16.msra.mxu1 %v7686_v39 }
  0xf8   :  { %6450 = vmatprep.subr.bf16.mxu0 %v7270_v1  ;;  %6462 = vmatprep.subr.bf16.mxu1 %v7270_v1 }
  0xfb   :  { %6452 = vmatpush3.bf16.msra.mxu0 %v7726_v48  ;;  %6464 = vmatpush3.bf16.msra.mxu1 %v7702_v42 }
  0xfc   :  { %6453 = vmatprep.subr.bf16.mxu0 %v7270_v1  ;;  %6465 = vmatprep.subr.bf16.mxu1 %v7270_v1 }
  0xff   :  { %6455 = vmatpush3.bf16.msra.mxu0 %v7739_v52  ;;  %6467 = vmatpush3.bf16.msra.mxu1 %v7714_v45 }
 0x100   :  { %5723 = vmatprep.subr.mxu0 %v7272_v2  ;;  %6468 = vmatprep.subr.bf16.mxu1 %v7270_v1 }
 0x103   :  { %5724 = vmatpush3.msk.msra.mxu0 %vm1835_vm3, %v7753_v53  ;;  %6470 = vmatpush3.bf16.msra.mxu1 %v7726_v48 }
 0x104   :  { %5726 = vmatmul.mubr.msk.f32.vlgmr.msra.gmra.mrb[20].mxu0 %vm1831_vm4, %v1910_v55  ;;  %6474 = vmatprep.subr.bf16.mxu0 %v7270_v1 }
 0x105   :  { %6476 = vmatpush3.bf16.msra.mxu0 %v7668_v36  ;;  %6471 = vmatprep.subr.bf16.mxu1 %v7270_v1 }
 0x106   :  { %6477 = vmatprep.subr.bf16.mxu0 %v7270_v1  ;;  %5783 = vmatprep.mubr.msk.f32.mxu0 %vm7271_vm0, %v7272_v2 }
 0x107   :  { %6473 = vmatpush3.bf16.msra.mxu1 %v7739_v52 }
 0x108   :  { %5752 = vmatprep.subr.mxu1 %v7272_v2 }
 0x109   :  { %6479 = vmatpush3.bf16.msra.mxu0 %v7686_v39 }
 0x10a   :  { %6480 = vmatprep.subr.bf16.mxu0 %v7270_v1 }
 0x10b   :  { %5753 = vmatpush3.msk.msra.mxu1 %vm1835_vm3, %v7753_v53 }
 0x10c   :  { %5755 = vmatmul.mubr.msk.f32.vlgmr.msra.gmra.mrb[20].mxu1 %vm1831_vm4, %v1986_v56  ;;  %6492 = vmatprep.subr.bf16.mxu1 %v7270_v1  ;;  %v2745_v56 = vld [vmem:[#allocation6 + $0x60] sm:$0xff] }
 0x10d   :  { %6482 = vmatpush3.bf16.msra.mxu0 %v7702_v42  ;;  %6494 = vmatpush3.bf16.msra.mxu1 %v7668_v36 }
 0x10e   :  { %6483 = vmatprep.subr.bf16.mxu0 %v7270_v1  ;;  %6495 = vmatprep.subr.bf16.mxu1 %v7270_v1 }
 0x10f   :  { %5812 = vmatprep.mubr.msk.f32.mxu1 %vm7271_vm0, %v7272_v2 }
 0x111   :  { %6485 = vmatpush3.bf16.msra.mxu0 %v7714_v45  ;;  %6497 = vmatpush3.bf16.msra.mxu1 %v7686_v39 }
 0x112   :  { %6486 = vmatprep.subr.bf16.mxu0 %v7270_v1  ;;  %6498 = vmatprep.subr.bf16.mxu1 %v7270_v1  ;;  %v489_v57 = vpop.f32.mrb[0].mxu1 }
 0x113   :  { %v414_v58 = vpop.f32.mrb[0].mxu0  ;;  %v5312_v59 = vpop.f32.mrb[1].mxu1 }
 0x114   :  { %v493_v60 = vmax.f32 %v414_v58, %v489_v57  ;;  %v5291_v61 = vpop.f32.mrb[1].mxu0 }
 0x115   :  { %6488 = vmatpush3.bf16.msra.mxu0 %v7726_v48  ;;  %6500 = vmatpush3.bf16.msra.mxu1 %v7702_v42 }
 0x116   :  { %6489 = vmatprep.subr.bf16.mxu0 %v7270_v1  ;;  %6501 = vmatprep.subr.bf16.mxu1 %v7270_v1 }
 0x119   :  { %6491 = vmatpush3.bf16.msra.mxu0 %v7739_v52  ;;  %6503 = vmatpush3.bf16.msra.mxu1 %v7714_v45 }
 0x11a   :  { %5781 = vmatprep.subr.mxu0 %v7272_v2  ;;  %6504 = vmatprep.subr.bf16.mxu1 %v7270_v1 }
 0x11d   :  { %5782 = vmatpush3.msk.msra.mxu0 %vm1835_vm3, %v7753_v53  ;;  %6506 = vmatpush3.bf16.msra.mxu1 %v7726_v48 }
 0x11e   :  { %5784 = vmatmul.mubr.msk.f32.vlgmr.msra.gmra.mrb[22].mxu0 %vm1831_vm4, %v2062_v62  ;;  %6510 = vmatprep.subr.bf16.mxu0 %v7270_v1 }
 0x11f   :  { %6512 = vmatpush3.bf16.msra.mxu0 %v7668_v36  ;;  %6507 = vmatprep.subr.bf16.mxu1 %v7270_v1 }
 0x120   :  { %6513 = vmatprep.subr.bf16.mxu0 %v7270_v1  ;;  %5841 = vmatprep.mubr.msk.f32.mxu0 %vm7271_vm0, %v7272_v2 }
 0x121   :  { %6509 = vmatpush3.bf16.msra.mxu1 %v7739_v52 }
 0x122   :  { %5810 = vmatprep.subr.mxu1 %v7272_v2 }
 0x123   :  { %6515 = vmatpush3.bf16.msra.mxu0 %v7686_v39 }
 0x124   :  { %6516 = vmatprep.subr.bf16.mxu0 %v7270_v1 }
 0x125   :  { %5811 = vmatpush3.msk.msra.mxu1 %vm1835_vm3, %v7753_v53  ;;  %v565_v0 = vpop.f32.mrb[2].mxu0  ;;  %v641_v3 = vpop.f32.mrb[2].mxu1 }
 0x126   :  { %5813 = vmatmul.mubr.msk.f32.vlgmr.msra.gmra.mrb[22].mxu1 %vm1831_vm4, %v2138_v63  ;;  %6528 = vmatprep.subr.bf16.mxu1 %v7270_v1  ;;  %v569_v4 = vmax.f32 %v493_v60, %v565_v0  ;;  %v5354_v5 = vpop.f32.mrb[3].mxu1  ;;  %v5333_v6 = vpop.f32.mrb[3].mxu0  ;;  %v2821_v63 = vld [vmem:[#allocation6 + $0x68] sm:$0xff]  ;;  %v2897_v0 = vld [vmem:[#allocation6 + $0x70] sm:$0xff] }
 0x127   :  { %6518 = vmatpush3.bf16.msra.mxu0 %v7702_v42  ;;  %6530 = vmatpush3.bf16.msra.mxu1 %v7668_v36 }
 0x128   :  { %6519 = vmatprep.subr.bf16.mxu0 %v7270_v1  ;;  %6531 = vmatprep.subr.bf16.mxu1 %v7270_v1  ;;  %v645_v7 = vmax.f32 %v569_v4, %v641_v3 }
 0x129   :  { %5870 = vmatprep.mubr.msk.f32.mxu1 %vm7271_vm0, %v7272_v2 }
 0x12b   :  { %6521 = vmatpush3.bf16.msra.mxu0 %v7714_v45  ;;  %6533 = vmatpush3.bf16.msra.mxu1 %v7686_v39 }
 0x12c   :  { %6522 = vmatprep.subr.bf16.mxu0 %v7270_v1  ;;  %6534 = vmatprep.subr.bf16.mxu1 %v7270_v1 }
 0x12f   :  { %6524 = vmatpush3.bf16.msra.mxu0 %v7726_v48  ;;  %6536 = vmatpush3.bf16.msra.mxu1 %v7702_v42 }
 0x130   :  { %6525 = vmatprep.subr.bf16.mxu0 %v7270_v1  ;;  %6537 = vmatprep.subr.bf16.mxu1 %v7270_v1 }
 0x133   :  { %6527 = vmatpush3.bf16.msra.mxu0 %v7739_v52  ;;  %6539 = vmatpush3.bf16.msra.mxu1 %v7714_v45 }
 0x134   :  { %5839 = vmatprep.subr.mxu0 %v7272_v2  ;;  %6540 = vmatprep.subr.bf16.mxu1 %v7270_v1 }
 0x137   :  { %5840 = vmatpush3.msk.msra.mxu0 %vm1835_vm3, %v7753_v53  ;;  %6542 = vmatpush3.bf16.msra.mxu1 %v7726_v48 }
 0x138   :  { %5842 = vmatmul.mubr.msk.f32.vlgmr.msra.gmra.mrb[24].mxu0 %vm1831_vm4, %v2214_v8  ;;  %6546 = vmatprep.subr.bf16.mxu0 %v7270_v1  ;;  %v717_v9 = vpop.f32.mrb[4].mxu0  ;;  %v793_v10 = vpop.f32.mrb[4].mxu1 }
 0x139   :  { %6548 = vmatpush3.bf16.msra.mxu0 %v7668_v36  ;;  %6543 = vmatprep.subr.bf16.mxu1 %v7270_v1  ;;  %v721_v11 = vmax.f32 %v645_v7, %v717_v9  ;;  %v5396_v12 = vpop.f32.mrb[5].mxu1  ;;  %v5375_v13 = vpop.f32.mrb[5].mxu0  ;;  %v2973_v9 = vld [vmem:[#allocation6 + $0x78] sm:$0xff] }
 0x13a   :  { %6549 = vmatprep.subr.bf16.mxu0 %v7270_v1  ;;  %5899 = vmatprep.mubr.msk.f32.mxu0 %vm7271_vm0, %v7272_v2 }
 0x13b   :  { %6545 = vmatpush3.bf16.msra.mxu1 %v7739_v52  ;;  %v797_v14 = vmax.f32 %v721_v11, %v793_v10  ;;  %v3233_v10 = vld [vmem:[%s8774_s6] sm:$0xff]  ;;  %v3234_v11 = vld [vmem:[%s8774_s6 + $0x8] sm:$0xff] }
 0x13c   :  { %5868 = vmatprep.subr.mxu1 %v7272_v2 }
 0x13d   :  { %6551 = vmatpush3.bf16.msra.mxu0 %v7686_v39 }
 0x13e   :  { %6552 = vmatprep.subr.bf16.mxu0 %v7270_v1 }
 0x13f   :  { %5869 = vmatpush3.msk.msra.mxu1 %vm1835_vm3, %v7753_v53 }
 0x140   :  { %5871 = vmatmul.mubr.msk.f32.vlgmr.msra.gmra.mrb[24].mxu1 %vm1831_vm4, %v2290_v15  ;;  %6564 = vmatprep.subr.bf16.mxu1 %v7270_v1  ;;  %v8061_v15 = vpack.c.bf16 %v3234_v11, %v3233_v10  ;;  %v4776_v11 = vld [vmem:[%s8771_s3 + $0x40] sm:$0xff] }
 0x141   :  { %6554 = vmatpush3.bf16.msra.mxu0 %v7702_v42  ;;  %6566 = vmatpush3.bf16.msra.mxu1 %v7668_v36 }
 0x142   :  { %6555 = vmatprep.subr.bf16.mxu0 %v7270_v1  ;;  %6567 = vmatprep.subr.bf16.mxu1 %v7270_v1 }
 0x143   :  { %5928 = vmatprep.mubr.msk.f32.mxu1 %vm7271_vm0, %v7272_v2 }
 0x145   :  { %6557 = vmatpush3.bf16.msra.mxu0 %v7714_v45  ;;  %6569 = vmatpush3.bf16.msra.mxu1 %v7686_v39 }
 0x146   :  { %6558 = vmatprep.subr.bf16.mxu0 %v7270_v1  ;;  %6570 = vmatprep.subr.bf16.mxu1 %v7270_v1 }
 0x149   :  { %6560 = vmatpush3.bf16.msra.mxu0 %v7726_v48  ;;  %6572 = vmatpush3.bf16.msra.mxu1 %v7702_v42 }
 0x14a   :  { %6561 = vmatprep.subr.bf16.mxu0 %v7270_v1  ;;  %6573 = vmatprep.subr.bf16.mxu1 %v7270_v1 }
 0x14b   :  { %v869_v16 = vpop.f32.mrb[6].mxu0  ;;  %v945_v17 = vpop.f32.mrb[6].mxu1 }
 0x14c   :  { %v873_v18 = vmax.f32 %v797_v14, %v869_v16  ;;  %v5438_v19 = vpop.f32.mrb[7].mxu1  ;;  %v5417_v20 = vpop.f32.mrb[7].mxu0  ;;  %v3049_v14 = vld [vmem:[#allocation6 + $0x80] sm:$0xff]  ;;  %v3235_v16 = vld [vmem:[%s8774_s6 + $0x10] sm:$0xff] }
 0x14d   :  { %6563 = vmatpush3.bf16.msra.mxu0 %v7739_v52  ;;  %6575 = vmatpush3.bf16.msra.mxu1 %v7714_v45  ;;  %v3237_v19 = vld [vmem:[%s8774_s6 + $0x20] sm:$0xff]  ;;  %v3238_v20 = vld [vmem:[%s8774_s6 + $0x28] sm:$0xff] }
 0x14e   :  { %5897 = vmatprep.subr.mxu0 %v7272_v2  ;;  %6576 = vmatprep.subr.bf16.mxu1 %v7270_v1  ;;  %v949_v21 = vmax.f32 %v873_v18, %v945_v17  ;;  %v3236_v17 = vld [vmem:[%s8774_s6 + $0x18] sm:$0xff] }
 0x14f   :  { %v8081_v18 = vpack.c.bf16 %v3236_v17, %v3235_v16 }
 0x151   :  { %5898 = vmatpush3.msk.msra.mxu0 %vm1835_vm3, %v7753_v53  ;;  %6578 = vmatpush3.bf16.msra.mxu1 %v7726_v48 }
 0x152   :  { %5900 = vmatmul.mubr.msk.f32.vlgmr.msra.gmra.mrb[26].mxu0 %vm1831_vm4, %v2366_v22  ;;  %6582 = vmatprep.subr.bf16.mxu0 %v7270_v1  ;;  %v8094_v22 = vpack.c.bf16 %v3238_v20, %v3237_v19  ;;  %v4780_v19 = vld [vmem:[%s8771_s3 + $0x50] sm:$0xff]  ;;  %v4789_v20 = vld [vmem:[%s8771_s3 + $0x78] sm:$0xff] }
 0x153   :  { %6584 = vmatpush3.bf16.msra.mxu0 %v7668_v36  ;;  %6579 = vmatprep.subr.bf16.mxu1 %v7270_v1 }
 0x154   :  { %6585 = vmatprep.subr.bf16.mxu0 %v7270_v1  ;;  %5957 = vmatprep.mubr.msk.f32.mxu0 %vm7271_vm0, %v7272_v2 }
 0x155   :  { %6581 = vmatpush3.bf16.msra.mxu1 %v7739_v52 }
 0x156   :  { %5926 = vmatprep.subr.mxu1 %v7272_v2 }
 0x157   :  { %6587 = vmatpush3.bf16.msra.mxu0 %v7686_v39 }
 0x158   :  { %6588 = vmatprep.subr.bf16.mxu0 %v7270_v1 }
 0x159   :  { %5927 = vmatpush3.msk.msra.mxu1 %vm1835_vm3, %v7753_v53 }
 0x15a   :  { %5929 = vmatmul.mubr.msk.f32.vlgmr.msra.gmra.mrb[26].mxu1 %vm1831_vm4, %v2442_v23  ;;  %6600 = vmatprep.subr.bf16.mxu1 %v7270_v1  ;;  %v3239_v23 = vld [vmem:[%s8774_s6 + $0x30] sm:$0xff] }
 0x15b   :  { %6590 = vmatpush3.bf16.msra.mxu0 %v7702_v42  ;;  %6602 = vmatpush3.bf16.msra.mxu1 %v7668_v36 }
 0x15c   :  { %6591 = vmatprep.subr.bf16.mxu0 %v7270_v1  ;;  %6603 = vmatprep.subr.bf16.mxu1 %v7270_v1 }
 0x15d   :  { %5986 = vmatprep.mubr.msk.f32.mxu1 %vm7271_vm0, %v7272_v2 }
 0x15e   :  { %v1021_v25 = vpop.f32.mrb[8].mxu0  ;;  %v1097_v26 = vpop.f32.mrb[8].mxu1 }
 0x15f   :  { %6593 = vmatpush3.bf16.msra.mxu0 %v7714_v45  ;;  %6605 = vmatpush3.bf16.msra.mxu1 %v7686_v39  ;;  %v1025_v28 = vmax.f32 %v949_v21, %v1021_v25  ;;  %v5480_v29 = vpop.f32.mrb[9].mxu1  ;;  %v5459_v30 = vpop.f32.mrb[9].mxu0  ;;  %v1103_v35 = vsel %vm329_vm5, -inf, %v1097_v26  ;;  %v3241_v25 = vld [vmem:[%s8774_s6 + $0x40] sm:$0xff] }
 0x160   :  { %6594 = vmatprep.subr.bf16.mxu0 %v7270_v1  ;;  %6606 = vmatprep.subr.bf16.mxu1 %v7270_v1  ;;  %v3244_v29 = vld [vmem:[%s8774_s6 + $0x58] sm:$0xff]  ;;  %v3125_v30 = vld [vmem:[#allocation6 + $0x88] sm:$0xff] }
 0x161   :  { %v1101_v31 = vmax.f32 %v1025_v28, %v1097_v26  ;;  %v3242_v26 = vld [vmem:[%s8774_s6 + $0x48] sm:$0xff] }
 0x163   :  { %6596 = vmatpush3.bf16.msra.mxu0 %v7726_v48  ;;  %6608 = vmatpush3.bf16.msra.mxu1 %v7702_v42  ;;  %v7922_v32 = vsel %vm329_vm5, %v1101_v31, %v1025_v28  ;;  %v3243_v28 = vld [vmem:[%s8774_s6 + $0x50] sm:$0xff]  ;;  %v4765_v31 = vld [vmem:[%s8771_s3 + $0x18] sm:$0xff] }
 0x164   :  { %6597 = vmatprep.subr.bf16.mxu0 %v7270_v1  ;;  %6609 = vmatprep.subr.bf16.mxu1 %v7270_v1 }
 0x167   :  { %6599 = vmatpush3.bf16.msra.mxu0 %v7739_v52  ;;  %6611 = vmatpush3.bf16.msra.mxu1 %v7714_v45 }
 0x168   :  { %5955 = vmatprep.subr.mxu0 %v7272_v2  ;;  %6612 = vmatprep.subr.bf16.mxu1 %v7270_v1 }
 0x16b   :  { %5956 = vmatpush3.msk.msra.mxu0 %vm1835_vm3, %v7753_v53  ;;  %6614 = vmatpush3.bf16.msra.mxu1 %v7726_v48 }
 0x16c   :  { %6618 = vmatprep.subr.bf16.mxu0 %v7270_v1  ;;  %5958 = vmatmul.mubr.msk.f32.vlgmr.msra.gmra.mrb[28].mxu0 %vm1831_vm4, %v2518_v33  ;;  %v3245_v33 = vld [vmem:[%s8774_s6 + $0x60] sm:$0xff] }
 0x16d   :  { %6620 = vmatpush3.bf16.msra.mxu0 %v7668_v36  ;;  %6615 = vmatprep.subr.bf16.mxu1 %v7270_v1 }
 0x16e   :  { %6621 = vmatprep.subr.bf16.mxu0 %v7270_v1  ;;  %6015 = vmatprep.mubr.msk.f32.mxu0 %vm7271_vm0, %v7272_v2 }
 0x16f   :  { %6617 = vmatpush3.bf16.msra.mxu1 %v7739_v52 }
 0x170   :  { %5984 = vmatprep.subr.mxu1 %v7272_v2 }
 0x171   :  { %6623 = vmatpush3.bf16.msra.mxu0 %v7686_v39  ;;  %v1175_v37 = vpop.f32.mrb[10].mxu0  ;;  %v1251_v38 = vpop.f32.mrb[10].mxu1 }
 0x172   :  { %6624 = vmatprep.subr.bf16.mxu0 %v7270_v1  ;;  %v1179_v40 = vmax.f32 %v1103_v35, %v1175_v37  ;;  %v5522_v41 = vpop.f32.mrb[11].mxu1  ;;  %v5501_v43 = vpop.f32.mrb[11].mxu0 }
 0x173   :  { %5985 = vmatpush3.msk.msra.mxu1 %vm1835_vm3, %v7753_v53 }
 0x174   :  { %5987 = vmatmul.mubr.msk.f32.vlgmr.msra.gmra.mrb[28].mxu1 %vm1831_vm4, %v2593_v34  ;;  %6636 = vmatprep.subr.bf16.mxu1 %v7270_v1  ;;  %v1255_v44 = vmax.f32 %v1179_v40, %v1251_v38  ;;  %v3247_v38 = vld [vmem:[%s8774_s6 + $0x70] sm:$0xff]  ;;  %v3248_v40 = vld [vmem:[%s8774_s6 + $0x78] sm:$0xff] }
 0x175   :  { %6626 = vmatpush3.bf16.msra.mxu0 %v7702_v42  ;;  %6638 = vmatpush3.bf16.msra.mxu1 %v7668_v36  ;;  %v8161_v43 = vpack.c.bf16 %v3248_v40, %v3247_v38  ;;  %v4792_v40 = vld [vmem:[%s8771_s3 + $0x80] sm:$0xff] }
 0x176   :  { %6627 = vmatprep.subr.bf16.mxu0 %v7270_v1  ;;  %6639 = vmatprep.subr.bf16.mxu1 %v7270_v1 }
 0x177   :  { %6044 = vmatprep.mubr.msk.f32.mxu1 %vm7271_vm0, %v7272_v2 }
 0x179   :  { %6629 = vmatpush3.bf16.msra.mxu0 %v7714_v45  ;;  %6641 = vmatpush3.bf16.msra.mxu1 %v7686_v39 }
 0x17a   :  { %6630 = vmatprep.subr.bf16.mxu0 %v7270_v1  ;;  %6642 = vmatprep.subr.bf16.mxu1 %v7270_v1 }
 0x17d   :  { %6632 = vmatpush3.bf16.msra.mxu0 %v7726_v48  ;;  %6644 = vmatpush3.bf16.msra.mxu1 %v7702_v42 }
 0x17e   :  { %6633 = vmatprep.subr.bf16.mxu0 %v7270_v1  ;;  %6645 = vmatprep.subr.bf16.mxu1 %v7270_v1 }
 0x181   :  { %6635 = vmatpush3.bf16.msra.mxu0 %v7739_v52  ;;  %6647 = vmatpush3.bf16.msra.mxu1 %v7714_v45 }
 0x182   :  { %6013 = vmatprep.subr.mxu0 %v7272_v2  ;;  %6648 = vmatprep.subr.bf16.mxu1 %v7270_v1 }
 0x184   :  { %v1327_v47 = vpop.f32.mrb[12].mxu0  ;;  %v1403_v49 = vpop.f32.mrb[12].mxu1 }
 0x185   :  { %6014 = vmatpush3.msk.msra.mxu0 %vm1835_vm3, %v7753_v53  ;;  %6650 = vmatpush3.bf16.msra.mxu1 %v7726_v48  ;;  %v1331_v50 = vmax.f32 %v1255_v44, %v1327_v47  ;;  %v5564_v51 = vpop.f32.mrb[13].mxu1  ;;  %v5543_v54 = vpop.f32.mrb[13].mxu0 }
 0x186   :  { %6016 = vmatmul.mubr.msk.f32.vlgmr.msra.gmra.mrb[30].mxu0 %vm1831_vm4, %v2669_v46  ;;  %6654 = vmatprep.subr.bf16.mxu0 %v7270_v1  ;;  %v4769_v51 = vld [vmem:[%s8771_s3 + $0x28] sm:$0xff] }
 0x187   :  { %v1407_v55 = vmax.f32 %v1331_v50, %v1403_v49  ;;  %6656 = vmatpush3.bf16.msra.mxu0 %v7668_v36  ;;  %6651 = vmatprep.subr.bf16.mxu1 %v7270_v1  ;;  %v8171_v49 = vld [vmem:[%s8774_s6 + $0x80] sm:$0xf] }
 0x188   :  { %6657 = vmatprep.subr.bf16.mxu0 %v7270_v1  ;;  %6073 = vmatprep.mubr.msk.f32.mxu0 %vm7271_vm0, %v7272_v2  ;;  %v3250_v50 = vld [vmem:[%s8771_s3] sm:$0xff] }
 0x189   :  { %6653 = vmatpush3.bf16.msra.mxu1 %v7739_v52 }
 0x18a   :  { %6042 = vmatprep.subr.mxu1 %v7272_v2 }
 0x18b   :  { %6659 = vmatpush3.bf16.msra.mxu0 %v7686_v39 }
 0x18c   :  { %6660 = vmatprep.subr.bf16.mxu0 %v7270_v1 }
 0x18d   :  { %6043 = vmatpush3.msk.msra.mxu1 %vm1835_vm3, %v7753_v53 }
 0x18e   :  { %6045 = vmatmul.mubr.msk.f32.vlgmr.msra.gmra.mrb[30].mxu1 %vm1831_vm4, %v2745_v56  ;;  %6672 = vmatprep.subr.bf16.mxu1 %v7270_v1 }
 0x18f   :  { %6662 = vmatpush3.bf16.msra.mxu0 %v7702_v42  ;;  %6674 = vmatpush3.bf16.msra.mxu1 %v7668_v36 }
 0x190   :  { %6663 = vmatprep.subr.bf16.mxu0 %v7270_v1  ;;  %6675 = vmatprep.subr.bf16.mxu1 %v7270_v1 }
 0x191   :  { %6102 = vmatprep.mubr.msk.f32.mxu1 %vm7271_vm0, %v7272_v2 }
 0x193   :  { %6665 = vmatpush3.bf16.msra.mxu0 %v7714_v45  ;;  %6677 = vmatpush3.bf16.msra.mxu1 %v7686_v39 }
 0x194   :  { %6666 = vmatprep.subr.bf16.mxu0 %v7270_v1  ;;  %6678 = vmatprep.subr.bf16.mxu1 %v7270_v1 }
 0x197   :  { %6668 = vmatpush3.bf16.msra.mxu0 %v7726_v48  ;;  %6680 = vmatpush3.bf16.msra.mxu1 %v7702_v42  ;;  %v1479_v57 = vpop.f32.mrb[14].mxu0  ;;  %v1555_v58 = vpop.f32.mrb[14].mxu1 }
 0x198   :  { %v1483_v59 = vmax.f32 %v1407_v55, %v1479_v57  ;;  %v5606_v60 = vpop.f32.mrb[15].mxu1  ;;  %6669 = vmatprep.subr.bf16.mxu0 %v7270_v1  ;;  %6681 = vmatprep.subr.bf16.mxu1 %v7270_v1  ;;  %v5585_v61 = vpop.f32.mrb[15].mxu0  ;;  %v4764_v57 = vld [vmem:[%s8771_s3 + $0x10] sm:$0xff] }
 0x19a   :  { %v1559_v62 = vmax.f32 %v1483_v59, %v1555_v58  ;;  %v4773_v58 = vld [vmem:[%s8771_s3 + $0x38] sm:$0xff] }
 0x19b   :  { %6671 = vmatpush3.bf16.msra.mxu0 %v7739_v52  ;;  %6683 = vmatpush3.bf16.msra.mxu1 %v7714_v45 }
 0x19c   :  { %6071 = vmatprep.subr.mxu0 %v7272_v2  ;;  %6684 = vmatprep.subr.bf16.mxu1 %v7270_v1 }
 0x19f   :  { %6072 = vmatpush3.msk.msra.mxu0 %vm1835_vm3, %v7753_v53  ;;  %6686 = vmatpush3.bf16.msra.mxu1 %v7726_v48 }
 0x1a0   :  { %6074 = vmatmul.mubr.msk.f32.vlgmr.msra.gmra.mrb[32].mxu0 %vm1831_vm4, %v2821_v63  ;;  %6690 = vmatprep.subr.bf16.mxu0 %v7270_v1  ;;  %v4777_v63 = vld [vmem:[%s8771_s3 + $0x48] sm:$0xff] }
 0x1a1   :  { %6692 = vmatpush3.bf16.msra.mxu0 %v7668_v36  ;;  %6687 = vmatprep.subr.bf16.mxu1 %v7270_v1 }
 0x1a2   :  { %6693 = vmatprep.subr.bf16.mxu0 %v7270_v1  ;;  %6131 = vmatprep.mubr.msk.f32.mxu0 %vm7271_vm0, %v7272_v2 }
 0x1a3   :  { %6689 = vmatpush3.bf16.msra.mxu1 %v7739_v52 }
 0x1a4   :  { %6100 = vmatprep.subr.mxu1 %v7272_v2 }
 0x1a5   :  { %6695 = vmatpush3.bf16.msra.mxu0 %v7686_v39 }
 0x1a6   :  { %6696 = vmatprep.subr.bf16.mxu0 %v7270_v1 }
 0x1a7   :  { %6101 = vmatpush3.msk.msra.mxu1 %vm1835_vm3, %v7753_v53 }
 0x1a8   :  { %6103 = vmatmul.mubr.msk.f32.vlgmr.msra.gmra.mrb[32].mxu1 %vm1831_vm4, %v2897_v0  ;;  %6708 = vmatprep.subr.bf16.mxu1 %v7270_v1 }
 0x1a9   :  { %6698 = vmatpush3.bf16.msra.mxu0 %v7702_v42  ;;  %6710 = vmatpush3.bf16.msra.mxu1 %v7668_v36 }
 0x1aa   :  { %v1631_v3 = vpop.f32.mrb[16].mxu0  ;;  %v1707_v4 = vpop.f32.mrb[16].mxu1  ;;  %6699 = vmatprep.subr.bf16.mxu0 %v7270_v1  ;;  %6711 = vmatprep.subr.bf16.mxu1 %v7270_v1 }
 0x1ab   :  { %v1635_v5 = vmax.f32 %v1559_v62, %v1631_v3  ;;  %v5648_v6 = vpop.f32.mrb[17].mxu1  ;;  %v5627_v7 = vpop.f32.mrb[17].mxu0  ;;  %6160 = vmatprep.mubr.msk.f32.mxu1 %vm7271_vm0, %v7272_v2  ;;  %v4768_v62 = vld [vmem:[%s8771_s3 + $0x20] sm:$0xff] }
 0x1ad   :  { %v1711_v8 = vmax.f32 %v1635_v5, %v1707_v4  ;;  %6701 = vmatpush3.bf16.msra.mxu0 %v7714_v45  ;;  %6713 = vmatpush3.bf16.msra.mxu1 %v7686_v39 }
 0x1ae   :  { %6702 = vmatprep.subr.bf16.mxu0 %v7270_v1  ;;  %6714 = vmatprep.subr.bf16.mxu1 %v7270_v1 }
 0x1b1   :  { %6704 = vmatpush3.bf16.msra.mxu0 %v7726_v48  ;;  %6716 = vmatpush3.bf16.msra.mxu1 %v7702_v42 }
 0x1b2   :  { %6705 = vmatprep.subr.bf16.mxu0 %v7270_v1  ;;  %6717 = vmatprep.subr.bf16.mxu1 %v7270_v1 }
 0x1b5   :  { %6707 = vmatpush3.bf16.msra.mxu0 %v7739_v52  ;;  %6719 = vmatpush3.bf16.msra.mxu1 %v7714_v45 }
 0x1b6   :  { %6129 = vmatprep.subr.mxu0 %v7272_v2  ;;  %6720 = vmatprep.subr.bf16.mxu1 %v7270_v1 }
 0x1b9   :  { %6130 = vmatpush3.msk.msra.mxu0 %vm1835_vm3, %v7753_v53  ;;  %6722 = vmatpush3.bf16.msra.mxu1 %v7726_v48 }
 0x1ba   :  { %6132 = vmatmul.mubr.msk.f32.vlgmr.msra.gmra.mrb[34].mxu0 %vm1831_vm4, %v2973_v9  ;;  %6726 = vmatprep.subr.bf16.mxu0 %v7270_v1  ;;  %v4781_v9 = vld [vmem:[%s8771_s3 + $0x58] sm:$0xff] }
 0x1bb   :  { %6728 = vmatpush3.bf16.msra.mxu0 %v7668_v36  ;;  %6723 = vmatprep.subr.bf16.mxu1 %v7270_v1 }
 0x1bc   :  { %6729 = vmatprep.subr.bf16.mxu0 %v7270_v1  ;;  %6189 = vmatprep.mubr.msk.f32.mxu0 %vm7271_vm0, %v7272_v2 }
 0x1bd   :  { %v1783_v12 = vpop.f32.mrb[18].mxu0  ;;  %6725 = vmatpush3.bf16.msra.mxu1 %v7739_v52 }
 0x1be   :  { %v8057_v13 = vmax.f32 %v1711_v8, %v1783_v12  ;;  %6158 = vmatprep.subr.mxu1 %v7272_v2  ;;  %v5669_v36 = vpop.f32.mrb[19].mxu0  ;;  %v4772_v8 = vld [vmem:[%s8771_s3 + $0x30] sm:$0xff] }
 0x1bf   :  { %6731 = vmatpush3.bf16.msra.mxu0 %v7686_v39  ;;  %v3251_v39 = vld [vmem:[%s8771_s3 + $0x8] sm:$0xff] }
 0x1c0   :  { %1803 = vrot.lane.b32.xlu0 %v8057_v13, %s7273_s20  ;;  %6732 = vmatprep.subr.bf16.mxu0 %v7270_v1 }
 0x1c1   :  { %6159 = vmatpush3.msk.msra.mxu1 %vm1835_vm3, %v7753_v53 }
 0x1c2   :  { %6161 = vmatmul.mubr.msk.f32.vlgmr.msra.gmra.mrb[34].mxu1 %vm1831_vm4, %v3049_v14  ;;  %6744 = vmatprep.subr.bf16.mxu1 %v7270_v1  ;;  %v4785_v14 = vld [vmem:[%s8771_s3 + $0x68] sm:$0xff] }
 0x1c3   :  { %6734 = vmatpush3.bf16.msra.mxu0 %v7702_v42  ;;  %6746 = vmatpush1.bf16.msra.mxu1 %v8061_v15 }
 0x1c4   :  { %6735 = vmatprep.subr.bf16.mxu0 %v7270_v1  ;;  %6747 = vmatprep.subr.bf16.mxu1 %v7270_v1 }
 0x1c5   :  { %v1905_v21 = vpop.f32.mrb[18].mxu1  ;;  %4763 = vmatprep.mubr.msk.f32.mxu1 %vm3252_vm6, %v3251_v39 }
 0x1c6   :  { %v5698_v42 = vpop.f32.mrb[19].mxu1 }
 0x1c7   :  { %6737 = vmatpush3.bf16.msra.mxu0 %v7714_v45  ;;  %6749 = vmatpush1.bf16.msra.mxu1 %v8081_v18  ;;  %v8106_v45 = vpack.c.bf16 %v3240_v24, %v3239_v23  ;;  %v4784_v24 = vld [vmem:[%s8771_s3 + $0x60] sm:$0xff] }
 0x1c8   :  { %6738 = vmatprep.subr.bf16.mxu0 %v7270_v1  ;;  %6750 = vmatprep.subr.bf16.mxu1 %v7270_v1 }
 0x1cb   :  { %6740 = vmatpush3.bf16.msra.mxu0 %v7726_v48  ;;  %6752 = vmatpush1.bf16.msra.mxu1 %v8094_v22  ;;  %v8118_v48 = vpack.c.bf16 %v3242_v26, %v3241_v25 }
 0x1cc   :  { %6741 = vmatprep.subr.bf16.mxu0 %v7270_v1  ;;  %6753 = vmatprep.subr.bf16.mxu1 %v7270_v1 }
 0x1cf   :  { %6743 = vmatpush3.bf16.msra.mxu0 %v7739_v52  ;;  %6755 = vmatpush1.bf16.msra.mxu1 %v8106_v45  ;;  %v8131_v52 = vpack.c.bf16 %v3244_v29, %v3243_v28  ;;  %v4793_v28 = vld [vmem:[%s8771_s3 + $0x88] sm:$0xff] }
 0x1d0   :  { %6187 = vmatprep.subr.mxu0 %v7272_v2  ;;  %6756 = vmatprep.subr.bf16.mxu1 %v7270_v1 }
 0x1d3   :  { %6188 = vmatpush3.msk.msra.mxu0 %vm1835_vm3, %v7753_v53  ;;  %6758 = vmatpush1.bf16.msra.mxu1 %v8118_v48  ;;  %v3246_v53 = vld [vmem:[%s8774_s6 + $0x68] sm:$0xff]  ;;  %s7279_s6 = smov [#allocation9]  }
 0x1d4   :  { %6190 = vmatmul.mubr.msk.f32.vlgmr.msra.gmra.mrb[36].mxu0 %vm1831_vm4, %v3125_v30  ;;  %6768 = vmatprep.subr.bf16.mxu0 %v7270_v1  ;;  %v8149_v35 = vpack.c.bf16 %v3246_v53, %v3245_v33  ;;  %v4788_v30 = vld [vmem:[%s8771_s3 + $0x70] sm:$0xff]  ;;  %v4797_v53 = vld [vmem:[%s8771_s3 + $0x98] sm:$0xff] }
 0x1d5   :  { %6770 = vmatpush1.bf16.msra.mxu0 %v8061_v15  ;;  %6759 = vmatprep.subr.bf16.mxu1 %v7270_v1 }
 0x1d6   :  { %6771 = vmatprep.subr.bf16.mxu0 %v7270_v1  ;;  %4767 = vmatprep.mubr.msk.f32.mxu0 %vm3252_vm6, %v4765_v31 }
 0x1d7   :  { %v1980_v34 = vpop.f32.mrb[20].mxu0  ;;  %6761 = vmatpush1.bf16.msra.mxu1 %v8131_v52 }
 0x1d8   :  { %v1984_v37 = vmax.f32 %v1905_v21, %v1980_v34  ;;  %6762 = vmatprep.subr.bf16.mxu1 %v7270_v1  ;;  %v5727_v41 = vpop.f32.mrb[21].mxu0 }
 0x1d9   :  { %6773 = vmatpush1.bf16.msra.mxu0 %v8081_v18  ;;  %v4801_v41 = vld [vmem:[%s8771_s3 + $0xa8] sm:$0xff] }
 0x1da   :  { %6774 = vmatprep.subr.bf16.mxu0 %v7270_v1 }
 0x1db   :  { %6764 = vmatpush1.bf16.msra.mxu1 %v8149_v35 }
 0x1dc   :  { %6765 = vmatprep.subr.bf16.mxu1 %v7270_v1 }
 0x1dd   :  { %6776 = vmatpush1.bf16.msra.mxu0 %v8094_v22 }
 0x1de   :  { %6777 = vmatprep.subr.bf16.mxu0 %v7270_v1 }
 0x1df   :  { %v2056_v44 = vpop.f32.mrb[20].mxu1  ;;  %6767 = vmatpush1.bf16.msra.mxu1 %v8161_v43 }
 0x1e0   :  { %v2060_v46 = vmax.f32 %v1984_v37, %v2056_v44  ;;  %v5756_v47 = vpop.f32.mrb[21].mxu1  ;;  %3292 = vmatprep.subr.mxu1 %v7272_v2 }
 0x1e1   :  { %6779 = vmatpush1.bf16.msra.mxu0 %v8106_v45 }
 0x1e2   :  { %6780 = vmatprep.subr.bf16.mxu0 %v7270_v1 }
 0x1e3   :  { %4762 = vmatpush1.msk.msra.mxu1 %vm3256_vm7, %v8171_v49 }
 0x1e4   :  { %3325 = vmatmul.mubr.f32.vlgmr.msra.gmra.mrb[36].mxu1 %v3250_v50  ;;  %6792 = vmatprep.subr.bf16.mxu1 %v7270_v1 }
 0x1e5   :  { %6782 = vmatpush1.bf16.msra.mxu0 %v8118_v48  ;;  %6794 = vmatpush1.bf16.msra.mxu1 %v8061_v15 }
 0x1e6   :  { %6783 = vmatprep.subr.bf16.mxu0 %v7270_v1  ;;  %6795 = vmatprep.subr.bf16.mxu1 %v7270_v1 }
 0x1e7   :  { %4771 = vmatprep.mubr.msk.f32.mxu1 %vm3252_vm6, %v4769_v51  ;;  %v4796_v51 = vld [vmem:[%s8771_s3 + $0x90] sm:$0xff] }
 0x1e9   :  { %6785 = vmatpush1.bf16.msra.mxu0 %v8131_v52  ;;  %6797 = vmatpush1.bf16.msra.mxu1 %v8081_v18 }
 0x1ea   :  { %6786 = vmatprep.subr.bf16.mxu0 %v7270_v1  ;;  %6798 = vmatprep.subr.bf16.mxu1 %v7270_v1 }
 0x1ed   :  { %6788 = vmatpush1.bf16.msra.mxu0 %v8149_v35  ;;  %6800 = vmatpush1.bf16.msra.mxu1 %v8094_v22 }
 0x1ee   :  { %6789 = vmatprep.subr.bf16.mxu0 %v7270_v1  ;;  %6801 = vmatprep.subr.bf16.mxu1 %v7270_v1 }
 0x1f1   :  { %v2132_v54 = vpop.f32.mrb[22].mxu0  ;;  %6791 = vmatpush1.bf16.msra.mxu0 %v8161_v43  ;;  %6803 = vmatpush1.bf16.msra.mxu1 %v8106_v45 }
 0x1f2   :  { %v2136_v55 = vmax.f32 %v2060_v46, %v2132_v54  ;;  %3368 = vmatprep.subr.mxu0 %v7272_v2  ;;  %6804 = vmatprep.subr.bf16.mxu1 %v7270_v1  ;;  %v5785_v56 = vpop.f32.mrb[23].mxu0 }
 0x1f3   :  { %v4805_v56 = vld [vmem:[%s8771_s3 + $0xb8] sm:$0xff] }
 0x1f5   :  { %4766 = vmatpush1.msk.msra.mxu0 %vm3256_vm7, %v8171_v49  ;;  %6806 = vmatpush1.bf16.msra.mxu1 %v8118_v48 }
 0x1f6   :  { %3401 = vmatmul.mubr.f32.vlgmr.msra.gmra.mrb[38].mxu0 %v4764_v57  ;;  %6816 = vmatprep.subr.bf16.mxu0 %v7270_v1  ;;  %v4800_v57 = vld [vmem:[%s8771_s3 + $0xa0] sm:$0xff] }
 0x1f7   :  { %6818 = vmatpush1.bf16.msra.mxu0 %v8061_v15  ;;  %6807 = vmatprep.subr.bf16.mxu1 %v7270_v1 }
 0x1f8   :  { %6819 = vmatprep.subr.bf16.mxu0 %v7270_v1  ;;  %4775 = vmatprep.mubr.msk.f32.mxu0 %vm3252_vm6, %v4773_v58 }
 0x1f9   :  { %v2208_v59 = vpop.f32.mrb[22].mxu1  ;;  %6809 = vmatpush1.bf16.msra.mxu1 %v8131_v52 }
 0x1fa   :  { %v2212_v60 = vmax.f32 %v2136_v55, %v2208_v59  ;;  %v5814_v61 = vpop.f32.mrb[23].mxu1  ;;  %6810 = vmatprep.subr.bf16.mxu1 %v7270_v1 }
 0x1fb   :  { %6821 = vmatpush1.bf16.msra.mxu0 %v8081_v18  ;;  %v4809_v61 = vld [vmem:[%s8771_s3 + $0xc8] sm:$0xff] }
 0x1fc   :  { %6822 = vmatprep.subr.bf16.mxu0 %v7270_v1 }
 0x1fd   :  { %6812 = vmatpush1.bf16.msra.mxu1 %v8149_v35 }
 0x1fe   :  { %6813 = vmatprep.subr.bf16.mxu1 %v7270_v1 }
 0x1ff   :  { %6824 = vmatpush1.bf16.msra.mxu0 %v8094_v22 }
 0x200   :  { %6825 = vmatprep.subr.bf16.mxu0 %v7270_v1 }
 0x201   :  { %6815 = vmatpush1.bf16.msra.mxu1 %v8161_v43 }
 0x202   :  { %3445 = vmatprep.subr.mxu1 %v7272_v2 }
 0x203   :  { %6827 = vmatpush1.bf16.msra.mxu0 %v8106_v45 }
 0x204   :  { %6828 = vmatprep.subr.bf16.mxu0 %v7270_v1 }
 0x205   :  { %4770 = vmatpush1.msk.msra.mxu1 %vm3256_vm7, %v8171_v49 }
 0x206   :  { %3478 = vmatmul.mubr.f32.vlgmr.msra.gmra.mrb[38].mxu1 %v4768_v62  ;;  %6840 = vmatprep.subr.bf16.mxu1 %v7270_v1 }
 0x207   :  { %6830 = vmatpush1.bf16.msra.mxu0 %v8118_v48  ;;  %6842 = vmatpush1.bf16.msra.mxu1 %v8061_v15 }
 0x208   :  { %6831 = vmatprep.subr.bf16.mxu0 %v7270_v1  ;;  %6843 = vmatprep.subr.bf16.mxu1 %v7270_v1 }
 0x209   :  { %4779 = vmatprep.mubr.msk.f32.mxu1 %vm3252_vm6, %v4777_v63 }
 0x20b   :  { %v2284_v0 = vpop.f32.mrb[24].mxu0  ;;  %6833 = vmatpush1.bf16.msra.mxu0 %v8131_v52  ;;  %6845 = vmatpush1.bf16.msra.mxu1 %v8081_v18 }
 0x20c   :  { %v2288_v3 = vmax.f32 %v2212_v60, %v2284_v0  ;;  %6834 = vmatprep.subr.bf16.mxu0 %v7270_v1  ;;  %6846 = vmatprep.subr.bf16.mxu1 %v7270_v1  ;;  %v5843_v4 = vpop.f32.mrb[25].mxu0 }
 0x20d   :  { %v4813_v4 = vld [vmem:[%s8771_s3 + $0xd8] sm:$0xff] }
 0x20f   :  { %6836 = vmatpush1.bf16.msra.mxu0 %v8149_v35  ;;  %6848 = vmatpush1.bf16.msra.mxu1 %v8094_v22 }
 0x210   :  { %6837 = vmatprep.subr.bf16.mxu0 %v7270_v1  ;;  %6849 = vmatprep.subr.bf16.mxu1 %v7270_v1 }
 0x213   :  { %v2360_v5 = vpop.f32.mrb[24].mxu1  ;;  %6839 = vmatpush1.bf16.msra.mxu0 %v8161_v43  ;;  %6851 = vmatpush1.bf16.msra.mxu1 %v8106_v45 }
 0x214   :  { %v2364_v6 = vmax.f32 %v2288_v3, %v2360_v5  ;;  %v5872_v7 = vpop.f32.mrb[25].mxu1  ;;  %3522 = vmatprep.subr.mxu0 %v7272_v2  ;;  %6852 = vmatprep.subr.bf16.mxu1 %v7270_v1  ;;  %v4804_v3 = vld [vmem:[%s8771_s3 + $0xb0] sm:$0xff] }
 0x217   :  { %4774 = vmatpush1.msk.msra.mxu0 %vm3256_vm7, %v8171_v49  ;;  %6854 = vmatpush1.bf16.msra.mxu1 %v8118_v48 }
 0x218   :  { %3555 = vmatmul.mubr.f32.vlgmr.msra.gmra.mrb[40].mxu0 %v4772_v8  ;;  %6864 = vmatprep.subr.bf16.mxu0 %v7270_v1  ;;  %v4808_v8 = vld [vmem:[%s8771_s3 + $0xc0] sm:$0xff] }
 0x219   :  { %6866 = vmatpush1.bf16.msra.mxu0 %v8061_v15  ;;  %6855 = vmatprep.subr.bf16.mxu1 %v7270_v1 }
 0x21a   :  { %6867 = vmatprep.subr.bf16.mxu0 %v7270_v1  ;;  %4783 = vmatprep.mubr.msk.f32.mxu0 %vm3252_vm6, %v4781_v9  ;;  %v4817_v9 = vld [vmem:[%s8771_s3 + $0xe8] sm:$0xff] }
 0x21b   :  { %6857 = vmatpush1.bf16.msra.mxu1 %v8131_v52 }
 0x21c   :  { %6858 = vmatprep.subr.bf16.mxu1 %v7270_v1 }
 0x21d   :  { %6869 = vmatpush1.bf16.msra.mxu0 %v8081_v18 }
 0x21e   :  { %6870 = vmatprep.subr.bf16.mxu0 %v7270_v1 }
 0x21f   :  { %6860 = vmatpush1.bf16.msra.mxu1 %v8149_v35 }
 0x220   :  { %6861 = vmatprep.subr.bf16.mxu1 %v7270_v1 }
 0x221   :  { %6872 = vmatpush1.bf16.msra.mxu0 %v8094_v22 }
 0x222   :  { %6873 = vmatprep.subr.bf16.mxu0 %v7270_v1 }
 0x223   :  { %6863 = vmatpush1.bf16.msra.mxu1 %v8161_v43 }
 0x224   :  { %3599 = vmatprep.subr.mxu1 %v7272_v2 }
 0x225   :  { %v2436_v10 = vpop.f32.mrb[26].mxu0  ;;  %6875 = vmatpush1.bf16.msra.mxu0 %v8106_v45 }
 0x226   :  { %v2440_v12 = vmax.f32 %v2364_v6, %v2436_v10  ;;  %6876 = vmatprep.subr.bf16.mxu0 %v7270_v1  ;;  %v5901_v36 = vpop.f32.mrb[27].mxu0 }
 0x227   :  { %4778 = vmatpush1.msk.msra.mxu1 %vm3256_vm7, %v8171_v49  ;;  %v4821_v36 = vld [vmem:[%s8771_s3 + $0xf8] sm:$0xff] }
 0x228   :  { %3632 = vmatmul.mubr.f32.vlgmr.msra.gmra.mrb[40].mxu1 %v4776_v11  ;;  %6888 = vmatprep.subr.bf16.mxu1 %v7270_v1 }
 0x229   :  { %6878 = vmatpush1.bf16.msra.mxu0 %v8118_v48  ;;  %6890 = vmatpush1.bf16.msra.mxu1 %v8061_v15 }
 0x22a   :  { %6879 = vmatprep.subr.bf16.mxu0 %v7270_v1  ;;  %6891 = vmatprep.subr.bf16.mxu1 %v7270_v1 }
 0x22b   :  { %4787 = vmatprep.mubr.msk.f32.mxu1 %vm3252_vm6, %v4785_v14  ;;  %v7274_v14 = vmov 0  }
 0x22c   :  { %7168 = vset.pattern.permute.xlu1 %v7274_v14  ;;  %7169 = vset.pattern.permute.xlu0 %v7274_v14 }
 0x22d   :  { %v2512_v16 = vpop.f32.mrb[26].mxu1  ;;  %6881 = vmatpush1.bf16.msra.mxu0 %v8131_v52  ;;  %6893 = vmatpush1.bf16.msra.mxu1 %v8081_v18 }
 0x22e   :  { %v8295_v17 = vmax.f32 %v2440_v12, %v2512_v16  ;;  %v5930_v39 = vpop.f32.mrb[27].mxu1  ;;  %6882 = vmatprep.subr.bf16.mxu0 %v7270_v1  ;;  %6894 = vmatprep.subr.bf16.mxu1 %v7270_v1  ;;  %v4812_v12 = vld [vmem:[%s8771_s3 + $0xd0] sm:$0xff] }
 0x230   :  { %3202 = vrot.lane.b32.xlu0 %v8295_v17, %s7273_s20 }
 0x231   :  { %6884 = vmatpush1.bf16.msra.mxu0 %v8149_v35  ;;  %6896 = vmatpush1.bf16.msra.mxu1 %v8094_v22 }
 0x232   :  { %6885 = vmatprep.subr.bf16.mxu0 %v7270_v1  ;;  %6897 = vmatprep.subr.bf16.mxu1 %v7270_v1 }
 0x235   :  { %6887 = vmatpush1.bf16.msra.mxu0 %v8161_v43  ;;  %6899 = vmatpush1.bf16.msra.mxu1 %v8106_v45 }
 0x236   :  { %3676 = vmatprep.subr.mxu0 %v7272_v2  ;;  %6900 = vmatprep.subr.bf16.mxu1 %v7270_v1 }
 0x239   :  { %4782 = vmatpush1.msk.msra.mxu0 %vm3256_vm7, %v8171_v49  ;;  %6902 = vmatpush1.bf16.msra.mxu1 %v8118_v48 }
 0x23a   :  { %3709 = vmatmul.mubr.f32.vlgmr.msra.gmra.mrb[42].mxu0 %v4780_v19  ;;  %6912 = vmatprep.subr.bf16.mxu0 %v7270_v1 }
 0x23b   :  { %6914 = vmatpush1.bf16.msra.mxu0 %v8061_v15  ;;  %6903 = vmatprep.subr.bf16.mxu1 %v7270_v1 }
 0x23c   :  { %6915 = vmatprep.subr.bf16.mxu0 %v7270_v1  ;;  %4791 = vmatprep.mubr.msk.f32.mxu0 %vm3252_vm6, %v4789_v20  ;;  %v4816_v20 = vld [vmem:[%s8771_s3 + $0xe0] sm:$0xff] }
 0x23d   :  { %6905 = vmatpush1.bf16.msra.mxu1 %v8131_v52 }
 0x23e   :  { %6906 = vmatprep.subr.bf16.mxu1 %v7270_v1 }
 0x23f   :  { %6917 = vmatpush1.bf16.msra.mxu0 %v8081_v18  ;;  %v2588_v21 = vpop.f32.mrb[28].mxu0 }
 0x240   :  { %6918 = vmatprep.subr.bf16.mxu0 %v7270_v1  ;;  %v5959_v42 = vpop.f32.mrb[29].mxu0 }
 0x241   :  { %6908 = vmatpush1.bf16.msra.mxu1 %v8149_v35 }
 0x242   :  { %6909 = vmatprep.subr.bf16.mxu1 %v7270_v1 }
 0x243   :  { %6920 = vmatpush1.bf16.msra.mxu0 %v8094_v22 }
 0x244   :  { %6921 = vmatprep.subr.bf16.mxu0 %v7270_v1 }
 0x245   :  { %6911 = vmatpush1.bf16.msra.mxu1 %v8161_v43 }
 0x246   :  { %3753 = vmatprep.subr.mxu1 %v7272_v2 }
 0x247   :  { %v2663_v23 = vpop.f32.mrb[28].mxu1  ;;  %6923 = vmatpush1.bf16.msra.mxu0 %v8106_v45 }
 0x248   :  { %v2667_v25 = vmax.f32 %v2588_v21, %v2663_v23  ;;  %v5988_v26 = vpop.f32.mrb[29].mxu1  ;;  %6924 = vmatprep.subr.bf16.mxu0 %v7270_v1  ;;  %v4825_v21 = vld [vmem:[%s8771_s3 + $0x108] sm:$0xff] }
 0x249   :  { %4786 = vmatpush1.msk.msra.mxu1 %vm3256_vm7, %v8171_v49 }
 0x24a   :  { %3786 = vmatmul.mubr.f32.vlgmr.msra.gmra.mrb[42].mxu1 %v4784_v24  ;;  %6936 = vmatprep.subr.bf16.mxu1 %v7270_v1 }
 0x24b   :  { %6926 = vmatpush1.bf16.msra.mxu0 %v8118_v48  ;;  %6938 = vmatpush1.bf16.msra.mxu1 %v8061_v15 }
 0x24c   :  { %6927 = vmatprep.subr.bf16.mxu0 %v7270_v1  ;;  %6939 = vmatprep.subr.bf16.mxu1 %v7270_v1 }
 0x24d   :  { %4795 = vmatprep.mubr.msk.f32.mxu1 %vm3252_vm6, %v4793_v28 }
 0x24f   :  { %6929 = vmatpush1.bf16.msra.mxu0 %v8131_v52  ;;  %6941 = vmatpush1.bf16.msra.mxu1 %v8081_v18 }
 0x250   :  { %6930 = vmatprep.subr.bf16.mxu0 %v7270_v1  ;;  %6942 = vmatprep.subr.bf16.mxu1 %v7270_v1 }
 0x253   :  { %6932 = vmatpush1.bf16.msra.mxu0 %v8149_v35  ;;  %6944 = vmatpush1.bf16.msra.mxu1 %v8094_v22 }
 0x254   :  { %6933 = vmatprep.subr.bf16.mxu0 %v7270_v1  ;;  %6945 = vmatprep.subr.bf16.mxu1 %v7270_v1 }
 0x257   :  { %6935 = vmatpush1.bf16.msra.mxu0 %v8161_v43  ;;  %6947 = vmatpush1.bf16.msra.mxu1 %v8106_v45 }
 0x258   :  { %3830 = vmatprep.subr.mxu0 %v7272_v2  ;;  %6948 = vmatprep.subr.bf16.mxu1 %v7270_v1 }
 0x259   :  { %v2739_v29 = vpop.f32.mrb[30].mxu0 }
 0x25a   :  { %v2743_v31 = vmax.f32 %v2667_v25, %v2739_v29  ;;  %v6017_v33 = vpop.f32.mrb[31].mxu0 }
 0x25b   :  { %4790 = vmatpush1.msk.msra.mxu0 %vm3256_vm7, %v8171_v49  ;;  %6950 = vmatpush1.bf16.msra.mxu1 %v8118_v48 }
 0x25c   :  { %3863 = vmatmul.mubr.f32.vlgmr.msra.gmra.mrb[44].mxu0 %v4788_v30  ;;  %6960 = vmatprep.subr.bf16.mxu0 %v7270_v1 }
 0x25d   :  { %6962 = vmatpush1.bf16.msra.mxu0 %v8061_v15  ;;  %6951 = vmatprep.subr.bf16.mxu1 %v7270_v1 }
 0x25e   :  { %6963 = vmatprep.subr.bf16.mxu0 %v7270_v1  ;;  %4799 = vmatprep.mubr.msk.f32.mxu0 %vm3252_vm6, %v4797_v53  ;;  %v1804_v53 = vpop.permute.xlu0 %1803 }
 0x25f   :  { %6953 = vmatpush1.bf16.msra.mxu1 %v8131_v52 }
 0x260   :  { %6954 = vmatprep.subr.bf16.mxu1 %v7270_v1 }
 0x261   :  { %v2815_v34 = vpop.f32.mrb[30].mxu1  ;;  %6965 = vmatpush1.bf16.msra.mxu0 %v8081_v18 }
 0x262   :  { %v2819_v37 = vmax.f32 %v2743_v31, %v2815_v34  ;;  %v6046_v38 = vpop.f32.mrb[31].mxu1  ;;  %6966 = vmatprep.subr.bf16.mxu0 %v7270_v1 }
 0x263   :  { %6956 = vmatpush1.bf16.msra.mxu1 %v8149_v35 }
 0x264   :  { %6957 = vmatprep.subr.bf16.mxu1 %v7270_v1 }
 0x265   :  { %6968 = vmatpush1.bf16.msra.mxu0 %v8094_v22 }
 0x266   :  { %6969 = vmatprep.subr.bf16.mxu0 %v7270_v1 }
 0x267   :  { %6959 = vmatpush1.bf16.msra.mxu1 %v8161_v43 }
 0x268   :  { %3907 = vmatprep.subr.mxu1 %v7272_v2 }
 0x269   :  { %6971 = vmatpush1.bf16.msra.mxu0 %v8106_v45 }
 0x26a   :  { %6972 = vmatprep.subr.bf16.mxu0 %v7270_v1 }
 0x26b   :  { %4794 = vmatpush1.msk.msra.mxu1 %vm3256_vm7, %v8171_v49 }
 0x26c   :  { %3940 = vmatmul.mubr.f32.vlgmr.msra.gmra.mrb[44].mxu1 %v4792_v40  ;;  %6984 = vmatprep.subr.bf16.mxu1 %v7270_v1  ;;  %v1806_v40 = vmax.f32 %v8057_v13, %v1804_v53  ;;  %v4761_v13 = vld [vmem:[%s8776_s8] ss:$0 sm:$0xff] }
 0x26d   :  { %6974 = vmatpush1.bf16.msra.mxu0 %v8118_v48  ;;  %6986 = vmatpush1.bf16.msra.mxu1 %v8061_v15  ;;  %v4637_v53 = vld [vmem:[%s8768_s0 + $0x20] sm:$0xff] }
 0x26e   :  { %6975 = vmatprep.subr.bf16.mxu0 %v7270_v1  ;;  %6987 = vmatprep.subr.bf16.mxu1 %v7270_v1 }
 0x26f   :  { %4803 = vmatprep.mubr.msk.f32.mxu1 %vm3252_vm6, %v4801_v41 }
 0x271   :  { %6977 = vmatpush1.bf16.msra.mxu0 %v8131_v52  ;;  %6989 = vmatpush1.bf16.msra.mxu1 %v8081_v18 }
 0x272   :  { %6978 = vmatprep.subr.bf16.mxu0 %v7270_v1  ;;  %6990 = vmatprep.subr.bf16.mxu1 %v7270_v1 }
 0x273   :  { %v2891_v44 = vpop.f32.mrb[32].mxu0 }
 0x274   :  { %v2895_v46 = vmax.f32 %v2819_v37, %v2891_v44  ;;  %v6075_v47 = vpop.f32.mrb[33].mxu0 }
 0x275   :  { %6980 = vmatpush1.bf16.msra.mxu0 %v8149_v35  ;;  %6992 = vmatpush1.bf16.msra.mxu1 %v8094_v22 }
 0x276   :  { %6981 = vmatprep.subr.bf16.mxu0 %v7270_v1  ;;  %6993 = vmatprep.subr.bf16.mxu1 %v7270_v1 }
 0x279   :  { %6983 = vmatpush1.bf16.msra.mxu0 %v8161_v43  ;;  %6995 = vmatpush1.bf16.msra.mxu1 %v8106_v45 }
 0x27a   :  { %3986 = vmatprep.subr.mxu0 %v7272_v2  ;;  %6996 = vmatprep.subr.bf16.mxu1 %v7270_v1 }
 0x27b   :  { %v2967_v50 = vpop.f32.mrb[32].mxu1 }
 0x27c   :  { %v2971_v54 = vmax.f32 %v2895_v46, %v2967_v50  ;;  %v6104_v55 = vpop.f32.mrb[33].mxu1  ;;  %v4685_v46 = vld [vmem:[#allocation2] ss:$0 sm:$0xff] }
 0x27d   :  { %4798 = vmatpush1.msk.msra.mxu0 %vm3256_vm7, %v8171_v49  ;;  %6998 = vmatpush1.bf16.msra.mxu1 %v8118_v48 }
 0x27e   :  { %4019 = vmatmul.mubr.f32.vlgmr.msra.gmra.mrb[46].mxu0 %v4796_v51  ;;  %7008 = vmatprep.subr.bf16.mxu0 %v7270_v1 }
 0x27f   :  { %7010 = vmatpush1.bf16.msra.mxu0 %v8061_v15  ;;  %6999 = vmatprep.subr.bf16.mxu1 %v7270_v1 }
 0x280   :  { %7011 = vmatprep.subr.bf16.mxu0 %v7270_v1  ;;  %4807 = vmatprep.mubr.msk.f32.mxu0 %vm3252_vm6, %v4805_v56 }
 0x281   :  { %7001 = vmatpush1.bf16.msra.mxu1 %v8131_v52 }
 0x282   :  { %7002 = vmatprep.subr.bf16.mxu1 %v7270_v1 }
 0x283   :  { %7013 = vmatpush1.bf16.msra.mxu0 %v8081_v18 }
 0x284   :  { %7014 = vmatprep.subr.bf16.mxu0 %v7270_v1 }
 0x285   :  { %7004 = vmatpush1.bf16.msra.mxu1 %v8149_v35 }
 0x286   :  { %7005 = vmatprep.subr.bf16.mxu1 %v7270_v1 }
 0x287   :  { %7016 = vmatpush1.bf16.msra.mxu0 %v8094_v22 }
 0x288   :  { %7017 = vmatprep.subr.bf16.mxu0 %v7270_v1 }
 0x289   :  { %7007 = vmatpush1.bf16.msra.mxu1 %v8161_v43 }
 0x28a   :  { %4063 = vmatprep.subr.mxu1 %v7272_v2 }
 0x28b   :  { %7019 = vmatpush1.bf16.msra.mxu0 %v8106_v45 }
 0x28c   :  { %7020 = vmatprep.subr.bf16.mxu0 %v7270_v1 }
 0x28d   :  { %v3043_v58 = vpop.f32.mrb[34].mxu0  ;;  %4802 = vmatpush1.msk.msra.mxu1 %vm3256_vm7, %v8171_v49 }
 0x28e   :  { %v3047_v59 = vmax.f32 %v2971_v54, %v3043_v58  ;;  %4096 = vmatmul.mubr.f32.vlgmr.msra.gmra.mrb[46].mxu1 %v4800_v57  ;;  %7032 = vmatprep.subr.bf16.mxu1 %v7270_v1  ;;  %v6133_v60 = vpop.f32.mrb[35].mxu0 }
 0x28f   :  { %7022 = vmatpush1.bf16.msra.mxu0 %v8118_v48  ;;  %7034 = vmatpush1.bf16.msra.mxu1 %v8061_v15 }
 0x290   :  { %7023 = vmatprep.subr.bf16.mxu0 %v7270_v1  ;;  %7035 = vmatprep.subr.bf16.mxu1 %v7270_v1 }
 0x291   :  { %4811 = vmatprep.mubr.msk.f32.mxu1 %vm3252_vm6, %v4809_v61 }
 0x293   :  { %7025 = vmatpush1.bf16.msra.mxu0 %v8131_v52  ;;  %7037 = vmatpush1.bf16.msra.mxu1 %v8081_v18 }
 0x294   :  { %7026 = vmatprep.subr.bf16.mxu0 %v7270_v1  ;;  %7038 = vmatprep.subr.bf16.mxu1 %v7270_v1 }
 0x295   :  { %v3119_v62 = vpop.f32.mrb[34].mxu1 }
 0x296   :  { %v3123_v63 = vmax.f32 %v3047_v59, %v3119_v62  ;;  %v6162_v0 = vpop.f32.mrb[35].mxu1 }
 0x297   :  { %7028 = vmatpush1.bf16.msra.mxu0 %v8149_v35  ;;  %7040 = vmatpush1.bf16.msra.mxu1 %v8094_v22 }
 0x298   :  { %7029 = vmatprep.subr.bf16.mxu0 %v7270_v1  ;;  %7041 = vmatprep.subr.bf16.mxu1 %v7270_v1 }
 0x29b   :  { %7031 = vmatpush1.bf16.msra.mxu0 %v8161_v43  ;;  %7043 = vmatpush1.bf16.msra.mxu1 %v8106_v45 }
 0x29c   :  { %4140 = vmatprep.subr.mxu0 %v7272_v2  ;;  %7044 = vmatprep.subr.bf16.mxu1 %v7270_v1 }
 0x29f   :  { %4806 = vmatpush1.msk.msra.mxu0 %vm3256_vm7, %v8171_v49  ;;  %7046 = vmatpush1.bf16.msra.mxu1 %v8118_v48 }
 0x2a0   :  { %4173 = vmatmul.mubr.f32.vlgmr.msra.gmra.mrb[48].mxu0 %v4804_v3  ;;  %7056 = vmatprep.subr.bf16.mxu0 %v7270_v1 }
 0x2a1   :  { %7058 = vmatpush1.bf16.msra.mxu0 %v8061_v15  ;;  %7047 = vmatprep.subr.bf16.mxu1 %v7270_v1 }
 0x2a2   :  { %7059 = vmatprep.subr.bf16.mxu0 %v7270_v1  ;;  %4815 = vmatprep.mubr.msk.f32.mxu0 %vm3252_vm6, %v4813_v4 }
 0x2a3   :  { %7049 = vmatpush1.bf16.msra.mxu1 %v8131_v52 }
 0x2a4   :  { %7050 = vmatprep.subr.bf16.mxu1 %v7270_v1 }
 0x2a5   :  { %7061 = vmatpush1.bf16.msra.mxu0 %v8081_v18 }
 0x2a6   :  { %7062 = vmatprep.subr.bf16.mxu0 %v7270_v1 }
 0x2a7   :  { %v3195_v5 = vpop.f32.mrb[36].mxu0  ;;  %7052 = vmatpush1.bf16.msra.mxu1 %v8149_v35 }
 0x2a8   :  { %v8484_v6 = vmax.f32 %v3123_v63, %v3195_v5  ;;  %7053 = vmatprep.subr.bf16.mxu1 %v7270_v1  ;;  %v6191_v7 = vpop.f32.mrb[37].mxu0 }
 0x2a9   :  { %7064 = vmatpush1.bf16.msra.mxu0 %v8094_v22 }
 0x2aa   :  { %3215 = vrot.lane.b32.xlu1 %v8484_v6, %s7273_s20  ;;  %7065 = vmatprep.subr.bf16.mxu0 %v7270_v1 }
 0x2ab   :  { %7055 = vmatpush1.bf16.msra.mxu1 %v8161_v43 }
 0x2ac   :  { %4217 = vmatprep.subr.mxu1 %v7272_v2 }
 0x2ad   :  { %7067 = vmatpush1.bf16.msra.mxu0 %v8106_v45 }
 0x2ae   :  { %7068 = vmatprep.subr.bf16.mxu0 %v7270_v1 }
 0x2af   :  { %4810 = vmatpush1.msk.msra.mxu1 %vm3256_vm7, %v8171_v49 }
 0x2b0   :  { %4250 = vmatmul.mubr.f32.vlgmr.msra.gmra.mrb[48].mxu1 %v4808_v8  ;;  %7080 = vmatprep.subr.bf16.mxu1 %v7270_v1 }
 0x2b1   :  { %7070 = vmatpush1.bf16.msra.mxu0 %v8118_v48  ;;  %7082 = vmatpush1.bf16.msra.mxu1 %v8061_v15 }
 0x2b2   :  { %7071 = vmatprep.subr.bf16.mxu0 %v7270_v1  ;;  %7083 = vmatprep.subr.bf16.mxu1 %v7270_v1 }
 0x2b3   :  { %4819 = vmatprep.mubr.msk.f32.mxu1 %vm3252_vm6, %v4817_v9 }
 0x2b5   :  { %7073 = vmatpush1.bf16.msra.mxu0 %v8131_v52  ;;  %7085 = vmatpush1.bf16.msra.mxu1 %v8081_v18 }
 0x2b6   :  { %7074 = vmatprep.subr.bf16.mxu0 %v7270_v1  ;;  %7086 = vmatprep.subr.bf16.mxu1 %v7270_v1 }
 0x2b7   :  { %v3326_v10 = vpop.f32.mrb[36].mxu1 }
 0x2b8   :  { %v3328_v11 = vpop.f32.mrb[37].mxu1 }
 0x2b9   :  { %7076 = vmatpush1.bf16.msra.mxu0 %v8149_v35  ;;  %7088 = vmatpush1.bf16.msra.mxu1 %v8094_v22 }
 0x2ba   :  { %7077 = vmatprep.subr.bf16.mxu0 %v7270_v1  ;;  %7089 = vmatprep.subr.bf16.mxu1 %v7270_v1 }
 0x2bd   :  { %7079 = vmatpush1.bf16.msra.mxu0 %v8161_v43  ;;  %7091 = vmatpush1.bf16.msra.mxu1 %v8106_v45 }
 0x2be   :  { %4294 = vmatprep.subr.mxu0 %v7272_v2  ;;  %7092 = vmatprep.subr.bf16.mxu1 %v7270_v1 }
 0x2c1   :  { %4814 = vmatpush1.msk.msra.mxu0 %vm3256_vm7, %v8171_v49  ;;  %7094 = vmatpush1.bf16.msra.mxu1 %v8118_v48 }
 0x2c2   :  { %4327 = vmatmul.mubr.f32.vlgmr.msra.gmra.mrb[50].mxu0 %v4812_v12  ;;  %7104 = vmatprep.subr.bf16.mxu0 %v7270_v1 }
 0x2c3   :  { %7106 = vmatpush1.bf16.msra.mxu0 %v8061_v15  ;;  %7095 = vmatprep.subr.bf16.mxu1 %v7270_v1 }
 0x2c4   :  { %7107 = vmatprep.subr.bf16.mxu0 %v7270_v1  ;;  %4823 = vmatprep.mubr.msk.f32.mxu0 %vm3252_vm6, %v4821_v36 }
 0x2c5   :  { %7097 = vmatpush1.bf16.msra.mxu1 %v8131_v52 }
 0x2c6   :  { %7098 = vmatprep.subr.bf16.mxu1 %v7270_v1 }
 0x2c7   :  { %7109 = vmatpush1.bf16.msra.mxu0 %v8081_v18 }
 0x2c8   :  { %7110 = vmatprep.subr.bf16.mxu0 %v7270_v1 }
 0x2c9   :  { %v3402_v16 = vpop.f32.mrb[38].mxu0  ;;  %7100 = vmatpush1.bf16.msra.mxu1 %v8149_v35 }
 0x2ca   :  { %v3406_v39 = vmax.f32 %v3326_v10, %v3402_v16  ;;  %7101 = vmatprep.subr.bf16.mxu1 %v7270_v1  ;;  %v3404_v19 = vpop.f32.mrb[39].mxu0  ;;  %v3203_v16 = vpop.permute.xlu0 %3202 }
 0x2cb   :  { %7112 = vmatpush1.bf16.msra.mxu0 %v8094_v22  ;;  %v3205_v19 = vmax.f32 %v8295_v17, %v3203_v16  ;;  %v4664_v16 = vld [vmem:[%s8768_s0 + $0x68] sm:$0xff] }
 0x2cc   :  { %7113 = vmatprep.subr.bf16.mxu0 %v7270_v1 }
 0x2cd   :  { %7103 = vmatpush1.bf16.msra.mxu1 %v8161_v43 }
 0x2ce   :  { %4371 = vmatprep.subr.mxu1 %v7272_v2 }
 0x2cf   :  { %7115 = vmatpush1.bf16.msra.mxu0 %v8106_v45 }
 0x2d0   :  { %7116 = vmatprep.subr.bf16.mxu0 %v7270_v1 }
 0x2d1   :  { %4818 = vmatpush1.msk.msra.mxu1 %vm3256_vm7, %v8171_v49 }
 0x2d2   :  { %4404 = vmatmul.mubr.f32.vlgmr.msra.gmra.mrb[50].mxu1 %v4816_v20  ;;  %7128 = vmatprep.subr.bf16.mxu1 %v7270_v1 }
 0x2d3   :  { %7118 = vmatpush1.bf16.msra.mxu0 %v8118_v48  ;;  %7130 = vmatpush1.bf16.msra.mxu1 %v8061_v15  ;;  %v4820_v15 = vld [vmem:[%s8771_s3 + $0xf0] sm:$0xff] }
 0x2d4   :  { %7119 = vmatprep.subr.bf16.mxu0 %v7270_v1  ;;  %7131 = vmatprep.subr.bf16.mxu1 %v7270_v1 }
 0x2d5   :  { %4827 = vmatprep.mubr.msk.f32.mxu1 %vm3252_vm6, %v4825_v21 }
 0x2d7   :  { %7121 = vmatpush1.bf16.msra.mxu0 %v8131_v52  ;;  %7133 = vmatpush1.bf16.msra.mxu1 %v8081_v18 }
 0x2d8   :  { %7122 = vmatprep.subr.bf16.mxu0 %v7270_v1  ;;  %7134 = vmatprep.subr.bf16.mxu1 %v7270_v1 }
 0x2d9   :  { %v3479_v42 = vpop.f32.mrb[38].mxu1 }
 0x2da   :  { %v3483_v23 = vmax.f32 %v3406_v39, %v3479_v42  ;;  %v3481_v24 = vpop.f32.mrb[39].mxu1 }
 0x2db   :  { %7124 = vmatpush1.bf16.msra.mxu0 %v8149_v35  ;;  %7136 = vmatpush1.bf16.msra.mxu1 %v8094_v22 }
 0x2dc   :  { %7125 = vmatprep.subr.bf16.mxu0 %v7270_v1  ;;  %7137 = vmatprep.subr.bf16.mxu1 %v7270_v1 }
 0x2df   :  { %7127 = vmatpush1.bf16.msra.mxu0 %v8161_v43  ;;  %7139 = vmatpush1.bf16.msra.mxu1 %v8106_v45 }
 0x2e0   :  { %4448 = vmatprep.subr.mxu0 %v7272_v2  ;;  %7140 = vmatprep.subr.bf16.mxu1 %v7270_v1 }
 0x2e3   :  { %4822 = vmatpush1.msk.msra.mxu0 %vm3256_vm7, %v8171_v49  ;;  %7142 = vmatpush1.bf16.msra.mxu1 %v8118_v48  ;;  %v4824_v48 = vld [vmem:[%s8771_s3 + $0x100] sm:$0xff] }
 0x2e4   :  { %4481 = vmatmul.mubr.f32.vlgmr.msra.gmra.mrb[52].mxu0 %v4820_v15  ;;  %7143 = vmatprep.subr.bf16.mxu1 %v7270_v1  ;;  %v8615_v15 = vld [vmem:[%s8777_s9] ss:$0 sm:$0xff] }
 0x2e7   :  { %7145 = vmatpush1.bf16.msra.mxu1 %v8131_v52 }
 0x2e8   :  { %7146 = vmatprep.subr.bf16.mxu1 %v7270_v1 }
 0x2eb   :  { %v3556_v18 = vpop.f32.mrb[40].mxu0  ;;  %7148 = vmatpush1.bf16.msra.mxu1 %v8149_v35 }
 0x2ec   :  { %v3560_v22 = vmax.f32 %v3483_v23, %v3556_v18  ;;  %7149 = vmatprep.subr.bf16.mxu1 %v7270_v1  ;;  %v3558_v45 = vpop.f32.mrb[41].mxu0  ;;  %v3212_v23 = vadd.f32 %v4761_v13, %v3205_v19 }
 0x2ed   :  { %v4627_v45 = vld [vmem:[%s8778_s10] ss:$0 sm:$0xff] }
 0x2ee   :  { %v3213_v18 = vmax.f32 %v3212_v23, 0.0  ;;  %v4669_v23 = vld [vmem:[%s8778_s10 + $0xe] ss:$0 sm:$0xff] }
 0x2ef   :  { %7151 = vmatpush1.bf16.msra.mxu1 %v8161_v43 }
 0x2f0   :  { %4525 = vmatprep.subr.mxu1 %v7272_v2 }
 0x2f3   :  { %4826 = vmatpush1.msk.msra.mxu1 %vm3256_vm7, %v8171_v49  ;;  %v8595_v49 = vld [vmem:[%s8775_s7] ss:$0 sm:$0xff]  ;;  %s7275_s7 = smov 16  }
 0x2f4   :  { %4558 = vmatmul.mubr.f32.vlgmr.msra.gmra.mrb[52].mxu1 %v4824_v48  ;;  %v1807_v47 = vadd.f32 %v8595_v49, %v1806_v40  ;;  %v4628_v48 = vld [vmem:[%s8768_s0 + $0x8] sm:$0xff] }
 0x2f5   :  { %v4640_v40 = vld [vmem:[%s8768_s0 + $0x28] sm:$0xff] }
 0x2f6   :  { %v1808_v51 = vmax.f32 %v1807_v47, 0.0  ;;  %v4643_v47 = vld [vmem:[%s8768_s0 + $0x30] sm:$0xff] }
 0x2fb   :  { %v3633_v52 = vpop.f32.mrb[40].mxu1 }
 0x2fc   :  { %v3637_v25 = vmax.f32 %v3560_v22, %v3633_v52  ;;  %v3635_v26 = vpop.f32.mrb[41].mxu1  ;;  %v75_v22 = vld [vmem:[%s8768_s0] sm:$0xff] }
 0x2fd   :  { %v4630_v52 = vld [vmem:[%s8778_s10 + $0x1] ss:$0 sm:$0xff]  ;;  %v83_v26 = vmul.f32 %v4627_v45, %v75_v22  ;;  %v4672_v22 = vld [vmem:[%s8778_s10 + $0xf] ss:$0 sm:$0xff] }
 0x30d   :  { %v3710_v35 = vpop.f32.mrb[42].mxu0 }
 0x30e   :  { %v3714_v28 = vmax.f32 %v3637_v25, %v3710_v35  ;;  %v3712_v29 = vpop.f32.mrb[43].mxu0  ;;  %v95_v35 = vmul.f32 %v4630_v52, %v4628_v48  ;;  %v4673_v52 = vld [vmem:[%s8768_s0 + $0x80] sm:$0xff] }
 0x30f   :  { %v4633_v29 = vld [vmem:[%s8778_s10 + $0x2] ss:$0 sm:$0xff] }
 0x31c   :  { %v3216_v41 = vpop.permute.xlu1 %3215 }
 0x31d   :  { %v3787_v1 = vpop.f32.mrb[42].mxu1  ;;  %v3218_v50 = vmax.f32 %v8484_v6, %v3216_v41  ;;  %v4642_v41 = vld [vmem:[%s8778_s10 + $0x5] ss:$0 sm:$0xff] }
 0x31e   :  { %v3791_v30 = vmax.f32 %v3714_v28, %v3787_v1  ;;  %v3789_v31 = vpop.f32.mrb[43].mxu1  ;;  %v4631_v28 = vld [vmem:[%s8768_s0 + $0x10] sm:$0xff]  ;;  %v96_v1 = vadd.f32 %v95_v35, %v83_v26 }
 0x31f   :  { %v3219_v54 = vadd.f32 %v4761_v13, %v3218_v50  ;;  %v4634_v31 = vld [vmem:[%s8768_s0 + $0x18] sm:$0xff]  ;;  %v4645_v50 = vld [vmem:[%s8778_s10 + $0x6] ss:$0 sm:$0xff] }
 0x321   :  { %v3220_v55 = vmax.f32 %v3219_v54, 0.0  ;;  %v4646_v54 = vld [vmem:[%s8768_s0 + $0x38] sm:$0xff] }
 0x32f   :  { %v3864_v43 = vpop.f32.mrb[44].mxu0 }
 0x330   :  { %v3868_v33 = vmax.f32 %v3791_v30, %v3864_v43  ;;  %v3866_v2 = vpop.f32.mrb[45].mxu0  ;;  %v107_v30 = vmul.f32 %v4633_v29, %v4631_v28  ;;  %v4636_v43 = vld [vmem:[%s8778_s10 + $0x3] ss:$0 sm:$0xff]  ;;  %v4676_v28 = vld [vmem:[%s8768_s0 + $0x88] sm:$0xff]  ;;  %v4678_v29 = vld [vmem:[%s8778_s10 + $0x11] ss:$0 sm:$0xff] }
 0x331   :  { %v119_v2 = vmul.f32 %v4636_v43, %v4634_v31  ;;  %v4679_v31 = vld [vmem:[%s8768_s0 + $0x90] sm:$0xff] }
 0x332   :  { %v4681_v43 = vld [vmem:[%s8778_s10 + $0x12] ss:$0 sm:$0xff] }
 0x33f   :  { %v3941_v34 = vpop.f32.mrb[44].mxu1 }
 0x340   :  { %v3945_v37 = vmax.f32 %v3868_v33, %v3941_v34  ;;  %v3943_v38 = vpop.f32.mrb[45].mxu1  ;;  %v3947_v56 = vsel %vm329_vm5, -inf, %v3941_v34  ;;  %v4639_v34 = vld [vmem:[%s8778_s10 + $0x4] ss:$0 sm:$0xff] }
 0x341   :  { %v131_v38 = vmul.f32 %v4639_v34, %v4637_v53  ;;  %v4682_v53 = vld [vmem:[%s8768_s0 + $0x98] sm:$0xff]  ;;  %v4684_v34 = vld [vmem:[%s8778_s10 + $0x13] ss:$0 sm:$0xff] }
 0x342   :  { %v3946_v44 = vsel %vm329_vm5, %v3945_v37, %v3868_v33  ;;  %v108_v33 = vadd.f32 %v107_v30, %v96_v1  ;;  %v287_v30 = vmul.f32 %v4678_v29, %v4676_v28 }
 0x343   :  { %4566 = vrot.lane.b32.xlu1 %v3946_v44, %s7273_s20 }
 0x344   :  { %v120_v37 = vadd.f32 %v119_v2, %v108_v33  ;;  %v299_v2 = vmul.f32 %v4681_v43, %v4679_v31 }
 0x347   :  { %320 = vperm.xlu1 %7168, %v4685_v46   ;;  %v143_v46 = vmul.f32 %v4642_v41, %v4640_v40 }
 0x34b   :  { %1812 = vrot.lane.b32.xlu1 %v1808_v51, %s7275_s7  ;;  %v155_v51 = vmul.f32 %v4645_v50, %v4643_v47 }
 0x34f   :  { %3228 = vrot.lane.b32.xlu1 %v3220_v55, %s7276_s28  ;;  %v4648_v55 = vld [vmem:[%s8778_s10 + $0x7] ss:$0 sm:$0xff] }
 0x351   :  { %v4020_v57 = vpop.f32.mrb[46].mxu0 }
 0x352   :  { %v4024_v58 = vmax.f32 %v3947_v56, %v4020_v57  ;;  %v4022_v59 = vpop.f32.mrb[47].mxu0  ;;  %v167_v57 = vmul.f32 %v4648_v55, %v4646_v54 }
 0x353   :  { %v4651_v59 = vld [vmem:[%s8778_s10 + $0x8] ss:$0 sm:$0xff] }
 0x361   :  { %v4097_v60 = vpop.f32.mrb[46].mxu1 }
 0x362   :  { %v4101_v61 = vmax.f32 %v4024_v58, %v4097_v60  ;;  %v4099_v62 = vpop.f32.mrb[47].mxu1  ;;  %v4649_v58 = vld [vmem:[%s8768_s0 + $0x40] sm:$0xff] }
 0x363   :  { %v4652_v62 = vld [vmem:[%s8768_s0 + $0x48] sm:$0xff] }
 0x373   :  { %v4174_v63 = vpop.f32.mrb[48].mxu0 }
 0x374   :  { %v4178_v0 = vmax.f32 %v4101_v61, %v4174_v63  ;;  %v4176_v3 = vpop.f32.mrb[49].mxu0  ;;  %v179_v61 = vmul.f32 %v4651_v59, %v4649_v58  ;;  %v4654_v63 = vld [vmem:[%s8778_s10 + $0x9] ss:$0 sm:$0xff] }
 0x375   :  { %v191_v3 = vmul.f32 %v4654_v63, %v4652_v62 }
 0x383   :  { %v4251_v4 = vpop.f32.mrb[48].mxu1 }
 0x384   :  { %v4255_v5 = vmax.f32 %v4178_v0, %v4251_v4  ;;  %v4253_v6 = vpop.f32.mrb[49].mxu1  ;;  %v4655_v4 = vld [vmem:[%s8768_s0 + $0x50] sm:$0xff] }
 0x395   :  { %v4328_v7 = vpop.f32.mrb[50].mxu0 }
 0x396   :  { %v4332_v8 = vmax.f32 %v4255_v5, %v4328_v7  ;;  %v4330_v9 = vpop.f32.mrb[51].mxu0  ;;  %v4657_v5 = vld [vmem:[%s8778_s10 + $0xa] ss:$0 sm:$0xff] }
 0x397   :  { %v203_v7 = vmul.f32 %v4657_v5, %v4655_v4  ;;  %v4660_v9 = vld [vmem:[%s8778_s10 + $0xb] ss:$0 sm:$0xff] }
 0x3a5   :  { %v4405_v10 = vpop.f32.mrb[50].mxu1 }
 0x3a6   :  { %v4409_v11 = vmax.f32 %v4332_v8, %v4405_v10  ;;  %v4407_v12 = vpop.f32.mrb[51].mxu1  ;;  %v4658_v8 = vld [vmem:[%s8768_s0 + $0x58] sm:$0xff] }
 0x3a7   :  { %v4661_v12 = vld [vmem:[%s8768_s0 + $0x60] sm:$0xff] }
 0x3b5   :  { %v4567_v42 = vpop.permute.xlu1 %4566 }
 0x3b6   :  { %v4569_v24 = vmax.f32 %v3946_v44, %v4567_v42  ;;  %v132_v44 = vadd.f32 %v131_v38, %v120_v37  ;;  %v4667_v42 = vld [vmem:[%s8768_s0 + $0x70] sm:$0xff]  ;;  %v311_v38 = vmul.f32 %v4684_v34, %v4682_v53 }
 0x3b7   :  { %v4482_v27 = vpop.f32.mrb[52].mxu0 }
 0x3b8   :  { %v4486_v36 = vmax.f32 %v4409_v11, %v4482_v27  ;;  %v4484_v14 = vpop.f32.mrb[53].mxu0  ;;  %v4576_v17 = vadd.f32 %v8615_v15, %v4569_v24  ;;  %v144_v13 = vadd.f32 %v143_v46, %v132_v44  ;;  %v215_v11 = vmul.f32 %v4660_v9, %v4658_v8  ;;  %v4663_v27 = vld [vmem:[%s8778_s10 + $0xc] ss:$0 sm:$0xff] }
 0x3b9   :  { %v227_v14 = vmul.f32 %v4663_v27, %v4661_v12 }
 0x3ba   :  { %v4577_v25 = vmax.f32 %v4576_v17, 0.0  ;;  %v156_v56 = vadd.f32 %v155_v51, %v144_v13  ;;  %v4670_v17 = vld [vmem:[%s8768_s0 + $0x78] sm:$0xff] }
 0x3bb   :  { %v263_v48 = vmul.f32 %v4672_v22, %v4670_v17 }
 0x3bc   :  { %v168_v60 = vadd.f32 %v167_v57, %v156_v56 }
 0x3be   :  { %v180_v0 = vadd.f32 %v179_v61, %v168_v60 }
 0x3c0   :  { %v192_v6 = vadd.f32 %v191_v3, %v180_v0 }
 0x3c2   :  { %v204_v10 = vadd.f32 %v203_v7, %v192_v6 }
 0x3c6   :  { %v321_v41 = vpop.permute.xlu1 %320 }
 0x3c7   :  { %v4559_v39 = vpop.f32.mrb[52].mxu1 }
 0x3c8   :  { %v8608_v20 = vmax.f32 %v4486_v36, %v4559_v39  ;;  %v4561_v21 = vpop.f32.mrb[53].mxu1  ;;  %v216_v36 = vadd.f32 %v215_v11, %v204_v10  ;;  %v4666_v39 = vld [vmem:[%s8778_s10 + $0xd] ss:$0 sm:$0xff] }
 0x3c9   :  { %v239_v21 = vmul.f32 %v4666_v39, %v4664_v16 }
 0x3ca   :  { %4579 = vrot.lane.b32.xlu0 %v8608_v20, %s7273_s20  ;;  %v228_v19 = vadd.f32 %v227_v14, %v216_v36 }
 0x3cc   :  { %v240_v24 = vadd.f32 %v239_v21, %v228_v19 }
 0x3ce   :  { %1790 = vrot.lane.b32.xlu0 %v7922_v32, %s7273_s20  ;;  %s7278_s20 = smov 64  }
 0x3d2   :  { %3222 = vrot.lane.b32.xlu0 %v3213_v18, %s7277_s5  ;;  %v251_v18 = vmul.f32 %v4669_v23, %v4667_v42  ;;  %s4613_s5 = sshll.u32 %s7279_s6, 4  ;;  %s4614_s5 = int_to_ptr.vmem [resolvable:$true] %s4613_s5 }
 0x3d3   :  { %s7214_s2 = scalar_lea.vmem %s4614_s5, 128  ;;  %p7219_p3 = scmp.lt.s32.totalorder %s4614_s5, %s4614_s5 }
 0x3d4   :  { %v252_v45 = vadd.f32 %v251_v18, %v240_v24  ;;  %p7215_p2 = scmp.ne.s32.totalorder %s4614_s5, %s7214_s2  ;;  %p7220_p4 = scmp.lt.s32.totalorder %s7214_s2, %s7214_s2 }
 0x3d6   :  { %4586 = vrot.lane.b32.xlu0 %v4577_v25, %s7278_s20  ;;  %v4675_v25 = vld [vmem:[%s8778_s10 + $0x10] ss:$0 sm:$0xff]  ;;  %v264_v26 = vadd.f32 %v263_v48, %v252_v45  ;;  %p7221_p5 = por %p7220_p4, %p7219_p3 }
 0x3d7   :  { %v275_v35 = vmul.f32 %v4675_v25, %v4673_v52 }
 0x3d8   :  { %p7222_p6 = pnand %p7221_p5, %p7215_p2 }
 0x3d9   :  { %v276_v1 = vadd.f32 %v275_v35, %v264_v26 }
 0x3db   :  { %v288_v33 = vadd.f32 %v287_v30, %v276_v1 }
 0x3dd   :  { %v300_v37 = vadd.f32 %v299_v2, %v288_v33 }
 0x3df   :  { %v312_v40 = vadd.f32 %v311_v38, %v300_v37 }
 0x3e1   :  { %v323_v44 = vadd.f32 %v321_v41, %v312_v40 }
 0x3e3   :  { %v324_v46 = vmax.f32 %v323_v44, 0.0 }
 0x3e5   :  { %326 = vst.msk [vmem:[#allocation9] sm:$0xff] %vm325_vm8, %v324_v46 }
 0x3e6   :  { %7225 = shalt.err (!%p7222_p6)
}
 0x3e7   :  { %s7226_s11 = scalar_lea.hbm %s8781_s13, 128 }
 0x3e8   :  { %p7227_p7 = scmp.ne.s32.totalorder %s8781_s13, %s7226_s11  ;;  %p7230_p8 = scmp.lt.u32.totalorder %s7226_s11, %s8781_s13 }
 0x3ea   :  { %p7232_p9 = pnand %p7230_p8, %p7227_p7 }
 0x3ec   :  { %7235 = shalt.err (!%p7232_p9)
}
 0x3ed   :  { %4616 = dma.vmem_to_hbm [thread:$0]  %s4614_s5, 128, %s8781_s13, [#allocation10]   ;;  %v1813_v56 = vpop.permute.xlu1 %1812  ;;  %vm1809_vm9 = vcmask 130048   ;;  %vm1815_vm10 = vcmask 261248   ;;  %vm3225_vm11 = vcmask 392448   ;;  %vm3231_vm12 = vcmask 523648  }
 0x3ee   :  { %s7280_s24 = smov 80   ;;  %vm4589_vm13 = vcmask 654848   ;;  %s7281_s13 = smov [#allocation8]   ;;  %vm4595_vm14 = vcmask 786048  }
 0x3ef   :  { %s4603_s25 = sshll.u32 %s7281_s13, 4  ;;  %s4604_s25 = int_to_ptr.vmem [resolvable:$true] %s4603_s25 }
 0x3f0   :  { %s7236_s26 = scalar_lea.vmem %s4604_s25, 128  ;;  %p7241_p11 = scmp.lt.s32.totalorder %s4604_s25, %s4604_s25 }
 0x3f1   :  { %p7237_p10 = scmp.ne.s32.totalorder %s4604_s25, %s7236_s26  ;;  %p7242_p12 = scmp.lt.s32.totalorder %s7236_s26, %s7236_s26 }
 0x3f3   :  { %p7243_p13 = por %p7242_p12, %p7241_p11 }
 0x3f5   :  { %p7244_p0 = pnand %p7243_p13, %p7237_p10 }
 0x43c   :  { %v4580_v47 = vpop.permute.xlu0 %4579 }
 0x43d   :  { %v4582_v50 = vmax.f32 %v8608_v20, %v4580_v47  ;;  %v3229_v20 = vpop.permute.xlu1 %3228 }
 0x43f   :  { %v4583_v13 = vadd.f32 %v8615_v15, %v4582_v50 }
 0x440   :  { %v1791_v51 = vpop.permute.xlu0 %1790 }
 0x441   :  { %v4584_v54 = vmax.f32 %v4583_v13, 0.0  ;;  %v1793_v55 = vmax.f32 %v7922_v32, %v1791_v51 }
 0x443   :  { %v1800_v57 = vadd.f32 %v8595_v49, %v1793_v55  ;;  %4592 = vrot.lane.b32.xlu1 %v4584_v54, %s7280_s24 }
 0x444   :  { %v3223_v58 = vpop.permute.xlu0 %3222 }
 0x445   :  { %v1801_v59 = vmax.f32 %v1800_v57, 0.0 }
 0x447   :  { %1810 = vst.msk [vmem:[#allocation8] sm:$0xff] %vm1809_vm9, %v1801_v59 }
 0x448   :  { %1816 = vst.msk [vmem:[#allocation8] sm:$0xff] %vm1815_vm10, %v1813_v56  ;;  %v4587_v15 = vpop.permute.xlu0 %4586 }
 0x449   :  { %3226 = vst.msk [vmem:[#allocation8] sm:$0xff] %vm3225_vm11, %v3223_v58 }
 0x44a   :  { %3232 = vst.msk [vmem:[#allocation8] sm:$0xff] %vm3231_vm12, %v3229_v20 }
 0x44b   :  { %4590 = vst.msk [vmem:[#allocation8] sm:$0xff] %vm4589_vm13, %v4587_v15 }
 0x4b5   :  { %v4593_v32 = vpop.permute.xlu1 %4592 }
 0x4b6   :  { %4596 = vst.msk [vmem:[#allocation8] sm:$0xff] %vm4595_vm14, %v4593_v32 }
 0x4b7   :  { %7247 = shalt.err (!%p7244_p0)
}
 0x4b8   :  { %s7248_s30 = scalar_lea.hbm %s8780_s12, 128 }
 0x4b9   :  { %p7249_p1 = scmp.ne.s32.totalorder %s8780_s12, %s7248_s30  ;;  %p7252_p2 = scmp.lt.u32.totalorder %s7248_s30, %s8780_s12 }
 0x4bb   :  { %p7254_p3 = pnand %p7252_p2, %p7249_p1 }
 0x4bd   :  { %7257 = shalt.err (!%p7254_p3)
}
 0x4be   :  { %4606 = dma.vmem_to_hbm [thread:$0]  %s4604_s25, 128, %s8780_s12, [#allocation5]  }
 0x4bf   :  { %7262 = dma.done.wait [#allocation5], 128  }
 0x4c0   :  { %7263 = vsyncadd [#allocation5], 4294967168 }
 0x4c1   :  { %7264 = dma.done.wait [#allocation10], 128  }
 0x4c2   :  { %7265 = vsyncadd [#allocation10], 4294967168 }
 0x4c3   :  { %4623 = vsyncpa [#allocation4], 1 }
 0x4c4   :  { %4624 = vsyncpa [#allocation7], 1 }
 0x4c5   :  { %4625 = vsyncpa [#allocation5], 1 }
 0x4c6   :  { %4626 = vsyncpa [#allocation10], 1 }

</bundles_post_ra>
